<compile_context>
chip_gen: v7x
topology: tpu7x:2x2x1
jax: 0.10.0
libtpu: 0.0.40
codegen_flags: <defaults>
</compile_context>

<pallas_src>
import functools

import jax
import jax.numpy as jnp
import numpy as np
from jax.experimental import pallas as pl
from jax.experimental.pallas import tpu as pltpu


def _round_up(x, m):
    return (x + m - 1) // m * m


def _pick_block_m(m, target_blocks=4, max_block=2048):
    """Lane-block size (multiple of 128).  Small layers get one full block
    (no padding waste, no extra grid steps); big layers get ~4 blocks so both
    v7x TensorCores run >=2 pipeline steps and tap DMA overlaps compute
    (also amortizes pipeline fill on the single-TC v5e/v6e)."""
    if m <= 1024:
        return _round_up(m, 128)
    return min(max_block, _round_up(pl.cdiv(m, target_blocks), 128))


# ----------------------------- Pallas kernels ------------------------------ #

def _conv_bn_relu_pool_kernel(p_ref, w_ref, shift_ref, o_ref):
    # p_ref:  (4, K, bm) bf16 im2col taps, one per 2x2 maxpool-window phase.
    # w_ref:  (Cout, K) bf16 with the BN scale folded in.
    # shift_ref: (Cout, 1) f32.  o_ref: (Cout, bm) bf16 (lane-dense).
    w = w_ref[...]
    acc = jnp.dot(w, p_ref[0], preferred_element_type=jnp.float32)
    for t in range(1, 4):
        acc = jnp.maximum(
            acc, jnp.dot(w, p_ref[t], preferred_element_type=jnp.float32))
    # maxpool(relu(scale*conv + shift)) == relu(max_t(scale*conv_t) + shift)
    o_ref[...] = jnp.maximum(acc + shift_ref[...], 0.0).astype(o_ref.dtype)


def _tail_kernel(p_ref, w2_ref, sh2_ref, sel_ref, w3_ref, sh3_ref,
                 pool_ref, fcw_ref, fcb_ref, o_ref):
    # Fused conv2+BN+ReLU+maxpool -> conv3+BN+ReLU -> AvgPool2d -> fc.
    #  p_ref:   (4, K2, M2) bf16 layer-2 im2col taps (one per maxpool phase)
    #  w2_ref:  (C, K2) bf16 (BN folded), sh2_ref: (C, 1) f32
    #  sel_ref: (9, M2, M3) bf16 0/1 column-selection ("im2col as matmul")
    #  w3_ref:  (9, C, C) bf16 (BN folded, per conv3 tap), sh3_ref: (C, 1) f32
    #  pool_ref:(M3, N) f32 avg-pool matrix, fcw_ref: (nc, C) f32,
    #  fcb_ref: (nc, 1) f32, o_ref: (nc, N) f32 transposed logits.
    w2 = w2_ref[...]
    acc2 = jnp.dot(w2, p_ref[0], preferred_element_type=jnp.float32)
    for t in range(1, 4):
        acc2 = jnp.maximum(
            acc2, jnp.dot(w2, p_ref[t], preferred_element_type=jnp.float32))
    y2 = jnp.maximum(acc2 + sh2_ref[...], 0.0).astype(jnp.bfloat16)   # (C, M2)

    # conv3: the stride-2 im2col gather stays in VMEM as exact 0/1 selection
    # matmuls on the bf16 activations (no HBM round trip, no extra launch).
    def tap(t):
        return jnp.dot(y2, sel_ref[t],
                       preferred_element_type=jnp.float32).astype(jnp.bfloat16)

    acc3 = jnp.dot(w3_ref[0], tap(0), preferred_element_type=jnp.float32)
    for t in range(1, 9):
        acc3 += jnp.dot(w3_ref[t], tap(t), preferred_element_type=jnp.float32)
    y3 = jnp.maximum(acc3 + sh3_ref[...], 0.0)                        # (C, M3)

    pooled = jnp.dot(y3, pool_ref[...], preferred_element_type=jnp.float32)
    o_ref[...] = (jnp.dot(fcw_ref[...], pooled,
                          preferred_element_type=jnp.float32)
                  + fcb_ref[...]).astype(o_ref.dtype)


# ------------------------------ Pallas wrappers ----------------------------- #

def conv_bn_relu_pool(taps, w_t, shift):
    """Fused conv+BN+ReLU+maxpool2x2: relu(max_t(w_t @ taps[t]) + shift)."""
    _, k, m = taps.shape
    cout = w_t.shape[0]
    block_m = _pick_block_m(m)
    mp = _round_up(m, block_m)
    if mp != m:
        taps = jnp.pad(taps, ((0, 0), (0, 0), (0, mp - m)))
    flops = 2 * 4 * cout * k * mp
    bytes_accessed = (4 * k * mp + cout * mp + cout * k) * 2 + cout * 4
    out = pl.pallas_call(
        _conv_bn_relu_pool_kernel,
        out_shape=jax.ShapeDtypeStruct((cout, mp), jnp.bfloat16),
        grid=(mp // block_m,),
        in_specs=[
            pl.BlockSpec((4, k, block_m), lambda i: (0, 0, i)),
            pl.BlockSpec((cout, k), lambda i: (0, 0)),
            pl.BlockSpec((cout, 1), lambda i: (0, 0)),
        ],
        out_specs=pl.BlockSpec((cout, block_m), lambda i: (0, i)),
        compiler_params=pltpu.CompilerParams(
            dimension_semantics=("parallel",)),
        cost_estimate=pl.CostEstimate(
            flops=flops, transcendentals=0, bytes_accessed=bytes_accessed),
    )(taps, w_t, shift)
    return out[:, :m]


def conv_pool_conv_head(taps2, w2_t, sh2, sel, w3_t, sh3, pool_mat, fc_w, fc_b):
    """Fused conv2+BN+ReLU+maxpool + conv3+BN+ReLU + AvgPool + flatten + fc."""
    _, k2, m2 = taps2.shape
    cout = w2_t.shape[0]
    m3 = sel.shape[2]
    nc = fc_w.shape[0]
    n = pool_mat.shape[1]
    flops = (2 * 4 * cout * k2 * m2 + 9 * 2 * cout * m2 * m3
             + 9 * 2 * cout * cout * m3 + 2 * cout * m3 * n + 2 * nc * cout * n)
    bytes_accessed = ((4 * k2 * m2 + 9 * m2 * m3 + cout * k2 + 9 * cout * cout) * 2
                      + (m3 * n + nc * cout + nc + 2 * cout + nc * n) * 4)
    out_t = pl.pallas_call(
        _tail_kernel,
        out_shape=jax.ShapeDtypeStruct((nc, n), jnp.float32),
        grid=(1,),
        in_specs=[
            pl.BlockSpec((4, k2, m2), lambda i: (0, 0, 0)),
            pl.BlockSpec((cout, k2), lambda i: (0, 0)),
            pl.BlockSpec((cout, 1), lambda i: (0, 0)),
            pl.BlockSpec((9, m2, m3), lambda i: (0, 0, 0)),
            pl.BlockSpec((9, cout, cout), lambda i: (0, 0, 0)),
            pl.BlockSpec((cout, 1), lambda i: (0, 0)),
            pl.BlockSpec((m3, n), lambda i: (0, 0)),
            pl.BlockSpec((nc, cout), lambda i: (0, 0)),
            pl.BlockSpec((nc, 1), lambda i: (0, 0)),
        ],
        out_specs=pl.BlockSpec((nc, n), lambda i: (0, 0)),
        compiler_params=pltpu.CompilerParams(
            dimension_semantics=("arbitrary",)),
        cost_estimate=pl.CostEstimate(
            flops=flops, transcendentals=0, bytes_accessed=bytes_accessed),
    )(taps2, w2_t, sh2, sel, w3_t, sh3, pool_mat, fc_w, fc_b)
    return out_t.T                                            # (N, num_classes)


# ------------------------------- JAX glue ----------------------------------- #

def pooled_conv_taps(x_cm, k, ph, pw):
    """x_cm: (C, N, H, W) -> (4, C*k*k, N*ph*pw) bf16 im2col taps grouped by
    the 2x2 maxpool-window phase (a, b).  Feature order (c, kh, kw) matches
    torch_weight.reshape(Cout, Cin*k*k); only conv outputs that survive the
    floor-mode pooling are ever gathered/computed."""
    c, n, _, _ = x_cm.shape
    taps = []
    for a in (0, 1):
        for b in (0, 1):
            feats = []
            for kh in range(k):
                for kw in range(k):
                    r0, c0 = 2 * a + kh, 2 * b + kw
                    feats.append(
                        x_cm[:, :, r0:r0 + 4 * (ph - 1) + 1:4,
                             c0:c0 + 4 * (pw - 1) + 1:4])
            f = jnp.stack(feats, axis=1)                  # (C, k*k, N, ph, pw)
            taps.append(f.reshape(c * k * k, n * ph * pw))
    return jnp.stack(taps, axis=0).astype(jnp.bfloat16)


def fold_conv_bn(w, b, gamma, beta, mean, var, eps=1e-5):
    """Fold conv bias + inference-mode BatchNorm; BN scale folded into the
    (transposed) weights so the kernel epilogue is only shift + ReLU."""
    s = gamma / jnp.sqrt(var + eps)                              # (Cout,)
    w_t = (w.reshape(w.shape[0], -1) * s[:, None]).astype(jnp.bfloat16)
    shift = (s * b + beta - s * mean).reshape(-1, 1).astype(jnp.float32)
    return w_t, shift


def fold_conv_bn_by_tap(w, b, gamma, beta, mean, var, eps=1e-5):
    """Same fold, but weights grouped per conv tap: (k*k, Cout, Cin) bf16."""
    s = gamma / jnp.sqrt(var + eps)
    w_f = w * s[:, None, None, None]                       # (Cout, Cin, k, k)
    w_t = jnp.transpose(w_f, (2, 3, 0, 1)).reshape(
        w.shape[2] * w.shape[3], w.shape[0], w.shape[1]).astype(jnp.bfloat16)
    shift = (s * b + beta - s * mean).reshape(-1, 1).astype(jnp.float32)
    return w_t, shift


def build_conv3_selection(n, hi, wi, ho, wo, k=3, s=2):
    """(k*k, n*hi*wi, n*ho*wo) 0/1 matrices: column m' of sel[t] picks the
    source activation column of conv3 tap t=(kh,kw) (exact in bf16)."""
    m2, m3 = n * hi * wi, n * ho * wo
    sel = np.zeros((k * k, m2, m3), np.float32)
    for kh in range(k):
        for kw in range(k):
            t = kh * k + kw
            for b in range(n):
                for ph in range(ho):
                    for pw in range(wo):
                        src = b * hi * wi + (s * ph + kh) * wi + (s * pw + kw)
                        dst = b * ho * wo + ph * wo + pw
                        sel[t, src, dst] = 1.0
    return jnp.asarray(sel, jnp.bfloat16)


def build_avgpool_matrix(n, s3):
    """(n*s3, n) matrix: global average over each image's s3 spatial lanes."""
    p = np.kron(np.eye(n, dtype=np.float32),
                np.ones((s3, 1), np.float32) / s3)
    return jnp.asarray(p)


def _conv_out(h, k=3, s=2):
    return (h - k) // s + 1


def init_params(key, num_classes=2):
    ks = jax.random.split(key, 10)
    p = {}
    p["w1"] = 0.05 * jax.random.normal(ks[0], (16, 3, 3, 3), jnp.float32)
    p["b1"] = 0.05 * jax.random.normal(ks[1], (16,), jnp.float32)
    p["w2"] = 0.05 * jax.random.normal(ks[2], (16, 16, 3, 3), jnp.float32)
    p["b2"] = 0.05 * jax.random.normal(ks[3], (16,), jnp.float32)
    p["w3"] = 0.05 * jax.random.normal(ks[4], (16, 16, 3, 3), jnp.float32)
    p["b3"] = 0.05 * jax.random.normal(ks[5], (16,), jnp.float32)
    for i, kk in zip((1, 2, 3), (ks[6], ks[7], ks[8])):
        sub = jax.random.split(kk, 4)
        p[f"bn{i}_gamma"] = 1.0 + 0.1 * jax.random.normal(sub[0], (16,), jnp.float32)
        p[f"bn{i}_beta"] = 0.1 * jax.random.normal(sub[1], (16,), jnp.float32)
        p[f"bn{i}_mean"] = 0.1 * jax.random.normal(sub[2], (16,), jnp.float32)
        p[f"bn{i}_var"] = 1.0 + 0.1 * jax.random.uniform(sub[3], (16,), jnp.float32)
    p["fc_w"] = 0.1 * jax.random.normal(ks[9], (num_classes, 16), jnp.float32)
    p["fc_b"] = jnp.zeros((num_classes,), jnp.float32)
    return p


def simplify_net_forward(params, x_nchw):
    n, _, h, w = x_nchw.shape
    # channels-major internal layout (C, N, H, W); spatial on lanes; bf16 so
    # the layer-1 im2col gather fusion moves half the bytes.
    x = jnp.transpose(x_nchw, (1, 0, 2, 3)).astype(jnp.bfloat16)

    # block 1: conv1(3->16, k3 s2) + BN + ReLU + maxpool2x2 (kernel A, bf16 out)
    w1, sh1 = fold_conv_bn(params["w1"], params["b1"], params["bn1_gamma"],
                           params["bn1_beta"], params["bn1_mean"],
                           params["bn1_var"])
    ph1, pw1 = _conv_out(h) // 2, _conv_out(w) // 2
    y = conv_bn_relu_pool(pooled_conv_taps(x, 3, ph1, pw1), w1, sh1)
    y = y.reshape(-1, n, ph1, pw1)

    # blocks 2+3+head: one fused kernel (kernel B); layer-2/3 activations stay
    # in VMEM, conv3's im2col runs in-kernel as selection matmuls.
    w2, sh2 = fold_conv_bn(params["w2"], params["b2"], params["bn2_gamma"],
                           params["bn2_beta"], params["bn2_mean"],
                           params["bn2_var"])
    ph2, pw2 = _conv_out(ph1) // 2, _conv_out(pw1) // 2
    taps2 = pooled_conv_taps(y, 3, ph2, pw2)

    oh3, ow3 = _conv_out(ph2), _conv_out(pw2)
    assert oh3 == 6 and ow3 == 6, "AvgPool2d(6) head expects a 6x6 feature map"
    w3, sh3 = fold_conv_bn_by_tap(params["w3"], params["b3"],
                                  params["bn3_gamma"], params["bn3_beta"],
                                  params["bn3_mean"], params["bn3_var"])
    sel = build_conv3_selection(n, ph2, pw2, oh3, ow3)
    pool_mat = build_avgpool_matrix(n, oh3 * ow3)
    return conv_pool_conv_head(taps2, w2, sh2, sel, w3, sh3, pool_mat,
                               params["fc_w"].astype(jnp.float32),
                               params["fc_b"].reshape(-1, 1).astype(jnp.float32))


if __name__ == "__main__":
    key = jax.random.PRNGKey(0)
    kx, kp = jax.random.split(key)
    # Smallest "natural" shape consistent with the module: AvgPool2d(6) + the
    # 16-feature fc require a 6x6 map after conv3, i.e. ~224x224 input.
    x = jax.random.normal(kx, (2, 3, 224, 224), dtype=jnp.float32)
    params = init_params(kp, num_classes=2)

    fwd = jax.jit(functools.partial(simplify_net_forward, params))
    out = fwd(x)
    jax.block_until_ready(out)
    assert out.shape == (2, 2) and out.dtype == jnp.float32
    print("KERNEL_OK")
</pallas_src>

<mosaic_0001>
module attributes {stable_mosaic.version = 11 : i64} {
  func.func @_conv_bn_relu_pool_kernel(%arg0: i32, %arg1: memref<4x27x1536xbf16, #tpu.memory_space<vmem>>, %arg2: memref<16x27xbf16, #tpu.memory_space<vmem>>, %arg3: memref<16x1xf32, #tpu.memory_space<vmem>>, %arg4: memref<16x1536xbf16, #tpu.memory_space<vmem>>) attributes {dimension_semantics = [#tpu.dimension_semantics<parallel>], iteration_bounds = array<i64: 4>, scalar_prefetch = 0 : i64, scratch_operands = 0 : i64, tpu.core_type = #tpu.core_type<tc>, window_params = [{transform_indices = @transform_0, window_bounds = array<i64: 4, 27, 1536>}, {pipeline_mode = #tpu.pipeline_mode<synchronous>, transform_indices = @transform_1, window_bounds = array<i64: 16, 27>}, {pipeline_mode = #tpu.pipeline_mode<synchronous>, transform_indices = @transform_2, window_bounds = array<i64: 16, 1>}, {transform_indices = @transform_3, window_bounds = array<i64: 16, 1536>}]} {
    %c0 = arith.constant 0 : index
    %c0_0 = arith.constant 0 : index
    %0 = vector.load %arg2[%c0, %c0_0] : memref<16x27xbf16, #tpu.memory_space<vmem>>, vector<16x27xbf16>
    %c0_1 = arith.constant 0 : index
    %c0_2 = arith.constant 0 : index
    %c0_3 = arith.constant 0 : index
    %1 = vector.load %arg1[%c0_1, %c0_2, %c0_3] : memref<4x27x1536xbf16, #tpu.memory_space<vmem>>, vector<1x27x1536xbf16>
    %2 = vector.shape_cast %1 : vector<1x27x1536xbf16> to vector<27x1536xbf16>
    %cst = arith.constant dense<0.000000e+00> : vector<16x1536xf32>
    %3 = tpu.matmul %0, %2, %cst {dimension_numbers = #tpu.dot_dimension_numbers<[1], [0], [0], [1], [0, 0, 1, 1], [], []>} : vector<16x27xbf16>, vector<27x1536xbf16>, vector<16x1536xf32> -> vector<16x1536xf32>
    %c1 = arith.constant 1 : index
    %c0_4 = arith.constant 0 : index
    %c0_5 = arith.constant 0 : index
    %4 = vector.load %arg1[%c1, %c0_4, %c0_5] : memref<4x27x1536xbf16, #tpu.memory_space<vmem>>, vector<1x27x1536xbf16>
    %5 = vector.shape_cast %4 : vector<1x27x1536xbf16> to vector<27x1536xbf16>
    %cst_6 = arith.constant dense<0.000000e+00> : vector<16x1536xf32>
    %6 = tpu.matmul %0, %5, %cst_6 {dimension_numbers = #tpu.dot_dimension_numbers<[1], [0], [0], [1], [0, 0, 1, 1], [], []>} : vector<16x27xbf16>, vector<27x1536xbf16>, vector<16x1536xf32> -> vector<16x1536xf32>
    %7 = arith.maximumf %3, %6 : vector<16x1536xf32>
    %c2 = arith.constant 2 : index
    %c0_7 = arith.constant 0 : index
    %c0_8 = arith.constant 0 : index
    %8 = vector.load %arg1[%c2, %c0_7, %c0_8] : memref<4x27x1536xbf16, #tpu.memory_space<vmem>>, vector<1x27x1536xbf16>
    %9 = vector.shape_cast %8 : vector<1x27x1536xbf16> to vector<27x1536xbf16>
    %cst_9 = arith.constant dense<0.000000e+00> : vector<16x1536xf32>
    %10 = tpu.matmul %0, %9, %cst_9 {dimension_numbers = #tpu.dot_dimension_numbers<[1], [0], [0], [1], [0, 0, 1, 1], [], []>} : vector<16x27xbf16>, vector<27x1536xbf16>, vector<16x1536xf32> -> vector<16x1536xf32>
    %11 = arith.maximumf %7, %10 : vector<16x1536xf32>
    %c3 = arith.constant 3 : index
    %c0_10 = arith.constant 0 : index
    %c0_11 = arith.constant 0 : index
    %12 = vector.load %arg1[%c3, %c0_10, %c0_11] : memref<4x27x1536xbf16, #tpu.memory_space<vmem>>, vector<1x27x1536xbf16>
    %13 = vector.shape_cast %12 : vector<1x27x1536xbf16> to vector<27x1536xbf16>
    %cst_12 = arith.constant dense<0.000000e+00> : vector<16x1536xf32>
    %14 = tpu.matmul %0, %13, %cst_12 {dimension_numbers = #tpu.dot_dimension_numbers<[1], [0], [0], [1], [0, 0, 1, 1], [], []>} : vector<16x27xbf16>, vector<27x1536xbf16>, vector<16x1536xf32> -> vector<16x1536xf32>
    %15 = arith.maximumf %11, %14 : vector<16x1536xf32>
    %c0_13 = arith.constant 0 : index
    %c0_14 = arith.constant 0 : index
    %16 = vector.load %arg3[%c0_13, %c0_14] : memref<16x1xf32, #tpu.memory_space<vmem>>, vector<16x1xf32>
    %17 = vector.broadcast %16 : vector<16x1xf32> to vector<16x1536xf32>
    %18 = arith.addf %15, %17 : vector<16x1536xf32>
    %cst_15 = arith.constant 0.000000e+00 : f32
    %19 = vector.broadcast %cst_15 : f32 to vector<16x1536xf32>
    %20 = arith.maximumf %18, %19 : vector<16x1536xf32>
    %21 = arith.truncf %20 : vector<16x1536xf32> to vector<16x1536xbf16>
    %c0_16 = arith.constant 0 : index
    %c0_17 = arith.constant 0 : index
    %22 = vector.load %arg4[%c0_16, %c0_17] : memref<16x1536xbf16, #tpu.memory_space<vmem>>, vector<16x1536xbf16>
    tpu.vector_store %arg4[%c0_16, %c0_17], %21 {strides = array<i32>} : memref<16x1536xbf16, #tpu.memory_space<vmem>>, vector<16x1536xbf16>,
    return
  }
  func.func @transform_0(%arg0: i32) -> (i32, i32, i32) {
    %c0_i32 = arith.constant 0 : i32
    %c0_i32_0 = arith.constant 0 : i32
    %c0_i32_1 = arith.constant 0 : i32
    return %c0_i32, %c0_i32_0, %arg0 : i32, i32, i32
  }
  func.func @transform_1(%arg0: i32) -> (i32, i32) {
    %c0_i32 = arith.constant 0 : i32
    %c0_i32_0 = arith.constant 0 : i32
    %c0_i32_1 = arith.constant 0 : i32
    return %c0_i32, %c0_i32_0 : i32, i32
  }
  func.func @transform_2(%arg0: i32) -> (i32, i32) {
    %c0_i32 = arith.constant 0 : i32
    %c0_i32_0 = arith.constant 0 : i32
    %c0_i32_1 = arith.constant 0 : i32
    return %c0_i32, %c0_i32_0 : i32, i32
  }
  func.func @transform_3(%arg0: i32) -> (i32, i32) {
    %c0_i32 = arith.constant 0 : i32
    %c0_i32_0 = arith.constant 0 : i32
    return %c0_i32, %arg0 : i32, i32
  }
}

module attributes {stable_mosaic.version = 11 : i64} {
  func.func @_tail_kernel(%arg0: i32, %arg1: memref<4x144x338xbf16, #tpu.memory_space<vmem>>, %arg2: memref<16x144xbf16, #tpu.memory_space<vmem>>, %arg3: memref<16x1xf32, #tpu.memory_space<vmem>>, %arg4: memref<9x338x72xbf16, #tpu.memory_space<vmem>>, %arg5: memref<9x16x16xbf16, #tpu.memory_space<vmem>>, %arg6: memref<16x1xf32, #tpu.memory_space<vmem>>, %arg7: memref<72x2xf32, #tpu.memory_space<vmem>>, %arg8: memref<2x16xf32, #tpu.memory_space<vmem>>, %arg9: memref<2x1xf32, #tpu.memory_space<vmem>>, %arg10: memref<2x2xf32, #tpu.memory_space<vmem>>) attributes {dimension_semantics = [#tpu.dimension_semantics<arbitrary>], iteration_bounds = array<i64: 1>, scalar_prefetch = 0 : i64, scratch_operands = 0 : i64, tpu.core_type = #tpu.core_type<tc>, window_params = [{pipeline_mode = #tpu.pipeline_mode<synchronous>, transform_indices = @transform_0, window_bounds = array<i64: 4, 144, 338>}, {pipeline_mode = #tpu.pipeline_mode<synchronous>, transform_indices = @transform_1, window_bounds = array<i64: 16, 144>}, {pipeline_mode = #tpu.pipeline_mode<synchronous>, transform_indices = @transform_2, window_bounds = array<i64: 16, 1>}, {pipeline_mode = #tpu.pipeline_mode<synchronous>, transform_indices = @transform_3, window_bounds = array<i64: 9, 338, 72>}, {pipeline_mode = #tpu.pipeline_mode<synchronous>, transform_indices = @transform_4, window_bounds = array<i64: 9, 16, 16>}, {pipeline_mode = #tpu.pipeline_mode<synchronous>, transform_indices = @transform_5, window_bounds = array<i64: 16, 1>}, {pipeline_mode = #tpu.pipeline_mode<synchronous>, transform_indices = @transform_6, window_bounds = array<i64: 72, 2>}, {pipeline_mode = #tpu.pipeline_mode<synchronous>, transform_indices = @transform_7, window_bounds = array<i64: 2, 16>}, {pipeline_mode = #tpu.pipeline_mode<synchronous>, transform_indices = @transform_8, window_bounds = array<i64: 2, 1>}, {pipeline_mode = #tpu.pipeline_mode<synchronous>, transform_indices = @transform_9, window_bounds = array<i64: 2, 2>}]} {
    %c0 = arith.constant 0 : index
    %c0_0 = arith.constant 0 : index
    %0 = vector.load %arg2[%c0, %c0_0] : memref<16x144xbf16, #tpu.memory_space<vmem>>, vector<16x144xbf16>
    %c0_1 = arith.constant 0 : index
    %c0_2 = arith.constant 0 : index
    %c0_3 = arith.constant 0 : index
    %1 = vector.load %arg1[%c0_1, %c0_2, %c0_3] : memref<4x144x338xbf16, #tpu.memory_space<vmem>>, vector<1x144x338xbf16>
    %2 = vector.shape_cast %1 : vector<1x144x338xbf16> to vector<144x338xbf16>
    %cst = arith.constant dense<0.000000e+00> : vector<16x338xf32>
    %3 = tpu.matmul %0, %2, %cst {dimension_numbers = #tpu.dot_dimension_numbers<[1], [0], [0], [1], [0, 0, 1, 1], [], []>} : vector<16x144xbf16>, vector<144x338xbf16>, vector<16x338xf32> -> vector<16x338xf32>
    %c1 = arith.constant 1 : index
    %c0_4 = arith.constant 0 : index
    %c0_5 = arith.constant 0 : index
    %4 = vector.load %arg1[%c1, %c0_4, %c0_5] : memref<4x144x338xbf16, #tpu.memory_space<vmem>>, vector<1x144x338xbf16>
    %5 = vector.shape_cast %4 : vector<1x144x338xbf16> to vector<144x338xbf16>
    %cst_6 = arith.constant dense<0.000000e+00> : vector<16x338xf32>
    %6 = tpu.matmul %0, %5, %cst_6 {dimension_numbers = #tpu.dot_dimension_numbers<[1], [0], [0], [1], [0, 0, 1, 1], [], []>} : vector<16x144xbf16>, vector<144x338xbf16>, vector<16x338xf32> -> vector<16x338xf32>
    %7 = arith.maximumf %3, %6 : vector<16x338xf32>
    %c2 = arith.constant 2 : index
    %c0_7 = arith.constant 0 : index
    %c0_8 = arith.constant 0 : index
    %8 = vector.load %arg1[%c2, %c0_7, %c0_8] : memref<4x144x338xbf16, #tpu.memory_space<vmem>>, vector<1x144x338xbf16>
    %9 = vector.shape_cast %8 : vector<1x144x338xbf16> to vector<144x338xbf16>
    %cst_9 = arith.constant dense<0.000000e+00> : vector<16x338xf32>
    %10 = tpu.matmul %0, %9, %cst_9 {dimension_numbers = #tpu.dot_dimension_numbers<[1], [0], [0], [1], [0, 0, 1, 1], [], []>} : vector<16x144xbf16>, vector<144x338xbf16>, vector<16x338xf32> -> vector<16x338xf32>
    %11 = arith.maximumf %7, %10 : vector<16x338xf32>
    %c3 = arith.constant 3 : index
    %c0_10 = arith.constant 0 : index
    %c0_11 = arith.constant 0 : index
    %12 = vector.load %arg1[%c3, %c0_10, %c0_11] : memref<4x144x338xbf16, #tpu.memory_space<vmem>>, vector<1x144x338xbf16>
    %13 = vector.shape_cast %12 : vector<1x144x338xbf16> to vector<144x338xbf16>
    %cst_12 = arith.constant dense<0.000000e+00> : vector<16x338xf32>
    %14 = tpu.matmul %0, %13, %cst_12 {dimension_numbers = #tpu.dot_dimension_numbers<[1], [0], [0], [1], [0, 0, 1, 1], [], []>} : vector<16x144xbf16>, vector<144x338xbf16>, vector<16x338xf32> -> vector<16x338xf32>
    %15 = arith.maximumf %11, %14 : vector<16x338xf32>
    %c0_13 = arith.constant 0 : index
    %c0_14 = arith.constant 0 : index
    %16 = vector.load %arg3[%c0_13, %c0_14] : memref<16x1xf32, #tpu.memory_space<vmem>>, vector<16x1xf32>
    %17 = vector.broadcast %16 : vector<16x1xf32> to vector<16x338xf32>
    %18 = arith.addf %15, %17 : vector<16x338xf32>
    %cst_15 = arith.constant 0.000000e+00 : f32
    %19 = vector.broadcast %cst_15 : f32 to vector<16x338xf32>
    %20 = arith.maximumf %18, %19 : vector<16x338xf32>
    %21 = arith.truncf %20 : vector<16x338xf32> to vector<16x338xbf16>
    %c0_16 = arith.constant 0 : index
    %c0_17 = arith.constant 0 : index
    %c0_18 = arith.constant 0 : index
    %22 = vector.load %arg5[%c0_16, %c0_17, %c0_18] : memref<9x16x16xbf16, #tpu.memory_space<vmem>>, vector<1x16x16xbf16>
    %23 = vector.shape_cast %22 : vector<1x16x16xbf16> to vector<16x16xbf16>
    %c0_19 = arith.constant 0 : index
    %c0_20 = arith.constant 0 : index
    %c0_21 = arith.constant 0 : index
    %24 = vector.load %arg4[%c0_19, %c0_20, %c0_21] : memref<9x338x72xbf16, #tpu.memory_space<vmem>>, vector<1x338x72xbf16>
    %25 = vector.shape_cast %24 : vector<1x338x72xbf16> to vector<338x72xbf16>
    %cst_22 = arith.constant dense<0.000000e+00> : vector<16x72xf32>
    %26 = tpu.matmul %21, %25, %cst_22 {dimension_numbers = #tpu.dot_dimension_numbers<[1], [0], [0], [1], [0, 0, 1, 1], [], []>} : vector<16x338xbf16>, vector<338x72xbf16>, vector<16x72xf32> -> vector<16x72xf32>
    %27 = arith.truncf %26 : vector<16x72xf32> to vector<16x72xbf16>
    %cst_23 = arith.constant dense<0.000000e+00> : vector<16x72xf32>
    %28 = tpu.matmul %23, %27, %cst_23 {dimension_numbers = #tpu.dot_dimension_numbers<[1], [0], [0], [1], [0, 0, 1, 1], [], []>} : vector<16x16xbf16>, vector<16x72xbf16>, vector<16x72xf32> -> vector<16x72xf32>
    %c1_24 = arith.constant 1 : index
    %c0_25 = arith.constant 0 : index
    %c0_26 = arith.constant 0 : index
    %29 = vector.load %arg5[%c1_24, %c0_25, %c0_26] : memref<9x16x16xbf16, #tpu.memory_space<vmem>>, vector<1x16x16xbf16>
    %30 = vector.shape_cast %29 : vector<1x16x16xbf16> to vector<16x16xbf16>
    %c1_27 = arith.constant 1 : index
    %c0_28 = arith.constant 0 : index
    %c0_29 = arith.constant 0 : index
    %31 = vector.load %arg4[%c1_27, %c0_28, %c0_29] : memref<9x338x72xbf16, #tpu.memory_space<vmem>>, vector<1x338x72xbf16>
    %32 = vector.shape_cast %31 : vector<1x338x72xbf16> to vector<338x72xbf16>
    %cst_30 = arith.constant dense<0.000000e+00> : vector<16x72xf32>
    %33 = tpu.matmul %21, %32, %cst_30 {dimension_numbers = #tpu.dot_dimension_numbers<[1], [0], [0], [1], [0, 0, 1, 1], [], []>} : vector<16x338xbf16>, vector<338x72xbf16>, vector<16x72xf32> -> vector<16x72xf32>
    %34 = arith.truncf %33 : vector<16x72xf32> to vector<16x72xbf16>
    %cst_31 = arith.constant dense<0.000000e+00> : vector<16x72xf32>
    %35 = tpu.matmul %30, %34, %cst_31 {dimension_numbers = #tpu.dot_dimension_numbers<[1], [0], [0], [1], [0, 0, 1, 1], [], []>} : vector<16x16xbf16>, vector<16x72xbf16>, vector<16x72xf32> -> vector<16x72xf32>
    %36 = arith.addf %28, %35 : vector<16x72xf32>
    %c2_32 = arith.constant 2 : index
    %c0_33 = arith.constant 0 : index
    %c0_34 = arith.constant 0 : index
    %37 = vector.load %arg5[%c2_32, %c0_33, %c0_34] : memref<9x16x16xbf16, #tpu.memory_space<vmem>>, vector<1x16x16xbf16>
    %38 = vector.shape_cast %37 : vector<1x16x16xbf16> to vector<16x16xbf16>
    %c2_35 = arith.constant 2 : index
    %c0_36 = arith.constant 0 : index
    %c0_37 = arith.constant 0 : index
    %39 = vector.load %arg4[%c2_35, %c0_36, %c0_37] : memref<9x338x72xbf16, #tpu.memory_space<vmem>>, vector<1x338x72xbf16>
    %40 = vector.shape_cast %39 : vector<1x338x72xbf16> to vector<338x72xbf16>
    %cst_38 = arith.constant dense<0.000000e+00> : vector<16x72xf32>
    %41 = tpu.matmul %21, %40, %cst_38 {dimension_numbers = #tpu.dot_dimension_numbers<[1], [0], [0], [1], [0, 0, 1, 1], [], []>} : vector<16x338xbf16>, vector<338x72xbf16>, vector<16x72xf32> -> vector<16x72xf32>
    %42 = arith.truncf %41 : vector<16x72xf32> to vector<16x72xbf16>
    %cst_39 = arith.constant dense<0.000000e+00> : vector<16x72xf32>
    %43 = tpu.matmul %38, %42, %cst_39 {dimension_numbers = #tpu.dot_dimension_numbers<[1], [0], [0], [1], [0, 0, 1, 1], [], []>} : vector<16x16xbf16>, vector<16x72xbf16>, vector<16x72xf32> -> vector<16x72xf32>
    %44 = arith.addf %36, %43 : vector<16x72xf32>
    %c3_40 = arith.constant 3 : index
    %c0_41 = arith.constant 0 : index
    %c0_42 = arith.constant 0 : index
    %45 = vector.load %arg5[%c3_40, %c0_41, %c0_42] : memref<9x16x16xbf16, #tpu.memory_space<vmem>>, vector<1x16x16xbf16>
    %46 = vector.shape_cast %45 : vector<1x16x16xbf16> to vector<16x16xbf16>
    %c3_43 = arith.constant 3 : index
    %c0_44 = arith.constant 0 : index
    %c0_45 = arith.constant 0 : index
    %47 = vector.load %arg4[%c3_43, %c0_44, %c0_45] : memref<9x338x72xbf16, #tpu.memory_space<vmem>>, vector<1x338x72xbf16>
    %48 = vector.shape_cast %47 : vector<1x338x72xbf16> to vector<338x72xbf16>
    %cst_46 = arith.constant dense<0.000000e+00> : vector<16x72xf32>
    %49 = tpu.matmul %21, %48, %cst_46 {dimension_numbers = #tpu.dot_dimension_numbers<[1], [0], [0], [1], [0, 0, 1, 1], [], []>} : vector<16x338xbf16>, vector<338x72xbf16>, vector<16x72xf32> -> vector<16x72xf32>
    %50 = arith.truncf %49 : vector<16x72xf32> to vector<16x72xbf16>
    %cst_47 = arith.constant dense<0.000000e+00> : vector<16x72xf32>
    %51 = tpu.matmul %46, %50, %cst_47 {dimension_numbers = #tpu.dot_dimension_numbers<[1], [0], [0], [1], [0, 0, 1, 1], [], []>} : vector<16x16xbf16>, vector<16x72xbf16>, vector<16x72xf32> -> vector<16x72xf32>
    %52 = arith.addf %44, %51 : vector<16x72xf32>
    %c4 = arith.constant 4 : index
    %c0_48 = arith.constant 0 : index
    %c0_49 = arith.constant 0 : index
    %53 = vector.load %arg5[%c4, %c0_48, %c0_49] : memref<9x16x16xbf16, #tpu.memory_space<vmem>>, vector<1x16x16xbf16>
    %54 = vector.shape_cast %53 : vector<1x16x16xbf16> to vector<16x16xbf16>
    %c4_50 = arith.constant 4 : index
    %c0_51 = arith.constant 0 : index
    %c0_52 = arith.constant 0 : index
    %55 = vector.load %arg4[%c4_50, %c0_51, %c0_52] : memref<9x338x72xbf16, #tpu.memory_space<vmem>>, vector<1x338x72xbf16>
    %56 = vector.shape_cast %55 : vector<1x338x72xbf16> to vector<338x72xbf16>
    %cst_53 = arith.constant dense<0.000000e+00> : vector<16x72xf32>
    %57 = tpu.matmul %21, %56, %cst_53 {dimension_numbers = #tpu.dot_dimension_numbers<[1], [0], [0], [1], [0, 0, 1, 1], [], []>} : vector<16x338xbf16>, vector<338x72xbf16>, vector<16x72xf32> -> vector<16x72xf32>
    %58 = arith.truncf %57 : vector<16x72xf32> to vector<16x72xbf16>
    %cst_54 = arith.constant dense<0.000000e+00> : vector<16x72xf32>
    %59 = tpu.matmul %54, %58, %cst_54 {dimension_numbers = #tpu.dot_dimension_numbers<[1], [0], [0], [1], [0, 0, 1, 1], [], []>} : vector<16x16xbf16>, vector<16x72xbf16>, vector<16x72xf32> -> vector<16x72xf32>
    %60 = arith.addf %52, %59 : vector<16x72xf32>
    %c5 = arith.constant 5 : index
    %c0_55 = arith.constant 0 : index
    %c0_56 = arith.constant 0 : index
    %61 = vector.load %arg5[%c5, %c0_55, %c0_56] : memref<9x16x16xbf16, #tpu.memory_space<vmem>>, vector<1x16x16xbf16>
    %62 = vector.shape_cast %61 : vector<1x16x16xbf16> to vector<16x16xbf16>
    %c5_57 = arith.constant 5 : index
    %c0_58 = arith.constant 0 : index
    %c0_59 = arith.constant 0 : index
    %63 = vector.load %arg4[%c5_57, %c0_58, %c0_59] : memref<9x338x72xbf16, #tpu.memory_space<vmem>>, vector<1x338x72xbf16>
    %64 = vector.shape_cast %63 : vector<1x338x72xbf16> to vector<338x72xbf16>
    %cst_60 = arith.constant dense<0.000000e+00> : vector<16x72xf32>
    %65 = tpu.matmul %21, %64, %cst_60 {dimension_numbers = #tpu.dot_dimension_numbers<[1], [0], [0], [1], [0, 0, 1, 1], [], []>} : vector<16x338xbf16>, vector<338x72xbf16>, vector<16x72xf32> -> vector<16x72xf32>
    %66 = arith.truncf %65 : vector<16x72xf32> to vector<16x72xbf16>
    %cst_61 = arith.constant dense<0.000000e+00> : vector<16x72xf32>
    %67 = tpu.matmul %62, %66, %cst_61 {dimension_numbers = #tpu.dot_dimension_numbers<[1], [0], [0], [1], [0, 0, 1, 1], [], []>} : vector<16x16xbf16>, vector<16x72xbf16>, vector<16x72xf32> -> vector<16x72xf32>
    %68 = arith.addf %60, %67 : vector<16x72xf32>
    %c6 = arith.constant 6 : index
    %c0_62 = arith.constant 0 : index
    %c0_63 = arith.constant 0 : index
    %69 = vector.load %arg5[%c6, %c0_62, %c0_63] : memref<9x16x16xbf16, #tpu.memory_space<vmem>>, vector<1x16x16xbf16>
    %70 = vector.shape_cast %69 : vector<1x16x16xbf16> to vector<16x16xbf16>
    %c6_64 = arith.constant 6 : index
    %c0_65 = arith.constant 0 : index
    %c0_66 = arith.constant 0 : index
    %71 = vector.load %arg4[%c6_64, %c0_65, %c0_66] : memref<9x338x72xbf16, #tpu.memory_space<vmem>>, vector<1x338x72xbf16>
    %72 = vector.shape_cast %71 : vector<1x338x72xbf16> to vector<338x72xbf16>
    %cst_67 = arith.constant dense<0.000000e+00> : vector<16x72xf32>
    %73 = tpu.matmul %21, %72, %cst_67 {dimension_numbers = #tpu.dot_dimension_numbers<[1], [0], [0], [1], [0, 0, 1, 1], [], []>} : vector<16x338xbf16>, vector<338x72xbf16>, vector<16x72xf32> -> vector<16x72xf32>
    %74 = arith.truncf %73 : vector<16x72xf32> to vector<16x72xbf16>
    %cst_68 = arith.constant dense<0.000000e+00> : vector<16x72xf32>
    %75 = tpu.matmul %70, %74, %cst_68 {dimension_numbers = #tpu.dot_dimension_numbers<[1], [0], [0], [1], [0, 0, 1, 1], [], []>} : vector<16x16xbf16>, vector<16x72xbf16>, vector<16x72xf32> -> vector<16x72xf32>
    %76 = arith.addf %68, %75 : vector<16x72xf32>
    %c7 = arith.constant 7 : index
    %c0_69 = arith.constant 0 : index
    %c0_70 = arith.constant 0 : index
    %77 = vector.load %arg5[%c7, %c0_69, %c0_70] : memref<9x16x16xbf16, #tpu.memory_space<vmem>>, vector<1x16x16xbf16>
    %78 = vector.shape_cast %77 : vector<1x16x16xbf16> to vector<16x16xbf16>
    %c7_71 = arith.constant 7 : index
    %c0_72 = arith.constant 0 : index
    %c0_73 = arith.constant 0 : index
    %79 = vector.load %arg4[%c7_71, %c0_72, %c0_73] : memref<9x338x72xbf16, #tpu.memory_space<vmem>>, vector<1x338x72xbf16>
    %80 = vector.shape_cast %79 : vector<1x338x72xbf16> to vector<338x72xbf16>
    %cst_74 = arith.constant dense<0.000000e+00> : vector<16x72xf32>
    %81 = tpu.matmul %21, %80, %cst_74 {dimension_numbers = #tpu.dot_dimension_numbers<[1], [0], [0], [1], [0, 0, 1, 1], [], []>} : vector<16x338xbf16>, vector<338x72xbf16>, vector<16x72xf32> -> vector<16x72xf32>
    %82 = arith.truncf %81 : vector<16x72xf32> to vector<16x72xbf16>
    %cst_75 = arith.constant dense<0.000000e+00> : vector<16x72xf32>
    %83 = tpu.matmul %78, %82, %cst_75 {dimension_numbers = #tpu.dot_dimension_numbers<[1], [0], [0], [1], [0, 0, 1, 1], [], []>} : vector<16x16xbf16>, vector<16x72xbf16>, vector<16x72xf32> -> vector<16x72xf32>
    %84 = arith.addf %76, %83 : vector<16x72xf32>
    %c8 = arith.constant 8 : index
    %c0_76 = arith.constant 0 : index
    %c0_77 = arith.constant 0 : index
    %85 = vector.load %arg5[%c8, %c0_76, %c0_77] : memref<9x16x16xbf16, #tpu.memory_space<vmem>>, vector<1x16x16xbf16>
    %86 = vector.shape_cast %85 : vector<1x16x16xbf16> to vector<16x16xbf16>
    %c8_78 = arith.constant 8 : index
    %c0_79 = arith.constant 0 : index
    %c0_80 = arith.constant 0 : index
    %87 = vector.load %arg4[%c8_78, %c0_79, %c0_80] : memref<9x338x72xbf16, #tpu.memory_space<vmem>>, vector<1x338x72xbf16>
    %88 = vector.shape_cast %87 : vector<1x338x72xbf16> to vector<338x72xbf16>
    %cst_81 = arith.constant dense<0.000000e+00> : vector<16x72xf32>
    %89 = tpu.matmul %21, %88, %cst_81 {dimension_numbers = #tpu.dot_dimension_numbers<[1], [0], [0], [1], [0, 0, 1, 1], [], []>} : vector<16x338xbf16>, vector<338x72xbf16>, vector<16x72xf32> -> vector<16x72xf32>
    %90 = arith.truncf %89 : vector<16x72xf32> to vector<16x72xbf16>
    %cst_82 = arith.constant dense<0.000000e+00> : vector<16x72xf32>
    %91 = tpu.matmul %86, %90, %cst_82 {dimension_numbers = #tpu.dot_dimension_numbers<[1], [0], [0], [1], [0, 0, 1, 1], [], []>} : vector<16x16xbf16>, vector<16x72xbf16>, vector<16x72xf32> -> vector<16x72xf32>
    %92 = arith.addf %84, %91 : vector<16x72xf32>
    %c0_83 = arith.constant 0 : index
    %c0_84 = arith.constant 0 : index
    %93 = vector.load %arg6[%c0_83, %c0_84] : memref<16x1xf32, #tpu.memory_space<vmem>>, vector<16x1xf32>
    %94 = vector.broadcast %93 : vector<16x1xf32> to vector<16x72xf32>
    %95 = arith.addf %92, %94 : vector<16x72xf32>
    %cst_85 = arith.constant 0.000000e+00 : f32
    %96 = vector.broadcast %cst_85 : f32 to vector<16x72xf32>
    %97 = arith.maximumf %95, %96 : vector<16x72xf32>
    %c0_86 = arith.constant 0 : index
    %c0_87 = arith.constant 0 : index
    %98 = vector.load %arg7[%c0_86, %c0_87] : memref<72x2xf32, #tpu.memory_space<vmem>>, vector<72x2xf32>
    %cst_88 = arith.constant dense<0.000000e+00> : vector<16x2xf32>
    %99 = tpu.matmul %97, %98, %cst_88 {dimension_numbers = #tpu.dot_dimension_numbers<[1], [0], [0], [1], [0, 0, 1, 1], [], []>} : vector<16x72xf32>, vector<72x2xf32>, vector<16x2xf32> -> vector<16x2xf32>
    %c0_89 = arith.constant 0 : index
    %c0_90 = arith.constant 0 : index
    %100 = vector.load %arg8[%c0_89, %c0_90] : memref<2x16xf32, #tpu.memory_space<vmem>>, vector<2x16xf32>
    %cst_91 = arith.constant dense<0.000000e+00> : vector<2x2xf32>
    %101 = tpu.matmul %100, %99, %cst_91 {dimension_numbers = #tpu.dot_dimension_numbers<[1], [0], [0], [1], [0, 0, 1, 1], [], []>} : vector<2x16xf32>, vector<16x2xf32>, vector<2x2xf32> -> vector<2x2xf32>
    %c0_92 = arith.constant 0 : index
    %c0_93 = arith.constant 0 : index
    %102 = vector.load %arg9[%c0_92, %c0_93] : memref<2x1xf32, #tpu.memory_space<vmem>>, vector<2x1xf32>
    %103 = vector.broadcast %102 : vector<2x1xf32> to vector<2x2xf32>
    %104 = arith.addf %101, %103 : vector<2x2xf32>
    %c0_94 = arith.constant 0 : index
    %c0_95 = arith.constant 0 : index
    %105 = vector.load %arg10[%c0_94, %c0_95] : memref<2x2xf32, #tpu.memory_space<vmem>>, vector<2x2xf32>
    tpu.vector_store %arg10[%c0_94, %c0_95], %104 {strides = array<i32>} : memref<2x2xf32, #tpu.memory_space<vmem>>, vector<2x2xf32>,
    return
  }
  func.func @transform_0(%arg0: i32) -> (i32, i32, i32) {
    %c0_i32 = arith.constant 0 : i32
    %c0_i32_0 = arith.constant 0 : i32
    %c0_i32_1 = arith.constant 0 : i32
    %c0_i32_2 = arith.constant 0 : i32
    return %c0_i32, %c0_i32_0, %c0_i32_1 : i32, i32, i32
  }
  func.func @transform_1(%arg0: i32) -> (i32, i32) {
    %c0_i32 = arith.constant 0 : i32
    %c0_i32_0 = arith.constant 0 : i32
    %c0_i32_1 = arith.constant 0 : i32
    return %c0_i32, %c0_i32_0 : i32, i32
  }
  func.func @transform_2(%arg0: i32) -> (i32, i32) {
    %c0_i32 = arith.constant 0 : i32
    %c0_i32_0 = arith.constant 0 : i32
    %c0_i32_1 = arith.constant 0 : i32
    return %c0_i32, %c0_i32_0 : i32, i32
  }
  func.func @transform_3(%arg0: i32) -> (i32, i32, i32) {
    %c0_i32 = arith.constant 0 : i32
    %c0_i32_0 = arith.constant 0 : i32
    %c0_i32_1 = arith.constant 0 : i32
    %c0_i32_2 = arith.constant 0 : i32
    return %c0_i32, %c0_i32_0, %c0_i32_1 : i32, i32, i32
  }
  func.func @transform_4(%arg0: i32) -> (i32, i32, i32) {
    %c0_i32 = arith.constant 0 : i32
    %c0_i32_0 = arith.constant 0 : i32
    %c0_i32_1 = arith.constant 0 : i32
    %c0_i32_2 = arith.constant 0 : i32
    return %c0_i32, %c0_i32_0, %c0_i32_1 : i32, i32, i32
  }
  func.func @transform_5(%arg0: i32) -> (i32, i32) {
    %c0_i32 = arith.constant 0 : i32
    %c0_i32_0 = arith.constant 0 : i32
    %c0_i32_1 = arith.constant 0 : i32
    return %c0_i32, %c0_i32_0 : i32, i32
  }
  func.func @transform_6(%arg0: i32) -> (i32, i32) {
    %c0_i32 = arith.constant 0 : i32
    %c0_i32_0 = arith.constant 0 : i32
    %c0_i32_1 = arith.constant 0 : i32
    return %c0_i32, %c0_i32_0 : i32, i32
  }
  func.func @transform_7(%arg0: i32) -> (i32, i32) {
    %c0_i32 = arith.constant 0 : i32
    %c0_i32_0 = arith.constant 0 : i32
    %c0_i32_1 = arith.constant 0 : i32
    return %c0_i32, %c0_i32_0 : i32, i32
  }
  func.func @transform_8(%arg0: i32) -> (i32, i32) {
    %c0_i32 = arith.constant 0 : i32
    %c0_i32_0 = arith.constant 0 : i32
    %c0_i32_1 = arith.constant 0 : i32
    return %c0_i32, %c0_i32_0 : i32, i32
  }
  func.func @transform_9(%arg0: i32) -> (i32, i32) {
    %c0_i32 = arith.constant 0 : i32
    %c0_i32_0 = arith.constant 0 : i32
    %c0_i32_1 = arith.constant 0 : i32
    return %c0_i32, %c0_i32_0 : i32, i32
  }
}

</mosaic_0001>

<bundles_post_ra>
// kernel: simplify_net_forward.2
= control target key start
LH: loop header
LB: loop body
LE: loop exit
PB: predicated region body
PF: predicated region fallthrough
CT: control target
= control target key end

     0   :  { %s2870_s12 = smov 0   ;;  %s2872_s13 = smov 0   ;;  %s3548_s0 = inlined_call_operand.vmem [shape: bf16[4,27,6144], index: 0, kind: input, shape index: {}]   ;;  %s3549_s1 = inlined_call_operand.vmem [shape: bf16[16,27], index: 1, kind: input, shape index: {}]   ;;  %s3550_s2 = inlined_call_operand.vmem [shape: f32[16,1], index: 2, kind: input, shape index: {}]   ;;  %s3551_s3 = inlined_call_operand.vmem [shape: bf16[16,6144], index: 3, kind: output, shape index: {}]  }
   0x1   :  { %s2874_s14 = smov 0  }
   0x2 LB: > { %s2421_s15 = sadd.s32 4294967295, %s2846_s14   ;;  %s2887_s16 = sadd.s32 1, %s2846_s14   ;;  %s2846_s14 = sphi %s2874_s14, %s3555_s14   ;;  %s2842_s13 = sphi %s2872_s13, %s3554_s13   ;;  %s2838_s12 = sphi %s2870_s12, %s3553_s12  }
   0x3   : > { %s17_s17 = ssub.s32 %s2846_s14, %s2887_s16  ;;  %s20_s18 = sadd.s32 1, %s2842_s13 }
   0x4   : > { %p18_p0 = scmp.eq.s32.totalorder %s17_s17, 0  ;;  %p27_p1 = scmp.ne.s32.totalorder %s2842_s13, %s2838_s12 }
   0x5   : > { %p28_p2 = scmp.eq.s32.totalorder %s2846_s14, 0  ;;  %p99_p3 = scmp.eq.s32.totalorder %s2421_s15, 3 }
   0x6   : > { %s2898_s19 = scalar_select %p18_p0, %s2842_s13, %s20_s18  }
   0x7   : > { %p29_p4 = por %p28_p2, %p27_p1  ;;  %p2900_p5 = por %p99_p3, %p27_p1 }
   0x8   : > { %p2424_p6 = scmp.ge.s32.totalorder %s2846_s14, 4 }
   0xa   : > { %127 = sbr.rel (%p2424_p6) target bundleno = 70 (0x46), region = 24 }
  0x11   : > { %130 = sbr.rel (!%p29_p4) target bundleno = 70 (0x46), region = 28  ;;  %s132_s21 = sand.u32 (%p29_p4), 1, %s2842_s13  }
  0x12   : > { %s2635_s22 = smul.u32 (%p29_p4), 48, %s2846_s14 }
  0x13   : > { %s2649_s23 = smul.u32 (%p29_p4), 768, %s132_s21 }
  0x14   : > { %s2910_s26 = scalar_lea.vmem (%p29_p4), %s3548_s0, %s2635_s22 }
  0x15   : > { %v150_v0 = vld [vmem:[%s2910_s26] sm:$0xff] (%p29_p4)  ;;  %v152_v1 = vld [vmem:[%s2910_s26 + $0x8] sm:$0xff] (%p29_p4)  ;;  %v154_v2 = vld [vmem:[%s2910_s26 + $0x10] sm:$0xff] (%p29_p4)  ;;  %s2915_s27 = scalar_lea.vmem (%p29_p4), [#allocation2], %s2649_s23 }
  0x16   : > { %151 = vst [vmem:[%s2915_s27] sm:$0xff] (%p29_p4), %v150_v0  ;;  %153 = vst [vmem:[%s2915_s27 + $0x8] sm:$0xff] (%p29_p4), %v152_v1  ;;  %v156_v3 = vld [vmem:[%s2910_s26 + $0x18] sm:$0xff] (%p29_p4)  ;;  %v158_v4 = vld [vmem:[%s2910_s26 + $0x20] sm:$0xff] (%p29_p4) }
  0x17   : > { %155 = vst [vmem:[%s2915_s27 + $0x10] sm:$0xff] (%p29_p4), %v154_v2  ;;  %v160_v5 = vld [vmem:[%s2910_s26 + $0x28] sm:$0xff] (%p29_p4)  ;;  %157 = vst [vmem:[%s2915_s27 + $0x18] sm:$0xff] (%p29_p4), %v156_v3  ;;  %v162_v6 = vld [vmem:[%s2910_s26 + $0xc0] sm:$0xff] (%p29_p4) }
  0x18   : > { %159 = vst [vmem:[%s2915_s27 + $0x20] sm:$0xff] %v158_v4  ;;  %161 = vst [vmem:[%s2915_s27 + $0x28] sm:$0xff] %v160_v5  ;;  %v164_v7 = vld [vmem:[%s2910_s26 + $0xc8] sm:$0xff]  ;;  %v166_v8 = vld [vmem:[%s2910_s26 + $0xd0] sm:$0xff] }
  0x19   : > { %163 = vst [vmem:[%s2915_s27 + $0x30] sm:$0xff] %v162_v6  ;;  %165 = vst [vmem:[%s2915_s27 + $0x38] sm:$0xff] %v164_v7  ;;  %v168_v9 = vld [vmem:[%s2910_s26 + $0xd8] sm:$0xff]  ;;  %v170_v10 = vld [vmem:[%s2910_s26 + $0xe0] sm:$0xff] }
  0x1a   : > { %167 = vst [vmem:[%s2915_s27 + $0x40] sm:$0xff] %v166_v8  ;;  %v172_v11 = vld [vmem:[%s2910_s26 + $0xe8] sm:$0xff]  ;;  %169 = vst [vmem:[%s2915_s27 + $0x48] sm:$0xff] %v168_v9  ;;  %v174_v12 = vld [vmem:[%s2910_s26 + $0x180] sm:$0xff] }
  0x1b   : > { %171 = vst [vmem:[%s2915_s27 + $0x50] sm:$0xff] %v170_v10  ;;  %173 = vst [vmem:[%s2915_s27 + $0x58] sm:$0xff] %v172_v11  ;;  %v176_v13 = vld [vmem:[%s2910_s26 + $0x188] sm:$0xff]  ;;  %v178_v14 = vld [vmem:[%s2910_s26 + $0x190] sm:$0xff] }
  0x1c   : > { %175 = vst [vmem:[%s2915_s27 + $0x60] sm:$0xff] %v174_v12  ;;  %177 = vst [vmem:[%s2915_s27 + $0x68] sm:$0xff] %v176_v13  ;;  %v180_v15 = vld [vmem:[%s2910_s26 + $0x198] sm:$0xff]  ;;  %v182_v16 = vld [vmem:[%s2910_s26 + $0x1a0] sm:$0xff] }
  0x1d   : > { %179 = vst [vmem:[%s2915_s27 + $0x70] sm:$0xff] %v178_v14  ;;  %v184_v17 = vld [vmem:[%s2910_s26 + $0x1a8] sm:$0xff]  ;;  %181 = vst [vmem:[%s2915_s27 + $0x78] sm:$0xff] %v180_v15  ;;  %v186_v18 = vld [vmem:[%s2910_s26 + $0x240] sm:$0xff] }
  0x1e   : > { %183 = vst [vmem:[%s2915_s27 + $0x80] sm:$0xff] %v182_v16  ;;  %185 = vst [vmem:[%s2915_s27 + $0x88] sm:$0xff] %v184_v17  ;;  %v188_v19 = vld [vmem:[%s2910_s26 + $0x248] sm:$0xff]  ;;  %v190_v20 = vld [vmem:[%s2910_s26 + $0x250] sm:$0xff] }
  0x1f   : > { %187 = vst [vmem:[%s2915_s27 + $0x90] sm:$0xff] %v186_v18  ;;  %189 = vst [vmem:[%s2915_s27 + $0x98] sm:$0xff] %v188_v19  ;;  %v192_v21 = vld [vmem:[%s2910_s26 + $0x258] sm:$0xff]  ;;  %v194_v22 = vld [vmem:[%s2910_s26 + $0x260] sm:$0xff] }
  0x20   : > { %191 = vst [vmem:[%s2915_s27 + $0xa0] sm:$0xff] %v190_v20  ;;  %v196_v23 = vld [vmem:[%s2910_s26 + $0x268] sm:$0xff]  ;;  %193 = vst [vmem:[%s2915_s27 + $0xa8] sm:$0xff] %v192_v21  ;;  %v198_v24 = vld [vmem:[%s2910_s26 + $0x300] sm:$0xff] }
  0x21   : > { %195 = vst [vmem:[%s2915_s27 + $0xb0] sm:$0xff] %v194_v22  ;;  %197 = vst [vmem:[%s2915_s27 + $0xb8] sm:$0xff] %v196_v23  ;;  %v200_v25 = vld [vmem:[%s2910_s26 + $0x308] sm:$0xff]  ;;  %v202_v26 = vld [vmem:[%s2910_s26 + $0x310] sm:$0xff] }
  0x22   : > { %199 = vst [vmem:[%s2915_s27 + $0xc0] sm:$0xff] %v198_v24  ;;  %201 = vst [vmem:[%s2915_s27 + $0xc8] sm:$0xff] %v200_v25  ;;  %v204_v27 = vld [vmem:[%s2910_s26 + $0x318] sm:$0xff]  ;;  %v206_v28 = vld [vmem:[%s2910_s26 + $0x320] sm:$0xff] }
  0x23   : > { %203 = vst [vmem:[%s2915_s27 + $0xd0] sm:$0xff] %v202_v26  ;;  %v208_v29 = vld [vmem:[%s2910_s26 + $0x328] sm:$0xff]  ;;  %205 = vst [vmem:[%s2915_s27 + $0xd8] sm:$0xff] %v204_v27  ;;  %v210_v30 = vld [vmem:[%s2910_s26 + $0x3c0] sm:$0xff] }
  0x24   : > { %207 = vst [vmem:[%s2915_s27 + $0xe0] sm:$0xff] %v206_v28  ;;  %209 = vst [vmem:[%s2915_s27 + $0xe8] sm:$0xff] %v208_v29  ;;  %v212_v31 = vld [vmem:[%s2910_s26 + $0x3c8] sm:$0xff]  ;;  %v214_v32 = vld [vmem:[%s2910_s26 + $0x3d0] sm:$0xff] }
  0x25   : > { %211 = vst [vmem:[%s2915_s27 + $0xf0] sm:$0xff] %v210_v30  ;;  %213 = vst [vmem:[%s2915_s27 + $0xf8] sm:$0xff] %v212_v31  ;;  %v216_v33 = vld [vmem:[%s2910_s26 + $0x3d8] sm:$0xff]  ;;  %v218_v34 = vld [vmem:[%s2910_s26 + $0x3e0] sm:$0xff] }
  0x26   : > { %215 = vst [vmem:[%s2915_s27 + $0x100] sm:$0xff] %v214_v32  ;;  %v220_v35 = vld [vmem:[%s2910_s26 + $0x3e8] sm:$0xff]  ;;  %217 = vst [vmem:[%s2915_s27 + $0x108] sm:$0xff] %v216_v33  ;;  %v222_v36 = vld [vmem:[%s2910_s26 + $0x480] sm:$0xff] }
  0x27   : > { %219 = vst [vmem:[%s2915_s27 + $0x110] sm:$0xff] %v218_v34  ;;  %221 = vst [vmem:[%s2915_s27 + $0x118] sm:$0xff] %v220_v35  ;;  %v224_v37 = vld [vmem:[%s2910_s26 + $0x488] sm:$0xff]  ;;  %v226_v38 = vld [vmem:[%s2910_s26 + $0x490] sm:$0xff] }
  0x28   : > { %223 = vst [vmem:[%s2915_s27 + $0x120] sm:$0xff] %v222_v36  ;;  %225 = vst [vmem:[%s2915_s27 + $0x128] sm:$0xff] %v224_v37  ;;  %v228_v39 = vld [vmem:[%s2910_s26 + $0x498] sm:$0xff]  ;;  %v230_v40 = vld [vmem:[%s2910_s26 + $0x4a0] sm:$0xff] }
  0x29   : > { %227 = vst [vmem:[%s2915_s27 + $0x130] sm:$0xff] %v226_v38  ;;  %v232_v41 = vld [vmem:[%s2910_s26 + $0x4a8] sm:$0xff]  ;;  %229 = vst [vmem:[%s2915_s27 + $0x138] sm:$0xff] %v228_v39  ;;  %v234_v42 = vld [vmem:[%s2910_s26 + $0x540] sm:$0xff] }
  0x2a   : > { %231 = vst [vmem:[%s2915_s27 + $0x140] sm:$0xff] %v230_v40  ;;  %233 = vst [vmem:[%s2915_s27 + $0x148] sm:$0xff] %v232_v41  ;;  %v236_v43 = vld [vmem:[%s2910_s26 + $0x548] sm:$0xff]  ;;  %v238_v44 = vld [vmem:[%s2910_s26 + $0x550] sm:$0xff] }
  0x2b   : > { %235 = vst [vmem:[%s2915_s27 + $0x150] sm:$0xff] %v234_v42  ;;  %237 = vst [vmem:[%s2915_s27 + $0x158] sm:$0xff] %v236_v43  ;;  %v240_v45 = vld [vmem:[%s2910_s26 + $0x558] sm:$0xff]  ;;  %v242_v46 = vld [vmem:[%s2910_s26 + $0x560] sm:$0xff] }
  0x2c   : > { %239 = vst [vmem:[%s2915_s27 + $0x160] sm:$0xff] %v238_v44  ;;  %v244_v47 = vld [vmem:[%s2910_s26 + $0x568] sm:$0xff]  ;;  %241 = vst [vmem:[%s2915_s27 + $0x168] sm:$0xff] %v240_v45  ;;  %v246_v48 = vld [vmem:[%s2910_s26 + $0x600] sm:$0xff] }
  0x2d   : > { %243 = vst [vmem:[%s2915_s27 + $0x170] sm:$0xff] %v242_v46  ;;  %245 = vst [vmem:[%s2915_s27 + $0x178] sm:$0xff] %v244_v47  ;;  %v248_v49 = vld [vmem:[%s2910_s26 + $0x608] sm:$0xff]  ;;  %v250_v50 = vld [vmem:[%s2910_s26 + $0x610] sm:$0xff] }
  0x2e   : > { %247 = vst [vmem:[%s2915_s27 + $0x180] sm:$0xff] %v246_v48  ;;  %249 = vst [vmem:[%s2915_s27 + $0x188] sm:$0xff] %v248_v49  ;;  %v252_v51 = vld [vmem:[%s2910_s26 + $0x618] sm:$0xff]  ;;  %v254_v52 = vld [vmem:[%s2910_s26 + $0x620] sm:$0xff] }
  0x2f   : > { %251 = vst [vmem:[%s2915_s27 + $0x190] sm:$0xff] %v250_v50  ;;  %v256_v53 = vld [vmem:[%s2910_s26 + $0x628] sm:$0xff]  ;;  %253 = vst [vmem:[%s2915_s27 + $0x198] sm:$0xff] %v252_v51  ;;  %v258_v54 = vld [vmem:[%s2910_s26 + $0x6c0] sm:$0xff] }
  0x30   : > { %255 = vst [vmem:[%s2915_s27 + $0x1a0] sm:$0xff] %v254_v52  ;;  %257 = vst [vmem:[%s2915_s27 + $0x1a8] sm:$0xff] %v256_v53  ;;  %v260_v55 = vld [vmem:[%s2910_s26 + $0x6c8] sm:$0xff]  ;;  %v262_v56 = vld [vmem:[%s2910_s26 + $0x6d0] sm:$0xff] }
  0x31   : > { %259 = vst [vmem:[%s2915_s27 + $0x1b0] sm:$0xff] %v258_v54  ;;  %261 = vst [vmem:[%s2915_s27 + $0x1b8] sm:$0xff] %v260_v55  ;;  %v264_v57 = vld [vmem:[%s2910_s26 + $0x6d8] sm:$0xff]  ;;  %v266_v58 = vld [vmem:[%s2910_s26 + $0x6e0] sm:$0xff] }
  0x32   : > { %263 = vst [vmem:[%s2915_s27 + $0x1c0] sm:$0xff] %v262_v56  ;;  %v268_v59 = vld [vmem:[%s2910_s26 + $0x6e8] sm:$0xff]  ;;  %265 = vst [vmem:[%s2915_s27 + $0x1c8] sm:$0xff] %v264_v57  ;;  %v270_v60 = vld [vmem:[%s2910_s26 + $0x780] sm:$0xff] }
  0x33   : > { %267 = vst [vmem:[%s2915_s27 + $0x1d0] sm:$0xff] %v266_v58  ;;  %269 = vst [vmem:[%s2915_s27 + $0x1d8] sm:$0xff] %v268_v59  ;;  %v272_v61 = vld [vmem:[%s2910_s26 + $0x788] sm:$0xff]  ;;  %v274_v62 = vld [vmem:[%s2910_s26 + $0x790] sm:$0xff] }
  0x34   : > { %271 = vst [vmem:[%s2915_s27 + $0x1e0] sm:$0xff] %v270_v60  ;;  %273 = vst [vmem:[%s2915_s27 + $0x1e8] sm:$0xff] %v272_v61  ;;  %v276_v63 = vld [vmem:[%s2910_s26 + $0x798] sm:$0xff]  ;;  %v278_v0 = vld [vmem:[%s2910_s26 + $0x7a0] sm:$0xff] }
  0x35   : > { %275 = vst [vmem:[%s2915_s27 + $0x1f0] sm:$0xff] %v274_v62  ;;  %v280_v1 = vld [vmem:[%s2910_s26 + $0x7a8] sm:$0xff]  ;;  %277 = vst [vmem:[%s2915_s27 + $0x1f8] sm:$0xff] %v276_v63  ;;  %v282_v2 = vld [vmem:[%s2910_s26 + $0x840] sm:$0xff] }
  0x36   : > { %279 = vst [vmem:[%s2915_s27 + $0x200] sm:$0xff] %v278_v0  ;;  %281 = vst [vmem:[%s2915_s27 + $0x208] sm:$0xff] %v280_v1  ;;  %v284_v3 = vld [vmem:[%s2910_s26 + $0x848] sm:$0xff]  ;;  %v286_v4 = vld [vmem:[%s2910_s26 + $0x850] sm:$0xff] }
  0x37   : > { %283 = vst [vmem:[%s2915_s27 + $0x210] sm:$0xff] %v282_v2  ;;  %285 = vst [vmem:[%s2915_s27 + $0x218] sm:$0xff] %v284_v3  ;;  %v288_v5 = vld [vmem:[%s2910_s26 + $0x858] sm:$0xff]  ;;  %v290_v6 = vld [vmem:[%s2910_s26 + $0x860] sm:$0xff] }
  0x38   : > { %287 = vst [vmem:[%s2915_s27 + $0x220] sm:$0xff] %v286_v4  ;;  %v292_v7 = vld [vmem:[%s2910_s26 + $0x868] sm:$0xff]  ;;  %289 = vst [vmem:[%s2915_s27 + $0x228] sm:$0xff] %v288_v5  ;;  %v294_v8 = vld [vmem:[%s2910_s26 + $0x900] sm:$0xff] }
  0x39   : > { %291 = vst [vmem:[%s2915_s27 + $0x230] sm:$0xff] %v290_v6  ;;  %293 = vst [vmem:[%s2915_s27 + $0x238] sm:$0xff] %v292_v7  ;;  %v296_v9 = vld [vmem:[%s2910_s26 + $0x908] sm:$0xff]  ;;  %v298_v10 = vld [vmem:[%s2910_s26 + $0x910] sm:$0xff] }
  0x3a   : > { %295 = vst [vmem:[%s2915_s27 + $0x240] sm:$0xff] %v294_v8  ;;  %297 = vst [vmem:[%s2915_s27 + $0x248] sm:$0xff] %v296_v9  ;;  %v300_v11 = vld [vmem:[%s2910_s26 + $0x918] sm:$0xff]  ;;  %v302_v12 = vld [vmem:[%s2910_s26 + $0x920] sm:$0xff] }
  0x3b   : > { %299 = vst [vmem:[%s2915_s27 + $0x250] sm:$0xff] %v298_v10  ;;  %v304_v13 = vld [vmem:[%s2910_s26 + $0x928] sm:$0xff]  ;;  %301 = vst [vmem:[%s2915_s27 + $0x258] sm:$0xff] %v300_v11  ;;  %v306_v14 = vld [vmem:[%s2910_s26 + $0x9c0] sm:$0xff] }
  0x3c   : > { %303 = vst [vmem:[%s2915_s27 + $0x260] sm:$0xff] %v302_v12  ;;  %305 = vst [vmem:[%s2915_s27 + $0x268] sm:$0xff] %v304_v13  ;;  %v308_v15 = vld [vmem:[%s2910_s26 + $0x9c8] sm:$0xff]  ;;  %v310_v16 = vld [vmem:[%s2910_s26 + $0x9d0] sm:$0xff] }
  0x3d   : > { %307 = vst [vmem:[%s2915_s27 + $0x270] sm:$0xff] %v306_v14  ;;  %309 = vst [vmem:[%s2915_s27 + $0x278] sm:$0xff] %v308_v15  ;;  %v312_v17 = vld [vmem:[%s2910_s26 + $0x9d8] sm:$0xff]  ;;  %v314_v18 = vld [vmem:[%s2910_s26 + $0x9e0] sm:$0xff] }
  0x3e   : > { %311 = vst [vmem:[%s2915_s27 + $0x280] sm:$0xff] %v310_v16  ;;  %v316_v19 = vld [vmem:[%s2910_s26 + $0x9e8] sm:$0xff]  ;;  %313 = vst [vmem:[%s2915_s27 + $0x288] sm:$0xff] %v312_v17  ;;  %v318_v20 = vld [vmem:[%s2910_s26 + $0xa80] sm:$0xff] }
  0x3f   : > { %315 = vst [vmem:[%s2915_s27 + $0x290] sm:$0xff] %v314_v18  ;;  %317 = vst [vmem:[%s2915_s27 + $0x298] sm:$0xff] %v316_v19  ;;  %v320_v21 = vld [vmem:[%s2910_s26 + $0xa88] sm:$0xff]  ;;  %v322_v22 = vld [vmem:[%s2910_s26 + $0xa90] sm:$0xff] }
  0x40   : > { %319 = vst [vmem:[%s2915_s27 + $0x2a0] sm:$0xff] %v318_v20  ;;  %321 = vst [vmem:[%s2915_s27 + $0x2a8] sm:$0xff] %v320_v21  ;;  %v324_v23 = vld [vmem:[%s2910_s26 + $0xa98] sm:$0xff]  ;;  %v326_v24 = vld [vmem:[%s2910_s26 + $0xaa0] sm:$0xff] }
  0x41   : > { %323 = vst [vmem:[%s2915_s27 + $0x2b0] sm:$0xff] %v322_v22  ;;  %v328_v25 = vld [vmem:[%s2910_s26 + $0xaa8] sm:$0xff]  ;;  %325 = vst [vmem:[%s2915_s27 + $0x2b8] sm:$0xff] %v324_v23  ;;  %v330_v26 = vld [vmem:[%s2910_s26 + $0xb40] sm:$0xff] }
  0x42   : > { %327 = vst [vmem:[%s2915_s27 + $0x2c0] sm:$0xff] %v326_v24  ;;  %329 = vst [vmem:[%s2915_s27 + $0x2c8] sm:$0xff] %v328_v25  ;;  %v332_v27 = vld [vmem:[%s2910_s26 + $0xb48] sm:$0xff]  ;;  %v334_v28 = vld [vmem:[%s2910_s26 + $0xb50] sm:$0xff] }
  0x43   : > { %331 = vst [vmem:[%s2915_s27 + $0x2d0] sm:$0xff] %v330_v26  ;;  %333 = vst [vmem:[%s2915_s27 + $0x2d8] sm:$0xff] %v332_v27  ;;  %v336_v29 = vld [vmem:[%s2910_s26 + $0xb58] sm:$0xff]  ;;  %v338_v30 = vld [vmem:[%s2910_s26 + $0xb60] sm:$0xff] }
  0x44   : > { %335 = vst [vmem:[%s2915_s27 + $0x2e0] sm:$0xff] %v334_v28  ;;  %v340_v31 = vld [vmem:[%s2910_s26 + $0xb68] sm:$0xff]  ;;  %337 = vst [vmem:[%s2915_s27 + $0x2e8] sm:$0xff] %v336_v29 }
  0x45   : > { %339 = vst [vmem:[%s2915_s27 + $0x2f0] sm:$0xff] %v338_v30  ;;  %341 = vst [vmem:[%s2915_s27 + $0x2f8] sm:$0xff] %v340_v31 }
  0x46 PF: > { %p2426_p7 = scmp.ge.s32.totalorder %s2846_s14, 1  ;;  %p346_p8 = scmp.lt.s32.totalorder %s2846_s14, 5 }
  0x48   : > { %p347_p9 = pnand %p2426_p7, %p346_p8 }
  0x49   : > { %s353_s28 = sand.u32 (!%p347_p9), 1, %s2838_s12   ;;  %vm521_vm0 = vcmask (!%p347_p9), 1044480   ;;  %v2848_v32 = vmov (!%p347_p9), 0   ;;  %v2172_v33 = vld [vmem:[%s3550_s2] sm:$0xff] (!%p347_p9)  ;;  %vm522_vm1 = vcmask (!%p347_p9), 1045504   ;;  %v2849_v34 = vmov (!%p347_p9), 65535  }
  0x4a   : > { %350 = sbr.rel (%p347_p9) target bundleno = 408 (0x198), region = 51  ;;  %593 = vmatprep.mubr.bf16.mxu0 (!%p347_p9), %v2848_v32  ;;  %636 = vmatprep.mubr.bf16.mxu1 (!%p347_p9), %v2848_v32  ;;  %v523_v35 = vsel (!%p347_p9), %vm521_vm0, 4294967295, %v2849_v34  ;;  %v2173_v36 = vld [vmem:[%s3550_s2 + $0x8] sm:$0xff] (!%p347_p9)  ;;  %v3137_v48 = vld [vmem:[%s3549_s1] sm:$0xff] (!%p347_p9)   ;;  %vm517_vm2 = vcmask (!%p347_p9), 220160  }
  0x4b   : > { %s2650_s29 = smul.u32 (!%p347_p9), 768, %s353_s28  ;;  %2678 = vset.pattern.permute.xlu0 (!%p347_p9), %v2848_v32  ;;  %v3126_v41 = vsel (!%p347_p9), %vm522_vm1, %v523_v35, 0 }
  0x4c   : > { %2176 = vperm.xlu0 (!%p347_p9), %2678, %v2172_v33   ;;  %s2651_s10 = smul.u32 (!%p347_p9), 96, %s353_s28 }
  0x4d   : > { %s3120_s7 = scalar_lea.vmem (!%p347_p9), [#allocation2], %s2650_s29 }
  0x4e   : > { %v2679_v37 = vld [vmem:[%s3120_s7 + $0x4] ss:$48 sps:$4 sm:$0xff] (!%p347_p9)   ;;  %v2681_v38 = vld [vmem:[%s3120_s7 + $0xc] ss:$48 sps:$4 sm:$0xff] (!%p347_p9)   ;;  %v2683_v39 = vld [vmem:[%s3120_s7] ss:$48 sps:$4 sm:$0xff] (!%p347_p9)  }
  0x4f   : > { %561 = vmatprep.subr.bf16.mxu0 (!%p347_p9), %v2679_v37  ;;  %v2684_v40 = vld [vmem:[%s3120_s7 + $0x8] ss:$48 sps:$4 sm:$0xff] (!%p347_p9)   ;;  %604 = vmatprep.subr.bf16.mxu1 (!%p347_p9), %v2681_v38  ;;  %v2685_v42 = vld [vmem:[%s3120_s7 + $0x64] ss:$48 sps:$4 sm:$0x3f] (!%p347_p9)   ;;  %s3475_s11 = scalar_lea.vmem (!%p347_p9), [#allocation3], %s2651_s10 }
  0x50   : > { %2181 = vperm.xlu0 (!%p347_p9), %2678, %v2173_v36   ;;  %562 = vmatpush1.bf16.msra.mxu0 (!%p347_p9), %v2683_v39  ;;  %v2687_v43 = vld [vmem:[%s3120_s7 + $0x6c] ss:$48 sps:$4 sm:$0x3f] (!%p347_p9)   ;;  %v529_v44 = vand.u32 (!%p347_p9), %v2685_v42, %v3126_v41  ;;  %v2689_v45 = vld [vmem:[%s3120_s7 + $0x60] ss:$48 sps:$4 sm:$0x3f] (!%p347_p9)  }
  0x51   : > { %605 = vmatpush1.bf16.msra.mxu1 %v2684_v40  ;;  %v2690_v46 = vld [vmem:[%s3120_s7 + $0x68] ss:$48 sps:$4 sm:$0x3f]   ;;  %v535_v47 = vand.u32 %v2687_v43, %v3126_v41  ;;  %v2694_v49 = vld [vmem:[%s3120_s7 + $0x14] ss:$48 sps:$4 sm:$0xff]   ;;  %v526_v50 = vand.u32 %v2689_v45, %v3126_v41  ;;  %s2648_s12 = smul.u32 (%p2900_p5), 48, %s2421_s15 }
  0x52   : > { %563 = vmatprep.subr.bf16.mxu0 %v529_v44  ;;  %v532_v51 = vand.u32 %v2690_v46, %v3126_v41  ;;  %v2692_v52 = vld [vmem:[%s3120_s7 + $0x10] ss:$48 sps:$4 sm:$0xff]   ;;  %v2695_v53 = vld [vmem:[%s3120_s7 + $0x18] ss:$48 sps:$4 sm:$0xff]   ;;  %v2697_v54 = vld [vmem:[%s3120_s7 + $0x1c] ss:$48 sps:$4 sm:$0xff]  }
  0x53   : > { %606 = vmatprep.subr.bf16.mxu1 %v535_v47  ;;  %v2698_v55 = vld [vmem:[%s3120_s7 + $0x70] ss:$48 sps:$4 sm:$0x3f]   ;;  %v2700_v56 = vld [vmem:[%s3120_s7 + $0x74] ss:$48 sps:$4 sm:$0x3f]   ;;  %s2325_s18 = scalar_lea.vmem (%p2900_p5), %s3551_s3, %s2648_s12 }
  0x54   : > { %564 = vmatpush1.bf16.msra.mxu0 %v526_v50  ;;  %v2701_v57 = vld [vmem:[%s3120_s7 + $0x78] ss:$48 sps:$4 sm:$0x3f]   ;;  %v541_v58 = vand.u32 %v2700_v56, %v3126_v41  ;;  %v2703_v59 = vld [vmem:[%s3120_s7 + $0x7c] ss:$48 sps:$4 sm:$0x3f]   ;;  %v538_v61 = vand.u32 %v2698_v55, %v3126_v41 }
  0x55   : > { %607 = vmatpush1.bf16.msra.mxu1 %v532_v51  ;;  %647 = vmatprep.subr.bf16.mxu0 %v2694_v49  ;;  %v547_v60 = vand.u32 %v2703_v59, %v3126_v41  ;;  %v544_v62 = vand.u32 %v2701_v57, %v3126_v41  ;;  %v2706_v63 = vld [vmem:[%s3120_s7 + $0x24] ss:$48 sps:$4 sm:$0xff]   ;;  %v2709_v0 = vld [vmem:[%s3120_s7 + $0x2c] ss:$48 sps:$4 sm:$0xff]   ;;  %v2704_v1 = vld [vmem:[%s3120_s7 + $0x20] ss:$48 sps:$4 sm:$0xff]  }
  0x56   : > { %690 = vmatprep.subr.bf16.mxu1 %v2697_v54  ;;  %v2707_v2 = vld [vmem:[%s3120_s7 + $0x28] ss:$48 sps:$4 sm:$0xff]   ;;  %v2712_v3 = vld [vmem:[%s3120_s7 + $0x84] ss:$48 sps:$4 sm:$0x3f]  }
  0x57   : > { %2452 = vmatmul.mubr.msk.bf16.vlgmr.msra.gmra.mrb[0].mxu0 %vm517_vm2, %v3137_v48  ;;  %v2710_v4 = vld [vmem:[%s3120_s7 + $0x80] ss:$48 sps:$4 sm:$0x3f]   ;;  %v2715_v5 = vld [vmem:[%s3120_s7 + $0x8c] ss:$48 sps:$4 sm:$0x3f]   ;;  %v553_v7 = vand.u32 %v2712_v3, %v3126_v41 }
  0x58   : > { %2453 = vmatmul.mubr.msk.bf16.vlgmr.msra.gmra.mrb[0].mxu1 %vm517_vm2, %v3137_v48  ;;  %648 = vmatpush1.bf16.msra.mxu0 %v2692_v52  ;;  %v2713_v6 = vld [vmem:[%s3120_s7 + $0x88] ss:$48 sps:$4 sm:$0x3f]   ;;  %v559_v8 = vand.u32 %v2715_v5, %v3126_v41  ;;  %v2718_v9 = vld [vmem:[%s3120_s7 + $0xc4] ss:$48 sps:$4 sm:$0xff]   ;;  %v550_v10 = vand.u32 %v2710_v4, %v3126_v41 }
  0x59   : > { %691 = vmatpush1.bf16.msra.mxu1 %v2695_v53  ;;  %649 = vmatprep.subr.bf16.mxu0 %v541_v58  ;;  %v556_v11 = vand.u32 %v2713_v6, %v3126_v41  ;;  %v2721_v12 = vld [vmem:[%s3120_s7 + $0xcc] ss:$48 sps:$4 sm:$0xff]   ;;  %v2724_v13 = vld [vmem:[%s3120_s7 + $0x124] ss:$48 sps:$4 sm:$0x3f]  }
  0x5a   : > { %679 = vmatprep.mubr.bf16.mxu0 %v2848_v32  ;;  %692 = vmatprep.subr.bf16.mxu1 %v547_v60  ;;  %v2727_v14 = vld [vmem:[%s3120_s7 + $0x12c] ss:$48 sps:$4 sm:$0x3f]   ;;  %v2716_v15 = vld [vmem:[%s3120_s7 + $0xc0] ss:$48 sps:$4 sm:$0xff]   ;;  %v956_v19 = vand.u32 %v2724_v13, %v3126_v41 }
  0x5b   : > { %722 = vmatprep.mubr.bf16.mxu1 %v2848_v32  ;;  %v2719_v16 = vld [vmem:[%s3120_s7 + $0xc8] ss:$48 sps:$4 sm:$0xff]   ;;  %v2722_v17 = vld [vmem:[%s3120_s7 + $0x120] ss:$48 sps:$4 sm:$0x3f]   ;;  %v962_v20 = vand.u32 %v2727_v14, %v3126_v41 }
  0x5c   : > { %650 = vmatpush1.bf16.msra.mxu0 %v538_v61  ;;  %v2725_v18 = vld [vmem:[%s3120_s7 + $0x128] ss:$48 sps:$4 sm:$0x3f]   ;;  %v953_v21 = vand.u32 %v2722_v17, %v3126_v41  ;;  %v2730_v23 = vld [vmem:[%s3120_s7 + $0xd4] ss:$48 sps:$4 sm:$0xff]  }
  0x5d   : > { %693 = vmatpush1.bf16.msra.mxu1 %v544_v62  ;;  %733 = vmatprep.subr.bf16.mxu0 %v2706_v63  ;;  %v959_v22 = vand.u32 %v2725_v18, %v3126_v41  ;;  %v2736_v24 = vld [vmem:[%s3120_s7 + $0x134] ss:$48 sps:$4 sm:$0x3f]   ;;  %v2733_v25 = vld [vmem:[%s3120_s7 + $0xdc] ss:$48 sps:$4 sm:$0xff]  }
  0x5e   : > { %776 = vmatprep.subr.bf16.mxu1 %v2709_v0  ;;  %v2739_v26 = vld [vmem:[%s3120_s7 + $0x13c] ss:$48 sps:$4 sm:$0x3f]   ;;  %v2728_v27 = vld [vmem:[%s3120_s7 + $0xd0] ss:$48 sps:$4 sm:$0xff]   ;;  %v968_v31 = vand.u32 %v2736_v24, %v3126_v41 }
  0x5f   : > { %2454 = vmatmul.mubr.msk.bf16.vlgmr.msra.gmra.mrb[4].mxu0 %vm517_vm2, %v3137_v48  ;;  %v2731_v28 = vld [vmem:[%s3120_s7 + $0xd8] ss:$48 sps:$4 sm:$0xff]   ;;  %v2734_v29 = vld [vmem:[%s3120_s7 + $0x130] ss:$48 sps:$4 sm:$0x3f]   ;;  %v974_v33 = vand.u32 %v2739_v26, %v3126_v41 }
  0x60   : > { %2455 = vmatmul.mubr.msk.bf16.vlgmr.msra.gmra.mrb[4].mxu1 %vm517_vm2, %v3137_v48  ;;  %734 = vmatpush1.bf16.msra.mxu0 %v2704_v1  ;;  %v2737_v30 = vld [vmem:[%s3120_s7 + $0x138] ss:$48 sps:$4 sm:$0x3f]   ;;  %v2742_v34 = vld [vmem:[%s3120_s7 + $0xe4] ss:$48 sps:$4 sm:$0xff]   ;;  %v965_v36 = vand.u32 %v2734_v29, %v3126_v41 }
  0x61   : > { %777 = vmatpush1.bf16.msra.mxu1 %v2707_v2  ;;  %735 = vmatprep.subr.bf16.mxu0 %v553_v7  ;;  %v2745_v35 = vld [vmem:[%s3120_s7 + $0xec] ss:$48 sps:$4 sm:$0xff]   ;;  %v971_v37 = vand.u32 %v2737_v30, %v3126_v41  ;;  %v2748_v38 = vld [vmem:[%s3120_s7 + $0x144] ss:$48 sps:$4 sm:$0x3f]  }
  0x62   : > { %778 = vmatprep.subr.bf16.mxu1 %v559_v8  ;;  %765 = vmatprep.mubr.bf16.mxu0 %v2848_v32  ;;  %v2751_v39 = vld [vmem:[%s3120_s7 + $0x14c] ss:$48 sps:$4 sm:$0x3f]   ;;  %v2740_v40 = vld [vmem:[%s3120_s7 + $0xe0] ss:$48 sps:$4 sm:$0xff]   ;;  %v980_v45 = vand.u32 %v2748_v38, %v3126_v41 }
  0x63   : > { %808 = vmatprep.mubr.bf16.mxu1 %v2848_v32  ;;  %v2743_v42 = vld [vmem:[%s3120_s7 + $0xe8] ss:$48 sps:$4 sm:$0xff]   ;;  %v2746_v43 = vld [vmem:[%s3120_s7 + $0x140] ss:$48 sps:$4 sm:$0x3f]   ;;  %v986_v46 = vand.u32 %v2751_v39, %v3126_v41 }
  0x64   : > { %736 = vmatpush1.bf16.msra.mxu0 %v550_v10  ;;  %v2749_v44 = vld [vmem:[%s3120_s7 + $0x148] ss:$48 sps:$4 sm:$0x3f]   ;;  %v2754_v47 = vld [vmem:[%s3120_s7 + $0x184] ss:$48 sps:$4 sm:$0xff]   ;;  %v977_v49 = vand.u32 %v2746_v43, %v3126_v41 }
  0x65   : > { %779 = vmatpush1.bf16.msra.mxu1 %v556_v11  ;;  %988 = vmatprep.subr.bf16.mxu0 %v2718_v9  ;;  %v983_v50 = vand.u32 %v2749_v44, %v3126_v41  ;;  %v2760_v51 = vld [vmem:[%s3120_s7 + $0x1e4] ss:$48 sps:$4 sm:$0x3f]   ;;  %v2757_v52 = vld [vmem:[%s3120_s7 + $0x18c] ss:$48 sps:$4 sm:$0xff]  }
  0x66   : > { %1031 = vmatprep.subr.bf16.mxu1 %v2721_v12  ;;  %v2763_v53 = vld [vmem:[%s3120_s7 + $0x1ec] ss:$48 sps:$4 sm:$0x3f]   ;;  %v2752_v54 = vld [vmem:[%s3120_s7 + $0x180] ss:$48 sps:$4 sm:$0xff]   ;;  %v1407_v58 = vand.u32 %v2760_v51, %v3126_v41 }
  0x67   : > { %2456 = vmatmul.mubr.msk.bf16.vlgmr.msra.gmra.mrb[8].mxu0 %vm517_vm2, %v3137_v48  ;;  %v2755_v55 = vld [vmem:[%s3120_s7 + $0x188] ss:$48 sps:$4 sm:$0xff]   ;;  %v2758_v56 = vld [vmem:[%s3120_s7 + $0x1e0] ss:$48 sps:$4 sm:$0x3f]   ;;  %v1413_v59 = vand.u32 %v2763_v53, %v3126_v41 }
  0x68   : > { %2457 = vmatmul.mubr.msk.bf16.vlgmr.msra.gmra.mrb[8].mxu1 %vm517_vm2, %v3137_v48  ;;  %989 = vmatpush1.bf16.msra.mxu0 %v2716_v15  ;;  %v2761_v57 = vld [vmem:[%s3120_s7 + $0x1e8] ss:$48 sps:$4 sm:$0x3f]   ;;  %v2766_v60 = vld [vmem:[%s3120_s7 + $0x194] ss:$48 sps:$4 sm:$0xff]   ;;  %v1404_v61 = vand.u32 %v2758_v56, %v3126_v41 }
  0x69   : > { %1032 = vmatpush1.bf16.msra.mxu1 %v2719_v16  ;;  %990 = vmatprep.subr.bf16.mxu0 %v956_v19  ;;  %v1410_v62 = vand.u32 %v2761_v57, %v3126_v41  ;;  %v2769_v63 = vld [vmem:[%s3120_s7 + $0x19c] ss:$48 sps:$4 sm:$0xff]   ;;  %v2772_v0 = vld [vmem:[%s3120_s7 + $0x1f4] ss:$48 sps:$4 sm:$0x3f]  }
  0x6a   : > { %1033 = vmatprep.subr.bf16.mxu1 %v962_v20  ;;  %1020 = vmatprep.mubr.bf16.mxu0 %v2848_v32  ;;  %v2775_v1 = vld [vmem:[%s3120_s7 + $0x1fc] ss:$48 sps:$4 sm:$0x3f]   ;;  %v2764_v2 = vld [vmem:[%s3120_s7 + $0x190] ss:$48 sps:$4 sm:$0xff]   ;;  %v1419_v6 = vand.u32 %v2772_v0, %v3126_v41 }
  0x6b   : > { %1063 = vmatprep.mubr.bf16.mxu1 %v2848_v32  ;;  %v2770_v3 = vld [vmem:[%s3120_s7 + $0x1f0] ss:$48 sps:$4 sm:$0x3f]   ;;  %v2767_v4 = vld [vmem:[%s3120_s7 + $0x198] ss:$48 sps:$4 sm:$0xff]   ;;  %v1425_v7 = vand.u32 %v2775_v1, %v3126_v41 }
  0x6c   : > { %991 = vmatpush1.bf16.msra.mxu0 %v953_v21  ;;  %v2773_v5 = vld [vmem:[%s3120_s7 + $0x1f8] ss:$48 sps:$4 sm:$0x3f]   ;;  %v2778_v8 = vld [vmem:[%s3120_s7 + $0x1a4] ss:$48 sps:$4 sm:$0xff]   ;;  %v1416_v10 = vand.u32 %v2770_v3, %v3126_v41 }
  0x6d   : > { %1034 = vmatpush1.bf16.msra.mxu1 %v959_v22  ;;  %1074 = vmatprep.subr.bf16.mxu0 %v2730_v23  ;;  %v2781_v9 = vld [vmem:[%s3120_s7 + $0x1ac] ss:$48 sps:$4 sm:$0xff]   ;;  %v1422_v11 = vand.u32 %v2773_v5, %v3126_v41  ;;  %v2784_v12 = vld [vmem:[%s3120_s7 + $0x204] ss:$48 sps:$4 sm:$0x3f]  }
  0x6e   : > { %1117 = vmatprep.subr.bf16.mxu1 %v2733_v25  ;;  %v2787_v13 = vld [vmem:[%s3120_s7 + $0x20c] ss:$48 sps:$4 sm:$0x3f]   ;;  %v2776_v14 = vld [vmem:[%s3120_s7 + $0x1a0] ss:$48 sps:$4 sm:$0xff]   ;;  %v1431_v18 = vand.u32 %v2784_v12, %v3126_v41 }
  0x6f   : > { %2506 = vmatmul.mubr.msk.bf16.vlgmr.msra.gmra.mrb[12].mxu0 %vm517_vm2, %v3137_v48  ;;  %v2779_v15 = vld [vmem:[%s3120_s7 + $0x1a8] ss:$48 sps:$4 sm:$0xff]   ;;  %v2782_v16 = vld [vmem:[%s3120_s7 + $0x200] ss:$48 sps:$4 sm:$0x3f]   ;;  %v1437_v19 = vand.u32 %v2787_v13, %v3126_v41 }
  0x70   : > { %2507 = vmatmul.mubr.msk.bf16.vlgmr.msra.gmra.mrb[12].mxu1 %vm517_vm2, %v3137_v48  ;;  %1075 = vmatpush1.bf16.msra.mxu0 %v2728_v27  ;;  %v2785_v17 = vld [vmem:[%s3120_s7 + $0x208] ss:$48 sps:$4 sm:$0x3f]   ;;  %v1428_v20 = vand.u32 %v2782_v16, %v3126_v41  ;;  %v2790_v22 = vld [vmem:[%s3120_s7 + $0x244] ss:$48 sps:$4 sm:$0xff]  }
  0x71   : > { %1118 = vmatpush1.bf16.msra.mxu1 %v2731_v28  ;;  %1076 = vmatprep.subr.bf16.mxu0 %v968_v31  ;;  %v1434_v21 = vand.u32 %v2785_v17, %v3126_v41  ;;  %v2793_v23 = vld [vmem:[%s3120_s7 + $0x24c] ss:$48 sps:$4 sm:$0xff]   ;;  %v2796_v24 = vld [vmem:[%s3120_s7 + $0x2a4] ss:$48 sps:$4 sm:$0x3f]  }
  0x72   : > { %1119 = vmatprep.subr.bf16.mxu1 %v974_v33  ;;  %1106 = vmatprep.mubr.bf16.mxu0 %v2848_v32  ;;  %v2799_v25 = vld [vmem:[%s3120_s7 + $0x2ac] ss:$48 sps:$4 sm:$0x3f]   ;;  %v2788_v26 = vld [vmem:[%s3120_s7 + $0x240] ss:$48 sps:$4 sm:$0xff]   ;;  %v1858_v30 = vand.u32 %v2796_v24, %v3126_v41 }
  0x73   : > { %1149 = vmatprep.mubr.bf16.mxu1 %v2848_v32  ;;  %v2791_v27 = vld [vmem:[%s3120_s7 + $0x248] ss:$48 sps:$4 sm:$0xff]   ;;  %v2794_v28 = vld [vmem:[%s3120_s7 + $0x2a0] ss:$48 sps:$4 sm:$0x3f]   ;;  %v1864_v31 = vand.u32 %v2799_v25, %v3126_v41 }
  0x74   : > { %1077 = vmatpush1.bf16.msra.mxu0 %v965_v36  ;;  %v2797_v29 = vld [vmem:[%s3120_s7 + $0x2a8] ss:$48 sps:$4 sm:$0x3f]   ;;  %v1855_v33 = vand.u32 %v2794_v28, %v3126_v41  ;;  %v2805_v36 = vld [vmem:[%s3120_s7 + $0x25c] ss:$48 sps:$4 sm:$0xff]  }
  0x75   : > { %1120 = vmatpush1.bf16.msra.mxu1 %v971_v37  ;;  %1160 = vmatprep.subr.bf16.mxu0 %v2742_v34  ;;  %v1861_v34 = vand.u32 %v2797_v29, %v3126_v41  ;;  %v2808_v37 = vld [vmem:[%s3120_s7 + $0x2b4] ss:$48 sps:$4 sm:$0x3f]   ;;  %v2811_v38 = vld [vmem:[%s3120_s7 + $0x2bc] ss:$48 sps:$4 sm:$0x3f]  }
  0x76   : > { %1203 = vmatprep.subr.bf16.mxu1 %v2745_v35  ;;  %v2802_v35 = vld [vmem:[%s3120_s7 + $0x254] ss:$48 sps:$4 sm:$0xff]   ;;  %v2800_v39 = vld [vmem:[%s3120_s7 + $0x250] ss:$48 sps:$4 sm:$0xff]   ;;  %v1870_v44 = vand.u32 %v2808_v37, %v3126_v41 }
  0x77   : > { %2508 = vmatmul.mubr.msk.bf16.vlgmr.msra.gmra.mrb[16].mxu0 %vm517_vm2, %v3137_v48  ;;  %v2809_v43 = vld [vmem:[%s3120_s7 + $0x2b8] ss:$48 sps:$4 sm:$0x3f]   ;;  %v2820_v51 = vld [vmem:[%s3120_s7 + $0x2c4] ss:$48 sps:$4 sm:$0x3f]  }
  0x78   : > { %2509 = vmatmul.mubr.msk.bf16.vlgmr.msra.gmra.mrb[16].mxu1 %vm517_vm2, %v3137_v48  ;;  %1161 = vmatpush1.bf16.msra.mxu0 %v2740_v40  ;;  %v2803_v40 = vld [vmem:[%s3120_s7 + $0x258] ss:$48 sps:$4 sm:$0xff]   ;;  %v2812_v53 = vld [vmem:[%s3120_s7 + $0x260] ss:$48 sps:$4 sm:$0xff]   ;;  %v1882_v57 = vand.u32 %v2820_v51, %v3126_v41 }
  0x79   : > { %1204 = vmatpush1.bf16.msra.mxu1 %v2743_v42  ;;  %1162 = vmatprep.subr.bf16.mxu0 %v980_v45  ;;  %v2806_v42 = vld [vmem:[%s3120_s7 + $0x2b0] ss:$48 sps:$4 sm:$0x3f]   ;;  %v1876_v45 = vand.u32 %v2811_v38, %v3126_v41  ;;  %v2821_v56 = vld [vmem:[%s3120_s7 + $0x2c8] ss:$48 sps:$4 sm:$0x3f]  }
  0x7a   : > { %1205 = vmatprep.subr.bf16.mxu1 %v986_v46  ;;  %1192 = vmatprep.mubr.bf16.mxu0 %v2848_v32  ;;  %v1867_v46 = vand.u32 %v2806_v42, %v3126_v41 }
  0x7b   : > { %1235 = vmatprep.mubr.bf16.mxu1 %v2848_v32 }
  0x7c   : > { %1163 = vmatpush1.bf16.msra.mxu0 %v977_v49  ;;  %v2814_v49 = vld [vmem:[%s3120_s7 + $0x264] ss:$48 sps:$4 sm:$0xff]  }
  0x7d   : > { %1206 = vmatpush1.bf16.msra.mxu1 %v983_v50  ;;  %1439 = vmatprep.subr.bf16.mxu0 %v2754_v47  ;;  %v1873_v47 = vand.u32 %v2809_v43, %v3126_v41  ;;  %v2817_v50 = vld [vmem:[%s3120_s7 + $0x26c] ss:$48 sps:$4 sm:$0xff]  }
  0x7e   : > { %1482 = vmatprep.subr.bf16.mxu1 %v2757_v52  ;;  %v2823_v52 = vld [vmem:[%s3120_s7 + $0x2cc] ss:$48 sps:$4 sm:$0x3f]  }
  0x7f   : > { %2510 = vmatmul.mubr.msk.bf16.vlgmr.msra.gmra.mrb[20].mxu0 %vm517_vm2, %v3137_v48 }
  0x80   : > { %2511 = vmatmul.mubr.msk.bf16.vlgmr.msra.gmra.mrb[20].mxu1 %vm517_vm2, %v3137_v48  ;;  %1440 = vmatpush1.bf16.msra.mxu0 %v2752_v54  ;;  %v2815_v54 = vld [vmem:[%s3120_s7 + $0x268] ss:$48 sps:$4 sm:$0xff]  }
  0x81   : > { %1483 = vmatpush1.bf16.msra.mxu1 %v2755_v55  ;;  %1441 = vmatprep.subr.bf16.mxu0 %v1407_v58  ;;  %v2818_v55 = vld [vmem:[%s3120_s7 + $0x2c0] ss:$48 sps:$4 sm:$0x3f]   ;;  %v1888_v58 = vand.u32 %v2823_v52, %v3126_v41 }
  0x82   : > { %1484 = vmatprep.subr.bf16.mxu1 %v1413_v59  ;;  %1471 = vmatprep.mubr.bf16.mxu0 %v2848_v32  ;;  %v1879_v59 = vand.u32 %v2818_v55, %v3126_v41 }
  0x83   : > { %1514 = vmatprep.mubr.bf16.mxu1 %v2848_v32 }
  0x84   : > { %1442 = vmatpush1.bf16.msra.mxu0 %v1404_v61 }
  0x85   : > { %1485 = vmatpush1.bf16.msra.mxu1 %v1410_v62  ;;  %1525 = vmatprep.subr.bf16.mxu0 %v2766_v60  ;;  %v1885_v60 = vand.u32 %v2821_v56, %v3126_v41 }
  0x86   : > { %1568 = vmatprep.subr.bf16.mxu1 %v2769_v63 }
  0x87   : > { %2560 = vmatmul.mubr.msk.bf16.vlgmr.msra.gmra.mrb[24].mxu0 %vm517_vm2, %v3137_v48 }
  0x88   : > { %2561 = vmatmul.mubr.msk.bf16.vlgmr.msra.gmra.mrb[24].mxu1 %vm517_vm2, %v3137_v48  ;;  %1526 = vmatpush1.bf16.msra.mxu0 %v2764_v2 }
  0x89   : > { %1569 = vmatpush1.bf16.msra.mxu1 %v2767_v4  ;;  %1527 = vmatprep.subr.bf16.mxu0 %v1419_v6 }
  0x8a   : > { %1570 = vmatprep.subr.bf16.mxu1 %v1425_v7  ;;  %1557 = vmatprep.mubr.bf16.mxu0 %v2848_v32 }
  0x8b   : > { %1600 = vmatprep.mubr.bf16.mxu1 %v2848_v32 }
  0x8c   : > { %1528 = vmatpush1.bf16.msra.mxu0 %v1416_v10 }
  0x8d   : > { %1571 = vmatpush1.bf16.msra.mxu1 %v1422_v11  ;;  %1611 = vmatprep.subr.bf16.mxu0 %v2778_v8 }
  0x8e   : > { %1654 = vmatprep.subr.bf16.mxu1 %v2781_v9 }
  0x8f   : > { %2562 = vmatmul.mubr.msk.bf16.vlgmr.msra.gmra.mrb[28].mxu0 %vm517_vm2, %v3137_v48 }
  0x90   : > { %2563 = vmatmul.mubr.msk.bf16.vlgmr.msra.gmra.mrb[28].mxu1 %vm517_vm2, %v3137_v48  ;;  %1612 = vmatpush1.bf16.msra.mxu0 %v2776_v14 }
  0x91   : > { %1655 = vmatpush1.bf16.msra.mxu1 %v2779_v15  ;;  %1613 = vmatprep.subr.bf16.mxu0 %v1431_v18 }
  0x92   : > { %1656 = vmatprep.subr.bf16.mxu1 %v1437_v19  ;;  %1643 = vmatprep.mubr.bf16.mxu0 %v2848_v32 }
  0x93   : > { %1686 = vmatprep.mubr.bf16.mxu1 %v2848_v32 }
  0x94   : > { %1614 = vmatpush1.bf16.msra.mxu0 %v1428_v20 }
  0x95   : > { %1657 = vmatpush1.bf16.msra.mxu1 %v1434_v21  ;;  %1890 = vmatprep.subr.bf16.mxu0 %v2790_v22 }
  0x96   : > { %1933 = vmatprep.subr.bf16.mxu1 %v2793_v23 }
  0x97   : > { %2564 = vmatmul.mubr.msk.bf16.vlgmr.msra.gmra.mrb[32].mxu0 %vm517_vm2, %v3137_v48 }
  0x98   : > { %2565 = vmatmul.mubr.msk.bf16.vlgmr.msra.gmra.mrb[32].mxu1 %vm517_vm2, %v3137_v48  ;;  %1891 = vmatpush1.bf16.msra.mxu0 %v2788_v26 }
  0x99   : > { %1934 = vmatpush1.bf16.msra.mxu1 %v2791_v27  ;;  %1892 = vmatprep.subr.bf16.mxu0 %v1858_v30 }
  0x9a   : > { %1935 = vmatprep.subr.bf16.mxu1 %v1864_v31  ;;  %1922 = vmatprep.mubr.bf16.mxu0 %v2848_v32 }
  0x9b   : > { %1965 = vmatprep.mubr.bf16.mxu1 %v2848_v32 }
  0x9c   : > { %1893 = vmatpush1.bf16.msra.mxu0 %v1855_v33 }
  0x9d   : > { %1936 = vmatpush1.bf16.msra.mxu1 %v1861_v34  ;;  %1976 = vmatprep.subr.bf16.mxu0 %v2802_v35 }
  0x9e   : > { %2019 = vmatprep.subr.bf16.mxu1 %v2805_v36 }
  0x9f   : > { %2614 = vmatmul.mubr.msk.bf16.vlgmr.msra.gmra.mrb[36].mxu0 %vm517_vm2, %v3137_v48 }
  0xa0   : > { %2615 = vmatmul.mubr.msk.bf16.vlgmr.msra.gmra.mrb[36].mxu1 %vm517_vm2, %v3137_v48  ;;  %1977 = vmatpush1.bf16.msra.mxu0 %v2800_v39 }
  0xa1   : > { %2020 = vmatpush1.bf16.msra.mxu1 %v2803_v40  ;;  %1978 = vmatprep.subr.bf16.mxu0 %v1870_v44 }
  0xa2   : > { %2021 = vmatprep.subr.bf16.mxu1 %v1876_v45  ;;  %2008 = vmatprep.mubr.bf16.mxu0 %v2848_v32 }
  0xa3   : > { %2051 = vmatprep.mubr.bf16.mxu1 %v2848_v32 }
  0xa4   : > { %1979 = vmatpush1.bf16.msra.mxu0 %v1867_v46 }
  0xa5   : > { %2022 = vmatpush1.bf16.msra.mxu1 %v1873_v47  ;;  %2062 = vmatprep.subr.bf16.mxu0 %v2814_v49 }
  0xa6   : > { %2105 = vmatprep.subr.bf16.mxu1 %v2817_v50 }
  0xa7   : > { %2616 = vmatmul.mubr.msk.bf16.vlgmr.msra.gmra.mrb[40].mxu0 %vm517_vm2, %v3137_v48 }
  0xa8   : > { %2617 = vmatmul.mubr.msk.bf16.vlgmr.msra.gmra.mrb[40].mxu1 %vm517_vm2, %v3137_v48  ;;  %2063 = vmatpush1.bf16.msra.mxu0 %v2812_v53 }
  0xa9   : > { %2106 = vmatpush1.bf16.msra.mxu1 %v2815_v54  ;;  %2064 = vmatprep.subr.bf16.mxu0 %v1882_v57 }
  0xaa   : > { %2107 = vmatprep.subr.bf16.mxu1 %v1888_v58  ;;  %2094 = vmatprep.mubr.bf16.mxu0 %v2848_v32 }
  0xab   : > { %2137 = vmatprep.mubr.bf16.mxu1 %v2848_v32 }
  0xac   : > { %2065 = vmatpush1.bf16.msra.mxu0 %v1879_v59 }
  0xad   : > { %2108 = vmatpush1.bf16.msra.mxu1 %v1885_v60 }
  0xaf   : > { %2618 = vmatmul.mubr.msk.bf16.vlgmr.msra.gmra.mrb[44].mxu0 %vm517_vm2, %v3137_v48 }
  0xb0   : > { %2619 = vmatmul.mubr.msk.bf16.vlgmr.msra.gmra.mrb[44].mxu1 %vm517_vm2, %v3137_v48 }
 0x12a   : > { %v3343_v61 = vpop.f32.mrb[0].mxu0 }
 0x12b   : > { %v3345_v62 = vpop.f32.mrb[0].mxu1  ;;  %v3347_v63 = vpop.f32.mrb[1].mxu0 }
 0x12c   : > { %v3349_v41 = vpop.f32.mrb[1].mxu1  ;;  %v3351_v0 = vpop.f32.mrb[2].mxu0 }
 0x12d   : > { %v3353_v1 = vpop.f32.mrb[2].mxu1  ;;  %v3355_v32 = vpop.f32.mrb[3].mxu0 }
 0x12e   : > { %v3357_v2 = vpop.f32.mrb[3].mxu1 }
 0x132   : > { %v3359_v3 = vpop.f32.mrb[4].mxu0 }
 0x133   : > { %v3361_v4 = vpop.f32.mrb[4].mxu1  ;;  %v3363_v48 = vpop.f32.mrb[5].mxu0 }
 0x134   : > { %v3365_v5 = vpop.f32.mrb[5].mxu1  ;;  %v3367_v6 = vpop.f32.mrb[6].mxu0 }
 0x135   : > { %v3369_v7 = vpop.f32.mrb[6].mxu1  ;;  %v3371_v8 = vpop.f32.mrb[7].mxu0 }
 0x136   : > { %v3373_v9 = vpop.f32.mrb[7].mxu1 }
 0x13a   : > { %v3375_v10 = vpop.f32.mrb[8].mxu0 }
 0x13b   : > { %v3377_v11 = vpop.f32.mrb[8].mxu1  ;;  %v3379_v12 = vpop.f32.mrb[9].mxu0 }
 0x13c   : > { %v3381_v13 = vpop.f32.mrb[9].mxu1  ;;  %v3383_v14 = vpop.f32.mrb[10].mxu0 }
 0x13d   : > { %v3385_v15 = vpop.f32.mrb[10].mxu1  ;;  %v3387_v16 = vpop.f32.mrb[11].mxu0 }
 0x13e   : > { %v3389_v17 = vpop.f32.mrb[11].mxu1 }
 0x142   : > { %v1022_v18 = vpop.f32.mrb[12].mxu0 }
 0x143   : > { %v1065_v19 = vpop.f32.mrb[12].mxu1  ;;  %v1246_v20 = vmax.f32 %v3343_v61, %v1022_v18  ;;  %v1024_v22 = vpop.f32.mrb[13].mxu0 }
 0x144   : > { %v1248_v21 = vmax.f32 %v3345_v62, %v1065_v19  ;;  %v1067_v23 = vpop.f32.mrb[13].mxu1  ;;  %v1247_v24 = vmax.f32 %v3347_v63, %v1024_v22  ;;  %v1026_v26 = vpop.f32.mrb[14].mxu0 }
 0x145   : > { %v1249_v25 = vmax.f32 %v3349_v41, %v1067_v23  ;;  %v1069_v27 = vpop.f32.mrb[14].mxu1  ;;  %v1258_v28 = vmax.f32 %v3351_v0, %v1026_v26  ;;  %v1028_v30 = vpop.f32.mrb[15].mxu0 }
 0x146   : > { %v1260_v29 = vmax.f32 %v3353_v1, %v1069_v27  ;;  %v1071_v31 = vpop.f32.mrb[15].mxu1  ;;  %v1259_v33 = vmax.f32 %v3355_v32, %v1028_v30 }
 0x147   : > { %v1261_v34 = vmax.f32 %v3357_v2, %v1071_v31 }
 0x14a   : > { %v1108_v35 = vpop.f32.mrb[16].mxu0 }
 0x14b   : > { %v1151_v36 = vpop.f32.mrb[16].mxu1  ;;  %v1250_v37 = vmax.f32 %v3359_v3, %v1108_v35  ;;  %v1110_v39 = vpop.f32.mrb[17].mxu0 }
 0x14c   : > { %v1252_v38 = vmax.f32 %v3361_v4, %v1151_v36  ;;  %v1153_v40 = vpop.f32.mrb[17].mxu1  ;;  %v1251_v42 = vmax.f32 %v3363_v48, %v1110_v39  ;;  %v1112_v44 = vpop.f32.mrb[18].mxu0 }
 0x14d   : > { %v1253_v43 = vmax.f32 %v3365_v5, %v1153_v40  ;;  %v1155_v45 = vpop.f32.mrb[18].mxu1  ;;  %v1262_v46 = vmax.f32 %v3367_v6, %v1112_v44  ;;  %v1114_v49 = vpop.f32.mrb[19].mxu0 }
 0x14e   : > { %v1264_v47 = vmax.f32 %v3369_v7, %v1155_v45  ;;  %v1157_v50 = vpop.f32.mrb[19].mxu1  ;;  %v1263_v51 = vmax.f32 %v3371_v8, %v1114_v49  ;;  %v3439_v35 = vpop.permute.xlu0 %2176 }
 0x14f   : > { %v1265_v52 = vmax.f32 %v3373_v9, %v1157_v50 }
 0x152   : > { %v1194_v53 = vpop.f32.mrb[20].mxu0 }
 0x153   : > { %v1237_v54 = vpop.f32.mrb[20].mxu1  ;;  %v1254_v55 = vmax.f32 %v3375_v10, %v1194_v53  ;;  %v1196_v57 = vpop.f32.mrb[21].mxu0 }
 0x154   : > { %v1256_v56 = vmax.f32 %v3377_v11, %v1237_v54  ;;  %v1239_v58 = vpop.f32.mrb[21].mxu1  ;;  %v1255_v59 = vmax.f32 %v3379_v12, %v1196_v57  ;;  %v1198_v61 = vpop.f32.mrb[22].mxu0 }
 0x155   : > { %v1257_v60 = vmax.f32 %v3381_v13, %v1239_v58  ;;  %v1241_v62 = vpop.f32.mrb[22].mxu1  ;;  %v1266_v63 = vmax.f32 %v3383_v14, %v1198_v61  ;;  %v1200_v0 = vpop.f32.mrb[23].mxu0 }
 0x156   : > { %v1268_v41 = vmax.f32 %v3385_v15, %v1241_v62  ;;  %v1243_v1 = vpop.f32.mrb[23].mxu1  ;;  %v1267_v32 = vmax.f32 %v3387_v16, %v1200_v0  ;;  %v3457_v54 = vpop.permute.xlu0 %2181 }
 0x157   : > { %v1269_v2 = vmax.f32 %v3389_v17, %v1243_v1 }
 0x15a   : > { %v1473_v3 = vpop.f32.mrb[24].mxu0 }
 0x15b   : > { %v1516_v4 = vpop.f32.mrb[24].mxu1  ;;  %v1697_v48 = vmax.f32 %v1246_v20, %v1473_v3  ;;  %v1475_v6 = vpop.f32.mrb[25].mxu0 }
 0x15c   : > { %v1699_v5 = vmax.f32 %v1248_v21, %v1516_v4  ;;  %v1518_v7 = vpop.f32.mrb[25].mxu1  ;;  %v1698_v8 = vmax.f32 %v1247_v24, %v1475_v6  ;;  %v1477_v10 = vpop.f32.mrb[26].mxu0 }
 0x15d   : > { %v1700_v9 = vmax.f32 %v1249_v25, %v1518_v7  ;;  %v1520_v11 = vpop.f32.mrb[26].mxu1  ;;  %v3415_v12 = vmax.f32 %v1258_v28, %v1477_v10  ;;  %v1479_v14 = vpop.f32.mrb[27].mxu0 }
 0x15e   : > { %v3417_v13 = vmax.f32 %v1260_v29, %v1520_v11  ;;  %v1522_v15 = vpop.f32.mrb[27].mxu1  ;;  %v3419_v18 = vmax.f32 %v1259_v33, %v1479_v14 }
 0x15f   : > { %v3421_v16 = vmax.f32 %v1261_v34, %v1522_v15 }
 0x162   : > { %v1559_v17 = vpop.f32.mrb[28].mxu0 }
 0x163   : > { %v1602_v19 = vpop.f32.mrb[28].mxu1  ;;  %v3423_v20 = vmax.f32 %v1250_v37, %v1559_v17  ;;  %v1561_v22 = vpop.f32.mrb[29].mxu0 }
 0x164   : > { %v3425_v21 = vmax.f32 %v1252_v38, %v1602_v19  ;;  %v1604_v23 = vpop.f32.mrb[29].mxu1  ;;  %v3427_v24 = vmax.f32 %v1251_v42, %v1561_v22  ;;  %v1563_v26 = vpop.f32.mrb[30].mxu0 }
 0x165   : > { %v3429_v25 = vmax.f32 %v1253_v43, %v1604_v23  ;;  %v1606_v27 = vpop.f32.mrb[30].mxu1  ;;  %v3431_v28 = vmax.f32 %v1262_v46, %v1563_v26  ;;  %v1565_v30 = vpop.f32.mrb[31].mxu0 }
 0x166   : > { %v3433_v29 = vmax.f32 %v1264_v47, %v1606_v27  ;;  %v1608_v31 = vpop.f32.mrb[31].mxu1  ;;  %v3435_v33 = vmax.f32 %v1263_v51, %v1565_v30 }
 0x167   : > { %v3437_v34 = vmax.f32 %v1265_v52, %v1608_v31 }
 0x16a   : > { %v1645_v36 = vpop.f32.mrb[32].mxu0 }
 0x16b   : > { %v1688_v37 = vpop.f32.mrb[32].mxu1  ;;  %v3441_v38 = vmax.f32 %v1254_v55, %v1645_v36  ;;  %v1647_v40 = vpop.f32.mrb[33].mxu0 }
 0x16c   : > { %v3443_v39 = vmax.f32 %v1256_v56, %v1688_v37  ;;  %v1690_v42 = vpop.f32.mrb[33].mxu1  ;;  %v3445_v43 = vmax.f32 %v1255_v59, %v1647_v40  ;;  %v1649_v45 = vpop.f32.mrb[34].mxu0 }
 0x16d   : > { %v3447_v44 = vmax.f32 %v1257_v60, %v1690_v42  ;;  %v1692_v46 = vpop.f32.mrb[34].mxu1  ;;  %v3449_v47 = vmax.f32 %v1266_v63, %v1649_v45  ;;  %v1651_v50 = vpop.f32.mrb[35].mxu0 }
 0x16e   : > { %v3451_v49 = vmax.f32 %v1268_v41, %v1692_v46  ;;  %v1694_v51 = vpop.f32.mrb[35].mxu1  ;;  %v3453_v52 = vmax.f32 %v1267_v32, %v1651_v50 }
 0x16f   : > { %v3455_v53 = vmax.f32 %v1269_v2, %v1694_v51 }
 0x172   : > { %v1924_v55 = vpop.f32.mrb[36].mxu0 }
 0x173   : > { %v1967_v56 = vpop.f32.mrb[36].mxu1  ;;  %v2148_v57 = vmax.f32 %v1697_v48, %v1924_v55  ;;  %v1926_v59 = vpop.f32.mrb[37].mxu0 }
 0x174   : > { %v2150_v58 = vmax.f32 %v1699_v5, %v1967_v56  ;;  %v1969_v60 = vpop.f32.mrb[37].mxu1  ;;  %v2149_v61 = vmax.f32 %v1698_v8, %v1926_v59  ;;  %v1928_v63 = vpop.f32.mrb[38].mxu0 }
 0x175   : > { %v2151_v62 = vmax.f32 %v1700_v9, %v1969_v60  ;;  %v1971_v41 = vpop.f32.mrb[38].mxu1  ;;  %v2184_v0 = vadd.f32 %v3439_v35, %v2148_v57  ;;  %v2160_v32 = vmax.f32 %v3415_v12, %v1928_v63  ;;  %v1930_v3 = vpop.f32.mrb[39].mxu0 }
 0x176   : > { %v2186_v1 = vadd.f32 %v3439_v35, %v2150_v58  ;;  %v2162_v2 = vmax.f32 %v3417_v13, %v1971_v41  ;;  %v1973_v4 = vpop.f32.mrb[39].mxu1  ;;  %v2185_v48 = vadd.f32 %v3439_v35, %v2149_v61  ;;  %v2161_v6 = vmax.f32 %v3419_v18, %v1930_v3 }
 0x177   : > { %v2187_v5 = vadd.f32 %v3439_v35, %v2151_v62  ;;  %v2163_v7 = vmax.f32 %v3421_v16, %v1973_v4  ;;  %v2208_v8 = vmax.f32 %v2184_v0, 0.0  ;;  %v2196_v10 = vadd.f32 %v3457_v54, %v2160_v32 }
 0x178   : > { %v2210_v9 = vmax.f32 %v2186_v1, 0.0  ;;  %v2198_v11 = vadd.f32 %v3457_v54, %v2162_v2  ;;  %v2209_v14 = vmax.f32 %v2185_v48, 0.0  ;;  %v2197_v13 = vadd.f32 %v3457_v54, %v2161_v6 }
 0x179   : > { %v2211_v12 = vmax.f32 %v2187_v5, 0.0  ;;  %v2199_v15 = vadd.f32 %v3457_v54, %v2163_v7  ;;  %v2220_v17 = vmax.f32 %v2196_v10, 0.0 }
 0x17a   : > { %v2222_v19 = vmax.f32 %v2198_v11, 0.0  ;;  %v2636_v22 = vpack.c.bf16 %v2209_v14, %v2208_v8  ;;  %v2221_v26 = vmax.f32 %v2197_v13, 0.0  ;;  %v2010_v27 = vpop.f32.mrb[40].mxu0 }
 0x17b   : > { %v2637_v23 = vpack.c.bf16 %v2211_v12, %v2210_v9  ;;  %v2223_v18 = vmax.f32 %v2199_v15, 0.0  ;;  %v2053_v16 = vpop.f32.mrb[40].mxu1  ;;  %v2152_v30 = vmax.f32 %v3423_v20, %v2010_v27  ;;  %v2012_v36 = vpop.f32.mrb[41].mxu0 }
 0x17c   : > { %v2154_v31 = vmax.f32 %v3425_v21, %v2053_v16  ;;  %v2055_v37 = vpop.f32.mrb[41].mxu1  ;;  %2304 = vst [vmem:[%s3475_s11] sm:$0xff] %v2636_v22  ;;  %v2642_v40 = vpack.c.bf16 %v2221_v26, %v2220_v17  ;;  %v2153_v45 = vmax.f32 %v3427_v24, %v2012_v36  ;;  %v2014_v50 = vpop.f32.mrb[42].mxu0 }
 0x17d   : > { %2305 = vst [vmem:[%s3475_s11 + $0x8] sm:$0xff] %v2637_v23  ;;  %v2643_v42 = vpack.c.bf16 %v2223_v18, %v2222_v19  ;;  %v2155_v46 = vmax.f32 %v3429_v25, %v2055_v37  ;;  %v2057_v20 = vpop.f32.mrb[42].mxu1  ;;  %v2188_v21 = vadd.f32 %v3439_v35, %v2152_v30  ;;  %v2164_v55 = vmax.f32 %v3431_v28, %v2014_v50  ;;  %v2016_v57 = vpop.f32.mrb[43].mxu0 }
 0x17e   : > { %v2190_v51 = vadd.f32 %v3439_v35, %v2154_v31  ;;  %v2166_v56 = vmax.f32 %v3433_v29, %v2057_v20  ;;  %v2059_v58 = vpop.f32.mrb[43].mxu1  ;;  %2310 = vst [vmem:[%s3475_s11 + $0x30] sm:$0xff] %v2642_v40  ;;  %v2189_v59 = vadd.f32 %v3439_v35, %v2153_v45  ;;  %v2165_v25 = vmax.f32 %v3435_v33, %v2016_v57 }
 0x17f   : > { %2311 = vst [vmem:[%s3475_s11 + $0x38] sm:$0xff] %v2643_v42  ;;  %v2191_v24 = vadd.f32 %v3439_v35, %v2155_v46  ;;  %v2167_v60 = vmax.f32 %v3437_v34, %v2059_v58  ;;  %v2212_v61 = vmax.f32 %v2188_v21, 0.0  ;;  %v2200_v63 = vadd.f32 %v3457_v54, %v2164_v55 }
 0x180   : > { %v2214_v62 = vmax.f32 %v2190_v51, 0.0  ;;  %v2202_v28 = vadd.f32 %v3457_v54, %v2166_v56  ;;  %v2213_v41 = vmax.f32 %v2189_v59, 0.0  ;;  %v2201_v0 = vadd.f32 %v3457_v54, %v2165_v25 }
 0x181   : > { %v2215_v29 = vmax.f32 %v2191_v24, 0.0  ;;  %v2203_v1 = vadd.f32 %v3457_v54, %v2167_v60  ;;  %v2224_v32 = vmax.f32 %v2200_v63, 0.0 }
 0x182   : > { %v2226_v2 = vmax.f32 %v2202_v28, 0.0  ;;  %v2638_v3 = vpack.c.bf16 %v2213_v41, %v2212_v61  ;;  %v2225_v4 = vmax.f32 %v2201_v0, 0.0  ;;  %v2096_v48 = vpop.f32.mrb[44].mxu0 }
 0x183   : > { %v2639_v33 = vpack.c.bf16 %v2215_v29, %v2214_v62  ;;  %v2227_v34 = vmax.f32 %v2203_v1, 0.0  ;;  %v2139_v5 = vpop.f32.mrb[44].mxu1  ;;  %v2156_v6 = vmax.f32 %v3441_v38, %v2096_v48  ;;  %v2098_v8 = vpop.f32.mrb[45].mxu0 }
 0x184   : > { %v2158_v7 = vmax.f32 %v3443_v39, %v2139_v5  ;;  %v2141_v9 = vpop.f32.mrb[45].mxu1  ;;  %2306 = vst [vmem:[%s3475_s11 + $0x10] sm:$0xff] %v2638_v3  ;;  %v2644_v10 = vpack.c.bf16 %v2225_v4, %v2224_v32  ;;  %v2157_v14 = vmax.f32 %v3445_v43, %v2098_v8  ;;  %v2100_v13 = vpop.f32.mrb[46].mxu0  ;;  %v2340_v20 = vld [vmem:[%s3475_s11 + $0x8] sm:$0xff] (%p2900_p5) }
 0x185   : > { %2307 = vst [vmem:[%s3475_s11 + $0x18] sm:$0xff] %v2639_v33  ;;  %v2645_v11 = vpack.c.bf16 %v2227_v34, %v2226_v2  ;;  %v2159_v12 = vmax.f32 %v3447_v44, %v2141_v9  ;;  %v2143_v15 = vpop.f32.mrb[46].mxu1  ;;  %v2192_v17 = vadd.f32 %v3439_v35, %v2156_v6  ;;  %v2168_v39 = vmax.f32 %v3449_v47, %v2100_v13  ;;  %v2102_v22 = vpop.f32.mrb[47].mxu0  ;;  %v2350_v57 = vld [vmem:[%s3475_s11 + $0x30] sm:$0xff] (%p2900_p5) }
 0x186   : > { %v2194_v38 = vadd.f32 %v3439_v35, %v2158_v7  ;;  %v2170_v19 = vmax.f32 %v3451_v49, %v2143_v15  ;;  %v2145_v23 = vpop.f32.mrb[47].mxu1  ;;  %2312 = vst [vmem:[%s3475_s11 + $0x40] sm:$0xff] %v2644_v10  ;;  %v2193_v26 = vadd.f32 %v3439_v35, %v2157_v14  ;;  %v2169_v44 = vmax.f32 %v3453_v52, %v2102_v22  ;;  %v2352_v58 = vld [vmem:[%s3475_s11 + $0x38] sm:$0xff] (%p2900_p5) }
 0x187   : > { %2313 = vst [vmem:[%s3475_s11 + $0x48] sm:$0xff] %v2645_v11  ;;  %v2195_v43 = vadd.f32 %v3439_v35, %v2159_v12  ;;  %v2171_v18 = vmax.f32 %v3455_v53, %v2145_v23  ;;  %v2216_v27 = vmax.f32 %v2192_v17, 0.0  ;;  %v2204_v47 = vadd.f32 %v3457_v54, %v2168_v39  ;;  %2341 = vst [vmem:[%s2325_s18 + $0x8] sm:$0xff] (%p2900_p5), %v2340_v20 }
 0x188   : > { %v2218_v16 = vmax.f32 %v2194_v38, 0.0  ;;  %v2206_v49 = vadd.f32 %v3457_v54, %v2170_v19  ;;  %v2217_v30 = vmax.f32 %v2193_v26, 0.0  ;;  %v2205_v36 = vadd.f32 %v3457_v54, %v2169_v44  ;;  %2351 = vst [vmem:[%s2325_s18 + $0xc0] sm:$0xff] (%p2900_p5), %v2350_v57  ;;  %2353 = vst [vmem:[%s2325_s18 + $0xc8] sm:$0xff] (%p2900_p5), %v2352_v58 }
 0x189   : > { %v2219_v31 = vmax.f32 %v2195_v43, 0.0  ;;  %v2207_v35 = vadd.f32 %v3457_v54, %v2171_v18  ;;  %v2228_v37 = vmax.f32 %v2204_v47, 0.0  ;;  %2322 = sbr.rel (!%p2900_p5) target bundleno = 408 (0x198), region = 59  ;;  %v2338_v54 = vld [vmem:[%s3475_s11] sm:$0xff] (%p2900_p5) }
 0x18a   : > { %v2230_v52 = vmax.f32 %v2206_v49, 0.0  ;;  %v2640_v40 = vpack.c.bf16 %v2217_v30, %v2216_v27  ;;  %v2229_v53 = vmax.f32 %v2205_v36, 0.0  ;;  %2339 = vst [vmem:[%s2325_s18] sm:$0xff] (%p2900_p5), %v2338_v54 }
 0x18b   : > { %v2641_v42 = vpack.c.bf16 %v2219_v31, %v2218_v16  ;;  %v2231_v45 = vmax.f32 %v2207_v35, 0.0  ;;  %v2342_v21 = vld [vmem:[%s3475_s11 + $0x10] sm:$0xff] (%p2900_p5) }
 0x18c   : > { %2308 = vst [vmem:[%s3475_s11 + $0x20] sm:$0xff] %v2640_v40  ;;  %v2646_v46 = vpack.c.bf16 %v2229_v53, %v2228_v37  ;;  %v2344_v51 = vld [vmem:[%s3475_s11 + $0x18] sm:$0xff] (%p2900_p5)  ;;  %2343 = vst [vmem:[%s2325_s18 + $0x10] sm:$0xff] (%p2900_p5), %v2342_v21 }
 0x18d   : > { %2309 = vst [vmem:[%s3475_s11 + $0x28] sm:$0xff] %v2641_v42  ;;  %v2647_v50 = vpack.c.bf16 %v2231_v45, %v2230_v52  ;;  %v2354_v59 = vld [vmem:[%s3475_s11 + $0x40] sm:$0xff] (%p2900_p5)  ;;  %2345 = vst [vmem:[%s2325_s18 + $0x18] sm:$0xff] (%p2900_p5), %v2344_v51 }
 0x18e   : > { %2314 = vst [vmem:[%s3475_s11 + $0x50] sm:$0xff] %v2646_v46  ;;  %2355 = vst [vmem:[%s2325_s18 + $0xd0] sm:$0xff] (%p2900_p5), %v2354_v59  ;;  %v2356_v24 = vld [vmem:[%s3475_s11 + $0x48] sm:$0xff] (%p2900_p5) }
 0x18f   : > { %2315 = vst [vmem:[%s3475_s11 + $0x58] sm:$0xff] %v2647_v50  ;;  %2357 = vst [vmem:[%s2325_s18 + $0xd8] sm:$0xff] (%p2900_p5), %v2356_v24 }
 0x193   : > { %v2346_v55 = vld [vmem:[%s3475_s11 + $0x20] sm:$0xff] }
 0x194   : > { %v2348_v56 = vld [vmem:[%s3475_s11 + $0x28] sm:$0xff]  ;;  %2347 = vst [vmem:[%s2325_s18 + $0x20] sm:$0xff] %v2346_v55 }
 0x195   : > { %2349 = vst [vmem:[%s2325_s18 + $0x28] sm:$0xff] %v2348_v56  ;;  %v2358_v25 = vld [vmem:[%s3475_s11 + $0x50] sm:$0xff] }
 0x196   : > { %v2360_v60 = vld [vmem:[%s3475_s11 + $0x58] sm:$0xff]  ;;  %2359 = vst [vmem:[%s2325_s18 + $0xe0] sm:$0xff] %v2358_v25 }
 0x197   : > { %2361 = vst [vmem:[%s2325_s18 + $0xe8] sm:$0xff] %v2360_v60 }
 0x198 PF: > { %p10_p10 = scmp.ge.s32.totalorder %s2887_s16, 6   ;;  %s3553_s12 = smov %s2842_s13 }
 0x199   : > { %s3554_s13 = smov %s2898_s19  ;;  %s3555_s14 = smov %s2887_s16 }
 0x19a   :  { %12 = sbr.rel (!%p10_p10) target bundleno = 2 (0x2), region = 116 }

// kernel: simplify_net_forward.3
= control target key start
LH: loop header
LB: loop body
LE: loop exit
PB: predicated region body
PF: predicated region fallthrough
CT: control target
= control target key end

     0   :  { %v5873_v0 = vmov 0   ;;  %vm224_vm0 = vcmask 130048   ;;  %vm1330_vm1 = vcmask 1040384   ;;  %vm5875_vm2 = vmmov 0   ;;  %s7196_s0 = inlined_call_operand.vmem [shape: bf16[4,144,338], index: 0, kind: input, shape index: {}]   ;;  %s7197_s1 = inlined_call_operand.vmem [shape: bf16[16,144], index: 1, kind: input, shape index: {}]   ;;  %s7198_s2 = inlined_call_operand.vmem [shape: f32[16,1], index: 2, kind: input, shape index: {}]   ;;  %s7199_s8 = inlined_call_operand.vmem [shape: f32[2,1], index: 8, kind: input, shape index: {}]   ;;  %s7200_s3 = inlined_call_operand.vmem [shape: bf16[9,338,72], index: 3, kind: input, shape index: {}]   ;;  %s7201_s4 = inlined_call_operand.vmem [shape: bf16[9,16,16], index: 4, kind: input, shape index: {}]   ;;  %s7202_s5 = inlined_call_operand.vmem [shape: f32[16,1], index: 5, kind: input, shape index: {}]   ;;  %s7203_s6 = inlined_call_operand.vmem [shape: f32[72,2], index: 6, kind: input, shape index: {}]   ;;  %s7204_s7 = inlined_call_operand.vmem [shape: f32[2,16], index: 7, kind: input, shape index: {}]   ;;  %s7205_s9 = inlined_call_operand.vmem [shape: f32[2,2], index: 9, kind: output, shape index: {}]  }
   0x1   :  { %271 = vmatprep.subr.bf16.mxu1 %v5873_v0  ;;  %v5519_v1 = vld [vmem:[%s7196_s0 + $0x4] ss:$12 sps:$4 sm:$0xff]   ;;  %5517 = vset.pattern.permute.xlu0 %v5873_v0  ;;  %v5521_v2 = vld [vmem:[%s7196_s0 + $0x8] ss:$12 sps:$4 sm:$0xff]   ;;  %v5522_v3 = vld [vmem:[%s7196_s0] ss:$12 sps:$4 sm:$0xff]  }
   0x2   :  { %5518 = vset.pattern.permute.xlu1 %v5873_v0  ;;  %228 = vmatprep.subr.bf16.mxu0 %v5519_v1  ;;  %v5523_v4 = vld [vmem:[%s7196_s0 + $0x1c] ss:$12 sps:$4 sm:$0xff]   ;;  %v5525_v5 = vld [vmem:[%s7196_s0 + $0x20] ss:$12 sps:$4 sm:$0xff]   ;;  %v5526_v6 = vld [vmem:[%s7196_s0 + $0x18] ss:$12 sps:$4 sm:$0xff]  }
   0x3   :  { %272 = vmatpush1.bf16.msra.mxu1 %v5521_v2  ;;  %229 = vmatpush1.bf16.msra.mxu0 %v5522_v3  ;;  %v5527_v7 = vld [vmem:[%s7196_s0 + $0x34] ss:$12 sps:$4 sm:$0xff]   ;;  %v5529_v8 = vld [vmem:[%s7196_s0 + $0x38] ss:$12 sps:$4 sm:$0xff]   ;;  %v5530_v9 = vld [vmem:[%s7196_s0 + $0x30] ss:$12 sps:$4 sm:$0xff]  }
   0x4   :  { %273 = vmatprep.subr.bf16.mxu1 %v5873_v0  ;;  %230 = vmatprep.subr.bf16.mxu0 %v5523_v4  ;;  %v5531_v10 = vld [vmem:[%s7196_s0 + $0x4c] ss:$12 sps:$4 sm:$0xff]   ;;  %v5533_v11 = vld [vmem:[%s7196_s0 + $0x50] ss:$12 sps:$4 sm:$0xff]   ;;  %v5534_v12 = vld [vmem:[%s7196_s0 + $0x48] ss:$12 sps:$4 sm:$0xff]  }
   0x5   :  { %v5535_v13 = vld [vmem:[%s7196_s0 + $0x64] ss:$12 sps:$4 sm:$0xff]   ;;  %v5537_v14 = vld [vmem:[%s7196_s0 + $0x68] ss:$12 sps:$4 sm:$0xff]   ;;  %v5538_v15 = vld [vmem:[%s7196_s0 + $0x60] ss:$12 sps:$4 sm:$0xff]  }
   0x6   :  { %v5539_v16 = vld [vmem:[%s7196_s0 + $0x7c] ss:$12 sps:$4 sm:$0xff]   ;;  %v5541_v17 = vld [vmem:[%s7196_s0 + $0x80] ss:$12 sps:$4 sm:$0xff]   ;;  %v5542_v18 = vld [vmem:[%s7196_s0 + $0x78] ss:$12 sps:$4 sm:$0xff]  }
   0x7   :  { %274 = vmatpush1.bf16.msra.mxu1 %v5525_v5  ;;  %231 = vmatpush1.bf16.msra.mxu0 %v5526_v6  ;;  %v5543_v19 = vld [vmem:[%s7196_s0 + $0x94] ss:$12 sps:$4 sm:$0xff]   ;;  %v5995_v20 = vld [vmem:[%s7197_s1 + $0x4] ss:$8 sps:$4 sm:$0xff]   ;;  %v5546_v22 = vld [vmem:[%s7196_s0 + $0x90] ss:$12 sps:$4 sm:$0xff]  }
   0x8   :  { %275 = vmatprep.subr.bf16.mxu1 %v5873_v0  ;;  %232 = vmatprep.subr.bf16.mxu0 %v5527_v7  ;;  %v5545_v21 = vld [vmem:[%s7196_s0 + $0x98] ss:$12 sps:$4 sm:$0xff]   ;;  %v5549_v24 = vld [vmem:[%s7196_s0 + $0xb0] ss:$12 sps:$4 sm:$0xff]   ;;  %v5550_v25 = vld [vmem:[%s7196_s0 + $0xa8] ss:$12 sps:$4 sm:$0xff]  }
   0x9   :  { %4191 = vmatprep.mubr.msk.bf16.mxu1 %vm224_vm0, %v5995_v20  ;;  %v5547_v23 = vld [vmem:[%s7196_s0 + $0xac] ss:$12 sps:$4 sm:$0xff]   ;;  %4190 = vmatprep.mubr.msk.bf16.mxu0 %vm224_vm0, %v5995_v20  ;;  %v5551_v26 = vld [vmem:[%s7196_s0 + $0xc4] ss:$12 sps:$4 sm:$0xff]   ;;  %v5553_v27 = vld [vmem:[%s7196_s0 + $0xc8] ss:$12 sps:$4 sm:$0xff]  }
   0xa   :  { %v5554_v28 = vld [vmem:[%s7196_s0 + $0xc0] ss:$12 sps:$4 sm:$0xff]   ;;  %v5560_v29 = vld [vmem:[%s7196_s0 + $0xdc] ss:$12 sps:$4 sm:$0xff]   ;;  %v5558_v32 = vld [vmem:[%s7196_s0 + $0xd8] ss:$12 sps:$4 sm:$0xff]  }
   0xb   :  { %276 = vmatpush1.bf16.msra.mxu1 %v5529_v8  ;;  %233 = vmatpush1.bf16.msra.mxu0 %v5530_v9  ;;  %v6034_v30 = vld [vmem:[%s7197_s1] ss:$8 sps:$4 sm:$0xff]   ;;  %v5565_v34 = vld [vmem:[%s7196_s0 + $0xf8] ss:$12 sps:$4 sm:$0xff]   ;;  %v5562_v35 = vld [vmem:[%s7196_s0 + $0xf0] ss:$12 sps:$4 sm:$0xff]  }
   0xc   :  { %277 = vmatprep.subr.bf16.mxu1 %v5873_v0  ;;  %234 = vmatprep.subr.bf16.mxu0 %v5531_v10  ;;  %v5561_v31 = vld [vmem:[%s7196_s0 + $0xe0] ss:$12 sps:$4 sm:$0xff]   ;;  %v5569_v37 = vld [vmem:[%s7196_s0 + $0x110] ss:$12 sps:$4 sm:$0xff]   ;;  %v5566_v38 = vld [vmem:[%s7196_s0 + $0x108] ss:$12 sps:$4 sm:$0xff]  }
   0xd   :  { %v5564_v33 = vld [vmem:[%s7196_s0 + $0xf4] ss:$12 sps:$4 sm:$0xff]   ;;  %v5568_v36 = vld [vmem:[%s7196_s0 + $0x10c] ss:$12 sps:$4 sm:$0xff]   ;;  %v5572_v39 = vld [vmem:[%s7196_s0 + $0x124] ss:$12 sps:$4 sm:$0xff]  }
   0xe   :  { %v5573_v40 = vld [vmem:[%s7196_s0 + $0x128] ss:$12 sps:$4 sm:$0xff]   ;;  %v5570_v41 = vld [vmem:[%s7196_s0 + $0x120] ss:$12 sps:$4 sm:$0xff]   ;;  %v5574_v44 = vld [vmem:[%s7196_s0 + $0x138] ss:$12 sps:$4 sm:$0xff]  }
   0xf   :  { %278 = vmatpush1.bf16.msra.mxu1 %v5533_v11  ;;  %235 = vmatpush1.bf16.msra.mxu0 %v5534_v12  ;;  %v5576_v42 = vld [vmem:[%s7196_s0 + $0x13c] ss:$12 sps:$4 sm:$0xff]   ;;  %v5577_v43 = vld [vmem:[%s7196_s0 + $0x140] ss:$12 sps:$4 sm:$0xff]   ;;  %v5581_v46 = vld [vmem:[%s7196_s0 + $0x158] ss:$12 sps:$4 sm:$0xff]  }
  0x10   :  { %279 = vmatprep.subr.bf16.mxu1 %v5873_v0  ;;  %236 = vmatprep.subr.bf16.mxu0 %v5535_v13  ;;  %v5580_v45 = vld [vmem:[%s7196_s0 + $0x154] ss:$12 sps:$4 sm:$0xff]   ;;  %v5578_v47 = vld [vmem:[%s7196_s0 + $0x150] ss:$12 sps:$4 sm:$0xff]   ;;  %v5584_v48 = vld [vmem:[%s7196_s0 + $0x16c] ss:$12 sps:$4 sm:$0xff]  }
  0x11   :  { %v5585_v49 = vld [vmem:[%s7196_s0 + $0x170] ss:$12 sps:$4 sm:$0xff]   ;;  %v5582_v50 = vld [vmem:[%s7196_s0 + $0x168] ss:$12 sps:$4 sm:$0xff]   ;;  %v5586_v53 = vld [vmem:[%s7196_s0 + $0x180] ss:$12 sps:$4 sm:$0xff]  }
  0x12   :  { %v5588_v51 = vld [vmem:[%s7196_s0 + $0x184] ss:$12 sps:$4 sm:$0xff]   ;;  %v5589_v52 = vld [vmem:[%s7196_s0 + $0x188] ss:$12 sps:$4 sm:$0xff]   ;;  %v5593_v55 = vld [vmem:[%s7196_s0 + $0x1a0] ss:$12 sps:$4 sm:$0xff]  }
  0x13   :  { %280 = vmatpush1.bf16.msra.mxu1 %v5537_v14  ;;  %237 = vmatpush1.bf16.msra.mxu0 %v5538_v15  ;;  %v5592_v54 = vld [vmem:[%s7196_s0 + $0x19c] ss:$12 sps:$4 sm:$0xff]   ;;  %v5590_v56 = vld [vmem:[%s7196_s0 + $0x198] ss:$12 sps:$4 sm:$0xff]   ;;  %v5596_v57 = vld [vmem:[%s7196_s0 + $0x1b4] ss:$12 sps:$4 sm:$0xff]  }
  0x14   :  { %281 = vmatprep.subr.bf16.mxu1 %v5873_v0  ;;  %238 = vmatprep.subr.bf16.mxu0 %v5539_v16  ;;  %v5597_v58 = vld [vmem:[%s7196_s0 + $0x1b8] ss:$12 sps:$4 sm:$0xff]   ;;  %v5594_v59 = vld [vmem:[%s7196_s0 + $0x1b0] ss:$12 sps:$4 sm:$0xff]   ;;  %v5598_v62 = vld [vmem:[%s7196_s0 + $0x1c8] ss:$12 sps:$4 sm:$0xff]  }
  0x15   :  { %v5600_v60 = vld [vmem:[%s7196_s0 + $0x1cc] ss:$12 sps:$4 sm:$0xff]   ;;  %v5601_v61 = vld [vmem:[%s7196_s0 + $0x1d0] ss:$12 sps:$4 sm:$0xff]   ;;  %v5605_v1 = vld [vmem:[%s7196_s0 + $0x1e8] ss:$12 sps:$4 sm:$0xff]  }
  0x16   :  { %v5604_v63 = vld [vmem:[%s7196_s0 + $0x1e4] ss:$12 sps:$4 sm:$0xff]   ;;  %v5602_v2 = vld [vmem:[%s7196_s0 + $0x1e0] ss:$12 sps:$4 sm:$0xff]   ;;  %v5608_v3 = vld [vmem:[%s7196_s0 + $0x1fc] ss:$12 sps:$4 sm:$0xff]  }
  0x17   :  { %282 = vmatpush1.bf16.msra.mxu1 %v5541_v17  ;;  %239 = vmatpush1.bf16.msra.mxu0 %v5542_v18  ;;  %v5609_v4 = vld [vmem:[%s7196_s0 + $0x200] ss:$12 sps:$4 sm:$0xff]   ;;  %v5606_v5 = vld [vmem:[%s7196_s0 + $0x1f8] ss:$12 sps:$4 sm:$0xff]   ;;  %v5610_v10 = vld [vmem:[%s7196_s0 + $0x210] ss:$12 sps:$4 sm:$0xff]  }
  0x18   :  { %283 = vmatprep.subr.bf16.mxu1 %v5873_v0  ;;  %240 = vmatprep.subr.bf16.mxu0 %v5543_v19  ;;  %v5612_v6 = vld [vmem:[%s7196_s0 + $0x214] ss:$12 sps:$4 sm:$0xff]   ;;  %v5613_v8 = vld [vmem:[%s7196_s0 + $0x218] ss:$12 sps:$4 sm:$0xff]   ;;  %v1126_v9 = vld [vmem:[%s7198_s2 + $0x8] sm:$0xff]  ;;  %vm1326_vm3 = vcmask 670720  }
  0x19   :  { %v1125_v7 = vld [vmem:[%s7198_s2] sm:$0xff]  ;;  %v5616_v11 = vld [vmem:[%s7196_s0 + $0x22c] ss:$12 sps:$4 sm:$0xff]   ;;  %v5617_v12 = vld [vmem:[%s7196_s0 + $0x230] ss:$12 sps:$4 sm:$0xff]   ;;  %vm3993_vm4 = vcmask 588800  }
  0x1a   :  { %1129 = vperm.xlu0 %5517, %v1125_v7   ;;  %v4076_v13 = vld [vmem:[%s7199_s8] sm:$0x3]  ;;  %v5614_v14 = vld [vmem:[%s7196_s0 + $0x228] ss:$12 sps:$4 sm:$0xff]   ;;  %v5620_v15 = vld [vmem:[%s7196_s0 + $0x244] ss:$12 sps:$4 sm:$0xff]  }
  0x1b   :  { %284 = vmatpush1.bf16.msra.mxu1 %v5545_v21  ;;  %241 = vmatpush1.bf16.msra.mxu0 %v5546_v22  ;;  %v5621_v16 = vld [vmem:[%s7196_s0 + $0x248] ss:$12 sps:$4 sm:$0xff]   ;;  %v5618_v17 = vld [vmem:[%s7196_s0 + $0x240] ss:$12 sps:$4 sm:$0xff]   ;;  %v5622_v21 = vld [vmem:[%s7196_s0 + $0x258] ss:$12 sps:$4 sm:$0xff]  }
  0x1c   :  { %285 = vmatprep.subr.bf16.mxu1 %v5873_v0  ;;  %242 = vmatprep.subr.bf16.mxu0 %v5547_v23  ;;  %v5624_v18 = vld [vmem:[%s7196_s0 + $0x25c] ss:$12 sps:$4 sm:$0xff]   ;;  %v5625_v19 = vld [vmem:[%s7196_s0 + $0x260] ss:$12 sps:$4 sm:$0xff]   ;;  %v5629_v23 = vld [vmem:[%s7196_s0 + $0x278] ss:$12 sps:$4 sm:$0xff]  }
  0x1d   :  { %v5628_v22 = vld [vmem:[%s7196_s0 + $0x274] ss:$12 sps:$4 sm:$0xff]   ;;  %v5685_v7 = vld [vmem:[%s7200_s3 + $0xa8] ss:$0 sps:$4 sm:$0x11]   ;;  %vm4155_vm5 = vcmask 9216  }
  0x1e   :  { %1134 = vperm.xlu0 %5517, %v1126_v9   ;;  %v5686_v9 = vld [vmem:[%s7200_s3 + $0x78] sm:$0xff]  }
  0x1f   :  { %286 = vmatpush1.bf16.msra.mxu1 %v5549_v24  ;;  %243 = vmatpush1.bf16.msra.mxu0 %v5550_v25  ;;  %v5626_v24 = vld [vmem:[%s7196_s0 + $0x270] ss:$12 sps:$4 sm:$0xff]   ;;  %v5632_v25 = vld [vmem:[%s7196_s0 + $0x28c] ss:$12 sps:$4 sm:$0xff]  }
  0x20   :  { %287 = vmatprep.subr.bf16.mxu1 %v5873_v0  ;;  %244 = vmatprep.subr.bf16.mxu0 %v5551_v26  ;;  %v5633_v26 = vld [vmem:[%s7196_s0 + $0x290] ss:$12 sps:$4 sm:$0xff]  }
  0x22   :  { %4079 = vperm.xlu0 %5517, %v4076_v13  }
  0x23   :  { %288 = vmatpush1.bf16.msra.mxu1 %v5553_v27  ;;  %245 = vmatpush1.bf16.msra.mxu0 %v5554_v28  ;;  %v5630_v27 = vld [vmem:[%s7196_s0 + $0x288] ss:$12 sps:$4 sm:$0xff]   ;;  %v5636_v28 = vld [vmem:[%s7196_s0 + $0x2a4] ss:$12 sps:$4 sm:$0xff]  }
  0x24   :  { %536 = vmatprep.subr.bf16.mxu1 %v5873_v0  ;;  %493 = vmatprep.subr.bf16.mxu0 %v5560_v29  ;;  %v5637_v29 = vld [vmem:[%s7196_s0 + $0x2a8] ss:$12 sps:$4 sm:$0xff]  }
  0x26   :  { %304 = vmatmul.mubr.bf16.vlgmr.msra.gmra.mrb[0].mxu1 %v6034_v30  ;;  %261 = vmatmul.mubr.bf16.vlgmr.msra.gmra.mrb[0].mxu0 %v6034_v30 }
  0x27   :  { %537 = vmatpush1.bf16.msra.mxu1 %v5561_v31  ;;  %494 = vmatpush1.bf16.msra.mxu0 %v5558_v32  ;;  %v5634_v31 = vld [vmem:[%s7196_s0 + $0x2a0] ss:$12 sps:$4 sm:$0xff]   ;;  %v5640_v32 = vld [vmem:[%s7196_s0 + $0x2bc] ss:$12 sps:$4 sm:$0xff]  }
  0x28   :  { %538 = vmatprep.subr.bf16.mxu1 %v5873_v0  ;;  %495 = vmatprep.subr.bf16.mxu0 %v5564_v33  ;;  %v5641_v33 = vld [vmem:[%s7196_s0 + $0x2c0] ss:$12 sps:$4 sm:$0xff]  }
  0x29   :  { %4256 = vmatprep.mubr.msk.bf16.mxu1 %vm224_vm0, %v5995_v20  ;;  %4255 = vmatprep.mubr.msk.bf16.mxu0 %vm224_vm0, %v5995_v20 }
  0x2b   :  { %539 = vmatpush1.bf16.msra.mxu1 %v5565_v34  ;;  %496 = vmatpush1.bf16.msra.mxu0 %v5562_v35  ;;  %v5638_v34 = vld [vmem:[%s7196_s0 + $0x2b8] ss:$12 sps:$4 sm:$0xff]   ;;  %v5644_v35 = vld [vmem:[%s7196_s0 + $0x2d4] ss:$12 sps:$4 sm:$0xff]  }
  0x2c   :  { %540 = vmatprep.subr.bf16.mxu1 %v5873_v0  ;;  %497 = vmatprep.subr.bf16.mxu0 %v5568_v36  ;;  %v5642_v36 = vld [vmem:[%s7196_s0 + $0x2d0] ss:$12 sps:$4 sm:$0xff]  }
  0x2f   :  { %541 = vmatpush1.bf16.msra.mxu1 %v5569_v37  ;;  %498 = vmatpush1.bf16.msra.mxu0 %v5566_v38  ;;  %v5648_v37 = vld [vmem:[%s7196_s0 + $0x2ec] ss:$12 sps:$4 sm:$0xff]   ;;  %v5649_v38 = vld [vmem:[%s7196_s0 + $0x2f0] ss:$12 sps:$4 sm:$0xff]  }
  0x30   :  { %542 = vmatprep.subr.bf16.mxu1 %v5873_v0  ;;  %499 = vmatprep.subr.bf16.mxu0 %v5572_v39  ;;  %v5646_v39 = vld [vmem:[%s7196_s0 + $0x2e8] ss:$12 sps:$4 sm:$0xff]  }
  0x33   :  { %543 = vmatpush1.bf16.msra.mxu1 %v5573_v40  ;;  %500 = vmatpush1.bf16.msra.mxu0 %v5570_v41  ;;  %v5652_v40 = vld [vmem:[%s7196_s0 + $0x304] ss:$12 sps:$4 sm:$0xff]   ;;  %v5653_v41 = vld [vmem:[%s7196_s0 + $0x308] ss:$12 sps:$4 sm:$0xff]  }
  0x34   :  { %544 = vmatprep.subr.bf16.mxu1 %v5873_v0  ;;  %501 = vmatprep.subr.bf16.mxu0 %v5576_v42  ;;  %v5650_v42 = vld [vmem:[%s7196_s0 + $0x300] ss:$12 sps:$4 sm:$0xff]  }
  0x37   :  { %545 = vmatpush1.bf16.msra.mxu1 %v5577_v43  ;;  %502 = vmatpush1.bf16.msra.mxu0 %v5574_v44  ;;  %v5656_v43 = vld [vmem:[%s7196_s0 + $0x31c] ss:$12 sps:$4 sm:$0xff]   ;;  %v5657_v44 = vld [vmem:[%s7196_s0 + $0x320] ss:$12 sps:$4 sm:$0xff]  }
  0x38   :  { %546 = vmatprep.subr.bf16.mxu1 %v5873_v0  ;;  %503 = vmatprep.subr.bf16.mxu0 %v5580_v45  ;;  %v5654_v45 = vld [vmem:[%s7196_s0 + $0x318] ss:$12 sps:$4 sm:$0xff]  }
  0x3b   :  { %547 = vmatpush1.bf16.msra.mxu1 %v5581_v46  ;;  %504 = vmatpush1.bf16.msra.mxu0 %v5578_v47  ;;  %v5660_v46 = vld [vmem:[%s7196_s0 + $0x334] ss:$12 sps:$4 sm:$0xff]   ;;  %v5661_v47 = vld [vmem:[%s7196_s0 + $0x338] ss:$12 sps:$4 sm:$0xff]  }
  0x3c   :  { %548 = vmatprep.subr.bf16.mxu1 %v5873_v0  ;;  %505 = vmatprep.subr.bf16.mxu0 %v5584_v48  ;;  %v5658_v48 = vld [vmem:[%s7196_s0 + $0x330] ss:$12 sps:$4 sm:$0xff]  }
  0x3f   :  { %549 = vmatpush1.bf16.msra.mxu1 %v5585_v49  ;;  %506 = vmatpush1.bf16.msra.mxu0 %v5582_v50  ;;  %v5664_v49 = vld [vmem:[%s7196_s0 + $0x34c] ss:$12 sps:$4 sm:$0xff]   ;;  %v5665_v50 = vld [vmem:[%s7196_s0 + $0x350] ss:$12 sps:$4 sm:$0xff]  }
  0x40   :  { %550 = vmatprep.subr.bf16.mxu1 %v5873_v0  ;;  %507 = vmatprep.subr.bf16.mxu0 %v5588_v51  ;;  %v5662_v51 = vld [vmem:[%s7196_s0 + $0x348] ss:$12 sps:$4 sm:$0xff]  }
  0x43   :  { %551 = vmatpush1.bf16.msra.mxu1 %v5589_v52  ;;  %508 = vmatpush1.bf16.msra.mxu0 %v5586_v53  ;;  %v5666_v52 = vld [vmem:[%s7200_s3 + $0x40] sm:$0xff]   ;;  %v5874_v53 = vmov 0.0  }
  0x44   :  { %552 = vmatprep.subr.bf16.mxu1 %v5873_v0  ;;  %509 = vmatprep.subr.bf16.mxu0 %v5592_v54  ;;  %v5668_v54 = vld [vmem:[%s7200_s3 + $0x48] sm:$0xff]  }
  0x47   :  { %553 = vmatpush1.bf16.msra.mxu1 %v5593_v55  ;;  %510 = vmatpush1.bf16.msra.mxu0 %v5590_v56  ;;  %v5670_v55 = vld [vmem:[%s7200_s3 + $0x80] sm:$0xff]   ;;  %v5671_v56 = vld [vmem:[%s7200_s3 + $0x50] sm:$0xff]  }
  0x48   :  { %807 = vmatprep.subr.bf16.mxu1 %v5873_v0  ;;  %764 = vmatprep.subr.bf16.mxu0 %v5596_v57  ;;  %v5672_v57 = vld [vmem:[%s7200_s3 + $0x10] sm:$0xff]  }
  0x4a   :  { %569 = vmatmul.mubr.bf16.vlgmr.msra.gmra.mrb[4].mxu1 %v6034_v30  ;;  %526 = vmatmul.mubr.bf16.vlgmr.msra.gmra.mrb[4].mxu0 %v6034_v30 }
  0x4b   :  { %808 = vmatpush1.bf16.msra.mxu1 %v5597_v58  ;;  %765 = vmatpush1.bf16.msra.mxu0 %v5594_v59  ;;  %v5673_v58 = vld [vmem:[%s7200_s3 + $0x88] sm:$0xff]   ;;  %v5674_v59 = vld [vmem:[%s7200_s3 + $0x58] sm:$0xff]  }
  0x4c   :  { %809 = vmatprep.subr.bf16.mxu1 %v5873_v0  ;;  %766 = vmatprep.subr.bf16.mxu0 %v5600_v60  ;;  %v5676_v60 = vld [vmem:[%s7200_s3 + $0x90] sm:$0xff]  }
  0x4d   :  { %4321 = vmatprep.mubr.msk.bf16.mxu1 %vm224_vm0, %v5995_v20  ;;  %4320 = vmatprep.mubr.msk.bf16.mxu0 %vm224_vm0, %v5995_v20 }
  0x4f   :  { %810 = vmatpush1.bf16.msra.mxu1 %v5601_v61  ;;  %767 = vmatpush1.bf16.msra.mxu0 %v5598_v62  ;;  %v5675_v61 = vld [vmem:[%s7200_s3 + $0x18] sm:$0xff]   ;;  %v5677_v62 = vld [vmem:[%s7200_s3 + $0x60] sm:$0xff]  }
  0x50   :  { %811 = vmatprep.subr.bf16.mxu1 %v5873_v0  ;;  %768 = vmatprep.subr.bf16.mxu0 %v5604_v63  ;;  %v5678_v63 = vld [vmem:[%s7200_s3 + $0x20] sm:$0xff]  }
  0x53   :  { %812 = vmatpush1.bf16.msra.mxu1 %v5605_v1  ;;  %769 = vmatpush1.bf16.msra.mxu0 %v5602_v2  ;;  %v5679_v1 = vld [vmem:[%s7200_s3 + $0x98] sm:$0xff]   ;;  %v5680_v2 = vld [vmem:[%s7200_s3 + $0x68] sm:$0xff]  }
  0x54   :  { %813 = vmatprep.subr.bf16.mxu1 %v5873_v0  ;;  %770 = vmatprep.subr.bf16.mxu0 %v5608_v3  ;;  %v5681_v3 = vld [vmem:[%s7200_s3 + $0x28] sm:$0xff]  }
  0x57   :  { %814 = vmatpush1.bf16.msra.mxu1 %v5609_v4  ;;  %771 = vmatpush1.bf16.msra.mxu0 %v5606_v5  ;;  %v5682_v4 = vld [vmem:[%s7200_s3 + $0xa0] sm:$0xff]   ;;  %v5683_v5 = vld [vmem:[%s7200_s3 + $0x70] sm:$0xff]  }
  0x58   :  { %815 = vmatprep.subr.bf16.mxu1 %v5873_v0  ;;  %772 = vmatprep.subr.bf16.mxu0 %v5612_v6  ;;  %v5684_v6 = vld [vmem:[%s7200_s3 + $0x30] sm:$0xff]  }
  0x5b   :  { %816 = vmatpush1.bf16.msra.mxu1 %v5613_v8  ;;  %773 = vmatpush1.bf16.msra.mxu0 %v5610_v10  ;;  %v1332_v8 = vsel %vm1330_vm1, %v5685_v7, 0  ;;  %v5687_v10 = vld [vmem:[%s7200_s3 + $0x38] sm:$0xff]  }
  0x5c   :  { %817 = vmatprep.subr.bf16.mxu1 %v5873_v0  ;;  %774 = vmatprep.subr.bf16.mxu0 %v5616_v11  ;;  %v5688_v11 = vld [vmem:[%s7200_s3 + $0xec] sm:$0xff]  }
  0x5f   :  { %818 = vmatpush1.bf16.msra.mxu1 %v5617_v12  ;;  %775 = vmatpush1.bf16.msra.mxu0 %v5614_v14 }
  0x60   :  { %819 = vmatprep.subr.bf16.mxu1 %v5873_v0  ;;  %776 = vmatprep.subr.bf16.mxu0 %v5620_v15 }
  0x63   :  { %820 = vmatpush1.bf16.msra.mxu1 %v5621_v16  ;;  %777 = vmatpush1.bf16.msra.mxu0 %v5618_v17 }
  0x64   :  { %821 = vmatprep.subr.bf16.mxu1 %v5873_v0  ;;  %778 = vmatprep.subr.bf16.mxu0 %v5624_v18 }
  0x67   :  { %822 = vmatpush1.bf16.msra.mxu1 %v5625_v19  ;;  %779 = vmatpush1.bf16.msra.mxu0 %v5622_v21 }
  0x68   :  { %823 = vmatprep.subr.bf16.mxu1 %v5873_v0  ;;  %780 = vmatprep.subr.bf16.mxu0 %v5628_v22 }
  0x6b   :  { %824 = vmatpush1.bf16.msra.mxu1 %v5629_v23  ;;  %781 = vmatpush1.bf16.msra.mxu0 %v5626_v24 }
  0x6c   :  { %1078 = vmatprep.subr.bf16.mxu1 %v5873_v0  ;;  %1035 = vmatprep.subr.bf16.mxu0 %v5632_v25 }
  0x6e   :  { %840 = vmatmul.mubr.bf16.vlgmr.msra.gmra.mrb[8].mxu1 %v6034_v30  ;;  %797 = vmatmul.mubr.bf16.vlgmr.msra.gmra.mrb[8].mxu0 %v6034_v30 }
  0x6f   :  { %1079 = vmatpush1.bf16.msra.mxu1 %v5633_v26  ;;  %1036 = vmatpush1.bf16.msra.mxu0 %v5630_v27 }
  0x70   :  { %1080 = vmatprep.subr.bf16.mxu1 %v5873_v0  ;;  %1037 = vmatprep.subr.bf16.mxu0 %v5636_v28 }
  0x71   :  { %4386 = vmatprep.mubr.msk.bf16.mxu1 %vm224_vm0, %v5995_v20  ;;  %4385 = vmatprep.mubr.msk.bf16.mxu0 %vm224_vm0, %v5995_v20  ;;  %v5645_v20 = vld [vmem:[%s7196_s0 + $0x2d8] ss:$12 sps:$4 sm:$0xff]  }
  0x73   :  { %1081 = vmatpush1.bf16.msra.mxu1 %v5637_v29  ;;  %1038 = vmatpush1.bf16.msra.mxu0 %v5634_v31 }
  0x74   :  { %1082 = vmatprep.subr.bf16.mxu1 %v5873_v0  ;;  %1039 = vmatprep.subr.bf16.mxu0 %v5640_v32 }
  0x77   :  { %1083 = vmatpush1.bf16.msra.mxu1 %v5641_v33  ;;  %1040 = vmatpush1.bf16.msra.mxu0 %v5638_v34 }
  0x78   :  { %1084 = vmatprep.subr.bf16.mxu1 %v5873_v0  ;;  %1041 = vmatprep.subr.bf16.mxu0 %v5644_v35 }
  0x7b   :  { %1085 = vmatpush1.bf16.msra.mxu1 %v5645_v20  ;;  %1042 = vmatpush1.bf16.msra.mxu0 %v5642_v36 }
  0x7c   :  { %1086 = vmatprep.subr.bf16.mxu1 %v5873_v0  ;;  %1043 = vmatprep.subr.bf16.mxu0 %v5648_v37 }
  0x7f   :  { %1087 = vmatpush1.bf16.msra.mxu1 %v5649_v38  ;;  %1044 = vmatpush1.bf16.msra.mxu0 %v5646_v39 }
  0x80   :  { %1088 = vmatprep.subr.bf16.mxu1 %v5873_v0  ;;  %1045 = vmatprep.subr.bf16.mxu0 %v5652_v40 }
  0x83   :  { %1089 = vmatpush1.bf16.msra.mxu1 %v5653_v41  ;;  %1046 = vmatpush1.bf16.msra.mxu0 %v5650_v42 }
  0x84   :  { %1090 = vmatprep.subr.bf16.mxu1 %v5873_v0  ;;  %1047 = vmatprep.subr.bf16.mxu0 %v5656_v43 }
  0x87   :  { %1091 = vmatpush1.bf16.msra.mxu1 %v5657_v44  ;;  %1048 = vmatpush1.bf16.msra.mxu0 %v5654_v45 }
  0x88   :  { %1092 = vmatprep.subr.bf16.mxu1 %v5873_v0  ;;  %1049 = vmatprep.subr.bf16.mxu0 %v5660_v46 }
  0x8b   :  { %1093 = vmatpush1.bf16.msra.mxu1 %v5661_v47  ;;  %1050 = vmatpush1.bf16.msra.mxu0 %v5658_v48 }
  0x8c   :  { %1094 = vmatprep.subr.bf16.mxu1 %v5873_v0  ;;  %1051 = vmatprep.subr.bf16.mxu0 %v5664_v49  ;;  %v5667_v0 = vld [vmem:[%s7200_s3] sm:$0xff]  }
  0x8f   :  { %1095 = vmatpush1.bf16.msra.mxu1 %v5665_v50  ;;  %1052 = vmatpush1.bf16.msra.mxu0 %v5662_v51 }
  0x90   :  { %5268 = vmatprep.subr.bf16.mxu1 %v5874_v53  ;;  %4975 = vmatprep.subr.bf16.mxu0 %v5666_v52 }
  0x92   :  { %1111 = vmatmul.mubr.bf16.vlgmr.msra.gmra.mrb[12].mxu1 %v6034_v30  ;;  %1068 = vmatmul.mubr.bf16.vlgmr.msra.gmra.mrb[12].mxu0 %v6034_v30  ;;  %v5669_v30 = vld [vmem:[%s7200_s3 + $0x8] sm:$0xff]  }
  0x93   :  { %4976 = vmatpush3.bf16.msra.mxu0 %v5667_v0  ;;  %5269 = vmatpush3.bf16.msra.mxu1 %v5670_v55 }
  0x94   :  { %4977 = vmatprep.subr.bf16.mxu0 %v5668_v54  ;;  %5270 = vmatprep.subr.bf16.mxu1 %v5874_v53 }
  0x95   :  { %5280 = vmatprep.mubr.msk.bf16.mxu1 %vm5875_vm2, %v5874_v53 }
  0x97   :  { %4978 = vmatpush3.bf16.msra.mxu0 %v5669_v30  ;;  %5271 = vmatpush3.bf16.msra.mxu1 %v5673_v58 }
  0x98   :  { %4979 = vmatprep.subr.bf16.mxu0 %v5671_v56  ;;  %5272 = vmatprep.subr.bf16.mxu1 %v5874_v53 }
  0x99   :  { %v1130_v49 = vpop.permute.xlu0 %1129 }
  0x9b   :  { %4980 = vmatpush3.bf16.msra.mxu0 %v5672_v57  ;;  %5273 = vmatpush3.bf16.msra.mxu1 %v5676_v60 }
  0x9c   :  { %4981 = vmatprep.subr.bf16.mxu0 %v5674_v59  ;;  %5274 = vmatprep.subr.bf16.mxu1 %v5874_v53 }
  0x9f   :  { %4982 = vmatpush3.bf16.msra.mxu0 %v5675_v61  ;;  %5275 = vmatpush3.bf16.msra.mxu1 %v5679_v1  ;;  %v1135_v61 = vpop.permute.xlu0 %1134 }
  0xa0   :  { %4983 = vmatprep.subr.bf16.mxu0 %v5677_v62  ;;  %5276 = vmatprep.subr.bf16.mxu1 %v5874_v53 }
  0xa3   :  { %4984 = vmatpush3.bf16.msra.mxu0 %v5678_v63  ;;  %5277 = vmatpush3.bf16.msra.mxu1 %v5682_v4 }
  0xa4   :  { %4985 = vmatprep.subr.bf16.mxu0 %v5680_v2  ;;  %5278 = vmatprep.subr.bf16.mxu1 %v5874_v53 }
  0xa7   :  { %4986 = vmatpush3.bf16.msra.mxu0 %v5681_v3  ;;  %5279 = vmatpush3.bf16.msra.mxu1 %v1332_v8 }
  0xa8   :  { %4987 = vmatprep.subr.bf16.mxu0 %v5683_v5  ;;  %5004 = vmatprep.subr.bf16.mxu1 %v5688_v11  ;;  %v5689_v11 = vld [vmem:[%s7200_s3 + $0xac] sm:$0xff]  }
  0xab   :  { %4988 = vmatpush3.bf16.msra.mxu0 %v5684_v6 }
  0xac   :  { %4989 = vmatprep.subr.bf16.mxu0 %v5686_v9 }
  0xaf   :  { %4990 = vmatpush3.bf16.msra.mxu0 %v5687_v10 }
  0xb0   :  { %5284 = vmatprep.subr.bf16.mxu0 %v5874_v53 }
  0xf9   :  { %v305_v12 = vpop.f32.mrb[0].mxu1  ;;  %v262_v14 = vpop.f32.mrb[0].mxu0 }
  0xfa   :  { %v307_v13 = vpop.f32.mrb[1].mxu1  ;;  %v264_v16 = vpop.f32.mrb[1].mxu0 }
  0xfb   :  { %v308_v15 = vpop.f32.mrb[2].mxu1  ;;  %v266_v18 = vpop.f32.mrb[2].mxu0 }
  0xfc   :  { %v310_v17 = vpop.f32.mrb[3].mxu1  ;;  %v268_v19 = vpop.f32.mrb[3].mxu0 }
 0x11d   :  { %v570_v21 = vpop.f32.mrb[4].mxu1  ;;  %v527_v23 = vpop.f32.mrb[4].mxu0 }
 0x11e   :  { %v579_v22 = vmax.f32 %v305_v12, %v570_v21  ;;  %v572_v24 = vpop.f32.mrb[5].mxu1  ;;  %v577_v25 = vmax.f32 %v262_v14, %v527_v23  ;;  %v529_v26 = vpop.f32.mrb[5].mxu0  ;;  %v5693_v21 = vld [vmem:[%s7200_s3 + $0xfc] sm:$0xff]  }
 0x11f   :  { %v573_v27 = vpop.f32.mrb[6].mxu1  ;;  %v578_v28 = vmax.f32 %v264_v16, %v529_v26  ;;  %v531_v31 = vpop.f32.mrb[6].mxu0  ;;  %v5690_v16 = vld [vmem:[%s7200_s3 + $0xf4] sm:$0xff]   ;;  %v5695_v23 = vld [vmem:[%s7200_s3 + $0xbc] sm:$0xff]   ;;  %v5696_v24 = vld [vmem:[%s7200_s3 + $0x104] sm:$0xff]  }
 0x120   :  { %v582_v29 = vmax.f32 %v308_v15, %v573_v27  ;;  %v575_v32 = vpop.f32.mrb[7].mxu1  ;;  %v580_v33 = vmax.f32 %v266_v18, %v531_v31  ;;  %v533_v34 = vpop.f32.mrb[7].mxu0  ;;  %v5691_v18 = vld [vmem:[%s7200_s3 + $0x12c] sm:$0xff]   ;;  %v5698_v26 = vld [vmem:[%s7200_s3 + $0xc4] sm:$0xff]   ;;  %v5702_v31 = vld [vmem:[%s7200_s3 + $0x114] sm:$0xff]  }
 0x121   :  { %v581_v35 = vmax.f32 %v268_v19, %v533_v34  ;;  %v5692_v19 = vld [vmem:[%s7200_s3 + $0xb4] sm:$0xff]   ;;  %v5699_v27 = vld [vmem:[%s7200_s3 + $0x10c] sm:$0xff]  }
 0x122   :  { %v5703_v32 = vld [vmem:[%s7200_s3 + $0x14c] sm:$0xff]   ;;  %v5706_v34 = vld [vmem:[%s7200_s3 + $0x154] ss:$0 sps:$4 sm:$0x11]  }
 0x141   :  { %v841_v20 = vpop.f32.mrb[8].mxu1  ;;  %v798_v37 = vpop.f32.mrb[8].mxu0 }
 0x142   :  { %v850_v36 = vmax.f32 %v579_v22, %v841_v20  ;;  %v843_v38 = vpop.f32.mrb[9].mxu1  ;;  %v848_v39 = vmax.f32 %v577_v25, %v798_v37  ;;  %v800_v40 = vpop.f32.mrb[9].mxu0  ;;  %v5694_v22 = vld [vmem:[%s7200_s3 + $0x134] sm:$0xff]   ;;  %v5697_v25 = vld [vmem:[%s7200_s3 + $0x13c] sm:$0xff]   ;;  %v1594_v20 = vsel %vm1330_vm1, %v5706_v34, 0 }
 0x143   :  { %v844_v41 = vpop.f32.mrb[10].mxu1  ;;  %v849_v42 = vmax.f32 %v578_v28, %v800_v40  ;;  %v802_v44 = vpop.f32.mrb[10].mxu0  ;;  %v5700_v28 = vld [vmem:[%s7200_s3 + $0x144] sm:$0xff]   ;;  %v5708_v37 = vld [vmem:[%s7200_s3 + $0x198] sm:$0xff]  }
 0x144   :  { %v853_v43 = vmax.f32 %v582_v29, %v844_v41  ;;  %v846_v45 = vpop.f32.mrb[11].mxu1  ;;  %v851_v46 = vmax.f32 %v580_v33, %v802_v44  ;;  %v804_v47 = vpop.f32.mrb[11].mxu0  ;;  %v5701_v29 = vld [vmem:[%s7200_s3 + $0xcc] sm:$0xff]   ;;  %v5704_v33 = vld [vmem:[%s7200_s3 + $0xd4] sm:$0xff]   ;;  %v5709_v38 = vld [vmem:[%s7200_s3 + $0x124] sm:$0xff]  }
 0x145   :  { %v852_v48 = vmax.f32 %v581_v35, %v804_v47  ;;  %v5705_v35 = vld [vmem:[%s7200_s3 + $0x11c] sm:$0xff]   ;;  %v5711_v40 = vld [vmem:[%s7200_s3 + $0xe4] sm:$0xff]   ;;  %v5716_v45 = vld [vmem:[%s7200_s3 + $0x1b0] sm:$0xff]  }
 0x146   :  { %v5712_v41 = vld [vmem:[%s7200_s3 + $0x1a0] sm:$0xff]   ;;  %v5715_v44 = vld [vmem:[%s7200_s3 + $0x168] sm:$0xff]   ;;  %v5718_v47 = vld [vmem:[%s7200_s3 + $0x1b8] sm:$0xff]  }
 0x147   :  { %v5764_v34 = vld [vmem:[%s7200_s3 + $0x3b4] sm:$0xff]  }
 0x165   :  { %v1112_v50 = vpop.f32.mrb[12].mxu1  ;;  %v1069_v52 = vpop.f32.mrb[12].mxu0 }
 0x166   :  { %v1121_v51 = vmax.f32 %v850_v36, %v1112_v50  ;;  %v1114_v0 = vpop.f32.mrb[13].mxu1  ;;  %v1119_v54 = vmax.f32 %v848_v39, %v1069_v52  ;;  %v1071_v30 = vpop.f32.mrb[13].mxu0  ;;  %v5707_v36 = vld [vmem:[%s7200_s3 + $0xdc] sm:$0xff]   ;;  %v5723_v52 = vld [vmem:[%s7200_s3 + $0x188] sm:$0xff]  }
 0x167   :  { %v1115_v55 = vpop.f32.mrb[14].mxu1  ;;  %v1120_v57 = vmax.f32 %v849_v42, %v1071_v30  ;;  %v1073_v59 = vpop.f32.mrb[14].mxu0  ;;  %v5710_v39 = vld [vmem:[%s7200_s3 + $0x158] sm:$0xff]   ;;  %v5713_v42 = vld [vmem:[%s7200_s3 + $0x160] sm:$0xff]   ;;  %v5724_v0 = vld [vmem:[%s7200_s3 + $0x1d0] sm:$0xff]  }
 0x168   :  { %v1139_v56 = vadd.f32 %v1130_v49, %v1121_v51  ;;  %v1124_v58 = vmax.f32 %v853_v43, %v1115_v55  ;;  %v1117_v60 = vpop.f32.mrb[15].mxu1  ;;  %v1137_v62 = vadd.f32 %v1130_v49, %v1119_v54  ;;  %v1122_v63 = vmax.f32 %v851_v46, %v1073_v59  ;;  %v1075_v1 = vpop.f32.mrb[15].mxu0  ;;  %v5714_v43 = vld [vmem:[%s7200_s3 + $0x1a8] sm:$0xff]   ;;  %v5717_v46 = vld [vmem:[%s7200_s3 + $0x170] sm:$0xff]   ;;  %v5721_v50 = vld [vmem:[%s7200_s3 + $0x180] sm:$0xff]  }
 0x169   :  { %v1138_v2 = vadd.f32 %v1130_v49, %v1120_v57  ;;  %v1123_v4 = vmax.f32 %v852_v48, %v1075_v1  ;;  %v5719_v48 = vld [vmem:[%s7200_s3 + $0x178] sm:$0xff]   ;;  %v5720_v49 = vld [vmem:[%s7200_s3 + $0x1c0] sm:$0xff]   ;;  %v5722_v51 = vld [vmem:[%s7200_s3 + $0x1c8] sm:$0xff]  }
 0x16a   :  { %v1142_v3 = vadd.f32 %v1135_v61, %v1124_v58  ;;  %v1140_v5 = vadd.f32 %v1135_v61, %v1122_v63  ;;  %v1145_v6 = vmax.f32 %v1139_v56, 0.0  ;;  %v1143_v9 = vmax.f32 %v1137_v62, 0.0  ;;  %v5725_v54 = vld [vmem:[%s7200_s3 + $0x190] sm:$0xff]   ;;  %v5726_v30 = vld [vmem:[%s7200_s3 + $0x244] sm:$0xff]   ;;  %v5732_v60 = vld [vmem:[%s7200_s3 + $0x25c] sm:$0xff]  }
 0x16b   :  { %v1141_v8 = vadd.f32 %v1135_v61, %v1123_v4  ;;  %v1144_v12 = vmax.f32 %v1138_v2, 0.0  ;;  %v5727_v55 = vld [vmem:[%s7200_s3 + $0x204] sm:$0xff]   ;;  %v5728_v56 = vld [vmem:[%s7200_s3 + $0x24c] sm:$0xff]   ;;  %v5730_v58 = vld [vmem:[%s7200_s3 + $0x254] sm:$0xff]  }
 0x16c   :  { %v1148_v7 = vmax.f32 %v1142_v3, 0.0  ;;  %v1146_v10 = vmax.f32 %v1140_v5, 0.0  ;;  %v5729_v57 = vld [vmem:[%s7200_s3 + $0x20c] sm:$0xff]   ;;  %v5731_v59 = vld [vmem:[%s7200_s3 + $0x214] sm:$0xff]   ;;  %v5733_v61 = vld [vmem:[%s7200_s3 + $0x21c] sm:$0xff]  }
 0x16d   :  { %v1147_v14 = vmax.f32 %v1141_v8, 0.0  ;;  %v5734_v62 = vld [vmem:[%s7200_s3 + $0x264] sm:$0xff]   ;;  %v5736_v1 = vld [vmem:[%s7200_s3 + $0x26c] sm:$0xff]   ;;  %v5738_v3 = vld [vmem:[%s7200_s3 + $0x274] sm:$0xff]  }
 0x16e   :  { %v6414_v13 = vpack.c.bf16 %v1148_v7, %v1145_v6  ;;  %v6416_v15 = vpack.c.bf16 %v1146_v10, %v1143_v9  ;;  %v5735_v63 = vld [vmem:[%s7200_s3 + $0x224] sm:$0xff]   ;;  %v5737_v2 = vld [vmem:[%s7200_s3 + $0x22c] sm:$0xff]   ;;  %v5739_v4 = vld [vmem:[%s7200_s3 + $0x234] sm:$0xff]  }
 0x16f   :  { %v6421_v17 = vpack.c.bf16 %v1147_v14, %v1144_v12  ;;  %v5740_v5 = vld [vmem:[%s7200_s3 + $0x27c] sm:$0xff]   ;;  %v5742_v7 = vld [vmem:[%s7200_s3 + $0x2f0] sm:$0xff]   ;;  %v5748_v14 = vld [vmem:[%s7200_s3 + $0x308] sm:$0xff]  }
 0x170   :  { %5281 = vmatmul.mubr.msk.bf16.vlgmr.msra.gmra.mrb[16].mxu1 %vm1326_vm3, %v6414_v13  ;;  %v5741_v6 = vld [vmem:[%s7200_s3 + $0x23c] sm:$0xff]   ;;  %v5743_v8 = vld [vmem:[%s7200_s3 + $0x2b0] sm:$0xff]  }
 0x171   :  { %5005 = vmatpush3.bf16.msra.mxu1 %v5689_v11  ;;  %1366 = vmatprep.mubr.bf16.mxu0 %v6421_v17  ;;  %v5744_v9 = vld [vmem:[%s7200_s3 + $0x2f8] sm:$0xff]   ;;  %v5746_v11 = vld [vmem:[%s7200_s3 + $0x300] sm:$0xff]  }
 0x172   :  { %1628 = vmatprep.mubr.bf16.mxu1 %v6421_v17  ;;  %1367 = vmatmul.mubr.bf16.vlgmr.msra.gmra.mrb[16].mxu0 %v6416_v15  ;;  %v5745_v10 = vld [vmem:[%s7200_s3 + $0x2b8] sm:$0xff]   ;;  %v5747_v12 = vld [vmem:[%s7200_s3 + $0x2c0] sm:$0xff]  }
 0x173   :  { %5006 = vmatprep.subr.bf16.mxu1 %v5690_v16  ;;  %5285 = vmatpush3.bf16.msra.mxu0 %v5691_v18  ;;  %v5749_v16 = vld [vmem:[%s7200_s3 + $0x2c8] sm:$0xff]   ;;  %v5750_v18 = vld [vmem:[%s7200_s3 + $0x310] sm:$0xff]  }
 0x174   :  { %5296 = vmatprep.mubr.msk.bf16.mxu0 %vm5875_vm2, %v5874_v53  ;;  %5286 = vmatprep.subr.bf16.mxu0 %v5874_v53 }
 0x175   :  { %5007 = vmatpush3.bf16.msra.mxu1 %v5692_v19  ;;  %v5751_v19 = vld [vmem:[%s7200_s3 + $0x2d0] sm:$0xff]  }
 0x176   :  { %5008 = vmatprep.subr.bf16.mxu1 %v5693_v21  ;;  %v5752_v21 = vld [vmem:[%s7200_s3 + $0x318] sm:$0xff]  }
 0x177   :  { %5287 = vmatpush3.bf16.msra.mxu0 %v5694_v22  ;;  %v5753_v22 = vld [vmem:[%s7200_s3 + $0x2d8] sm:$0xff]  }
 0x178   :  { %5288 = vmatprep.subr.bf16.mxu0 %v5874_v53 }
 0x179   :  { %5009 = vmatpush3.bf16.msra.mxu1 %v5695_v23  ;;  %v5754_v23 = vld [vmem:[%s7200_s3 + $0x320] sm:$0xff]  }
 0x17a   :  { %5010 = vmatprep.subr.bf16.mxu1 %v5696_v24  ;;  %v5755_v24 = vld [vmem:[%s7200_s3 + $0x2e0] sm:$0xff]  }
 0x17b   :  { %5289 = vmatpush3.bf16.msra.mxu0 %v5697_v25  ;;  %v5756_v25 = vld [vmem:[%s7200_s3 + $0x328] sm:$0xff]  }
 0x17c   :  { %5290 = vmatprep.subr.bf16.mxu0 %v5874_v53 }
 0x17d   :  { %5011 = vmatpush3.bf16.msra.mxu1 %v5698_v26  ;;  %v5757_v26 = vld [vmem:[%s7200_s3 + $0x2e8] sm:$0xff]  }
 0x17e   :  { %5012 = vmatprep.subr.bf16.mxu1 %v5699_v27  ;;  %v5758_v27 = vld [vmem:[%s7200_s3 + $0x39c] sm:$0xff]  }
 0x17f   :  { %5291 = vmatpush3.bf16.msra.mxu0 %v5700_v28  ;;  %v5759_v28 = vld [vmem:[%s7200_s3 + $0x35c] sm:$0xff]  }
 0x180   :  { %5292 = vmatprep.subr.bf16.mxu0 %v5874_v53 }
 0x181   :  { %5013 = vmatpush3.bf16.msra.mxu1 %v5701_v29  ;;  %v5760_v29 = vld [vmem:[%s7200_s3 + $0x3a4] sm:$0xff]  }
 0x182   :  { %5014 = vmatprep.subr.bf16.mxu1 %v5702_v31  ;;  %v5761_v31 = vld [vmem:[%s7200_s3 + $0x364] sm:$0xff]  }
 0x183   :  { %5293 = vmatpush3.bf16.msra.mxu0 %v5703_v32  ;;  %v5762_v32 = vld [vmem:[%s7200_s3 + $0x3ac] sm:$0xff]  }
 0x184   :  { %5294 = vmatprep.subr.bf16.mxu0 %v5874_v53 }
 0x185   :  { %5015 = vmatpush3.bf16.msra.mxu1 %v5704_v33  ;;  %v5763_v33 = vld [vmem:[%s7200_s3 + $0x36c] sm:$0xff]  }
 0x186   :  { %5016 = vmatprep.subr.bf16.mxu1 %v5705_v35  ;;  %v5765_v35 = vld [vmem:[%s7200_s3 + $0x374] sm:$0xff]  }
 0x187   :  { %5295 = vmatpush3.bf16.msra.mxu0 %v1594_v20  ;;  %v5766_v20 = vld [vmem:[%s7200_s3 + $0x3bc] sm:$0xff]  }
 0x188   :  { %5037 = vmatprep.subr.bf16.mxu0 %v5708_v37  ;;  %v5768_v37 = vld [vmem:[%s7200_s3 + $0x3c4] sm:$0xff]  }
 0x189   :  { %5017 = vmatpush3.bf16.msra.mxu1 %v5707_v36  ;;  %v5767_v36 = vld [vmem:[%s7200_s3 + $0x37c] sm:$0xff]  }
 0x18a   :  { %5018 = vmatprep.subr.bf16.mxu1 %v5709_v38  ;;  %5297 = vmatmul.mubr.msk.bf16.vlgmr.msra.gmra.mrb[20].mxu0 %vm1326_vm3, %v6414_v13  ;;  %v5769_v38 = vld [vmem:[%s7200_s3 + $0x384] sm:$0xff]  }
 0x18b   :  { %5038 = vmatpush3.bf16.msra.mxu0 %v5710_v39  ;;  %1988 = vmatprep.mubr.bf16.mxu0 %v6421_v17  ;;  %v5770_v39 = vld [vmem:[%s7200_s3 + $0x3cc] sm:$0xff]  }
 0x18c   :  { %5039 = vmatprep.subr.bf16.mxu0 %v5712_v41  ;;  %v5772_v41 = vld [vmem:[%s7200_s3 + $0x3d4] sm:$0xff]  }
 0x18d   :  { %5019 = vmatpush3.bf16.msra.mxu1 %v5711_v40  ;;  %v5771_v40 = vld [vmem:[%s7200_s3 + $0x38c] sm:$0xff]  }
 0x18e   :  { %5300 = vmatprep.subr.bf16.mxu1 %v5874_v53 }
 0x18f   :  { %5040 = vmatpush3.bf16.msra.mxu0 %v5713_v42  ;;  %v5773_v42 = vld [vmem:[%s7200_s3 + $0x394] sm:$0xff]  }
 0x190   :  { %1629 = vmatmul.mubr.bf16.vlgmr.msra.gmra.mrb[20].mxu1 %v6416_v15  ;;  %5041 = vmatprep.subr.bf16.mxu0 %v5714_v43  ;;  %v5774_v43 = vld [vmem:[%s7200_s3 + $0x448] sm:$0xff]  }
 0x191   :  { %5302 = vmatprep.mubr.msk.bf16.mxu1 %vm5875_vm2, %v5874_v53 }
 0x193   :  { %5042 = vmatpush3.bf16.msra.mxu0 %v5715_v44  ;;  %v5775_v44 = vld [vmem:[%s7200_s3 + $0x408] sm:$0xff]  }
 0x194   :  { %5043 = vmatprep.subr.bf16.mxu0 %v5716_v45  ;;  %v5776_v45 = vld [vmem:[%s7200_s3 + $0x450] sm:$0xff]  }
 0x197   :  { %5044 = vmatpush3.bf16.msra.mxu0 %v5717_v46  ;;  %v5777_v46 = vld [vmem:[%s7200_s3 + $0x410] sm:$0xff]  }
 0x198   :  { %5045 = vmatprep.subr.bf16.mxu0 %v5718_v47  ;;  %v5778_v47 = vld [vmem:[%s7200_s3 + $0x458] sm:$0xff]  }
 0x19b   :  { %5046 = vmatpush3.bf16.msra.mxu0 %v5719_v48  ;;  %v5779_v48 = vld [vmem:[%s7200_s3 + $0x418] sm:$0xff]  }
 0x19c   :  { %5047 = vmatprep.subr.bf16.mxu0 %v5720_v49  ;;  %v5780_v49 = vld [vmem:[%s7200_s3 + $0x460] sm:$0xff]  }
 0x19f   :  { %5048 = vmatpush3.bf16.msra.mxu0 %v5721_v50  ;;  %v5781_v50 = vld [vmem:[%s7200_s3 + $0x420] sm:$0xff]  }
 0x1a0   :  { %5049 = vmatprep.subr.bf16.mxu0 %v5722_v51  ;;  %v5782_v51 = vld [vmem:[%s7200_s3 + $0x468] sm:$0xff]  }
 0x1a3   :  { %5050 = vmatpush3.bf16.msra.mxu0 %v5723_v52  ;;  %v5783_v52 = vld [vmem:[%s7200_s3 + $0x428] sm:$0xff]  }
 0x1a4   :  { %5051 = vmatprep.subr.bf16.mxu0 %v5724_v0  ;;  %v5784_v0 = vld [vmem:[%s7200_s3 + $0x470] sm:$0xff]  }
 0x1a7   :  { %5052 = vmatpush3.bf16.msra.mxu0 %v5725_v54  ;;  %v5785_v54 = vld [vmem:[%s7200_s3 + $0x430] sm:$0xff]  }
 0x1a8   :  { %5068 = vmatprep.subr.bf16.mxu0 %v5726_v30  ;;  %v5786_v30 = vld [vmem:[%s7200_s3 + $0x478] sm:$0xff]  }
 0x1aa   :  { %1989 = vmatmul.mubr.bf16.vlgmr.msra.gmra.mrb[24].mxu0 %v6416_v15 }
 0x1ab   :  { %5069 = vmatpush3.bf16.msra.mxu0 %v5727_v55  ;;  %2301 = vmatprep.mubr.bf16.mxu0 %v6421_v17  ;;  %v5787_v55 = vld [vmem:[%s7200_s3 + $0x438] sm:$0xff]  }
 0x1ac   :  { %5070 = vmatprep.subr.bf16.mxu0 %v5728_v56  ;;  %v5788_v56 = vld [vmem:[%s7200_s3 + $0x480] sm:$0xff]  }
 0x1af   :  { %5071 = vmatpush3.bf16.msra.mxu0 %v5729_v57  ;;  %v5789_v57 = vld [vmem:[%s7200_s3 + $0x440] sm:$0xff]  }
 0x1b0   :  { %5072 = vmatprep.subr.bf16.mxu0 %v5730_v58  ;;  %v5790_v58 = vld [vmem:[%s7200_s3 + $0x4f4] sm:$0xff]  }
 0x1b3   :  { %5073 = vmatpush3.bf16.msra.mxu0 %v5731_v59  ;;  %v5791_v59 = vld [vmem:[%s7200_s3 + $0x4b4] sm:$0xff]  }
 0x1b4   :  { %5074 = vmatprep.subr.bf16.mxu0 %v5732_v60  ;;  %v5792_v60 = vld [vmem:[%s7200_s3 + $0x4fc] sm:$0xff]  }
 0x1b7   :  { %5075 = vmatpush3.bf16.msra.mxu0 %v5733_v61  ;;  %v5793_v61 = vld [vmem:[%s7200_s3 + $0x4bc] sm:$0xff]  }
 0x1b8   :  { %5076 = vmatprep.subr.bf16.mxu0 %v5734_v62  ;;  %v5794_v62 = vld [vmem:[%s7200_s3 + $0x504] sm:$0xff]  }
 0x1bb   :  { %5077 = vmatpush3.bf16.msra.mxu0 %v5735_v63  ;;  %v5795_v63 = vld [vmem:[%s7200_s3 + $0x4c4] sm:$0xff]  }
 0x1bc   :  { %5078 = vmatprep.subr.bf16.mxu0 %v5736_v1  ;;  %v5796_v1 = vld [vmem:[%s7200_s3 + $0x50c] sm:$0xff]  }
 0x1bf   :  { %5079 = vmatpush3.bf16.msra.mxu0 %v5737_v2  ;;  %v5797_v2 = vld [vmem:[%s7200_s3 + $0x4cc] sm:$0xff]  }
 0x1c0   :  { %5080 = vmatprep.subr.bf16.mxu0 %v5738_v3  ;;  %v5798_v3 = vld [vmem:[%s7200_s3 + $0x514] sm:$0xff]  }
 0x1c3   :  { %5081 = vmatpush3.bf16.msra.mxu0 %v5739_v4  ;;  %v5799_v4 = vld [vmem:[%s7200_s3 + $0x4d4] sm:$0xff]  }
 0x1c4   :  { %5082 = vmatprep.subr.bf16.mxu0 %v5740_v5  ;;  %v5800_v5 = vld [vmem:[%s7200_s3 + $0x51c] sm:$0xff]  }
 0x1c7   :  { %5083 = vmatpush3.bf16.msra.mxu0 %v5741_v6  ;;  %v5801_v6 = vld [vmem:[%s7200_s3 + $0x4dc] sm:$0xff]  }
 0x1c8   :  { %5099 = vmatprep.subr.bf16.mxu0 %v5742_v7  ;;  %v5802_v7 = vld [vmem:[%s7200_s3 + $0x524] sm:$0xff]  }
 0x1ca   :  { %2302 = vmatmul.mubr.bf16.vlgmr.msra.gmra.mrb[28].mxu0 %v6416_v15 }
 0x1cb   :  { %5100 = vmatpush3.bf16.msra.mxu0 %v5743_v8  ;;  %2614 = vmatprep.mubr.bf16.mxu0 %v6421_v17  ;;  %v5803_v8 = vld [vmem:[%s7200_s3 + $0x4e4] sm:$0xff]  }
 0x1cc   :  { %5101 = vmatprep.subr.bf16.mxu0 %v5744_v9  ;;  %v5804_v9 = vld [vmem:[%s7200_s3 + $0x52c] sm:$0xff]  }
 0x1cf   :  { %5102 = vmatpush3.bf16.msra.mxu0 %v5745_v10 }
 0x1d0   :  { %5103 = vmatprep.subr.bf16.mxu0 %v5746_v11 }
 0x1d3   :  { %5104 = vmatpush3.bf16.msra.mxu0 %v5747_v12  ;;  %v5805_v12 = vld [vmem:[%s7200_s3 + $0x4ec] sm:$0xff]  }
 0x1d4   :  { %5105 = vmatprep.subr.bf16.mxu0 %v5748_v14 }
 0x1d7   :  { %5106 = vmatpush3.bf16.msra.mxu0 %v5749_v16  ;;  %v5806_v16 = vld [vmem:[%s7200_s3 + $0x5a0] sm:$0xff]  }
 0x1d8   :  { %5107 = vmatprep.subr.bf16.mxu0 %v5750_v18 }
 0x1db   :  { %5108 = vmatpush3.bf16.msra.mxu0 %v5751_v19 }
 0x1dc   :  { %5109 = vmatprep.subr.bf16.mxu0 %v5752_v21 }
 0x1df   :  { %5110 = vmatpush3.bf16.msra.mxu0 %v5753_v22 }
 0x1e0   :  { %5111 = vmatprep.subr.bf16.mxu0 %v5754_v23 }
 0x1e3   :  { %5112 = vmatpush3.bf16.msra.mxu0 %v5755_v24  ;;  %v5807_v24 = vld [vmem:[%s7200_s3 + $0x560] sm:$0xff]  }
 0x1e4   :  { %5113 = vmatprep.subr.bf16.mxu0 %v5756_v25 }
 0x1e7   :  { %5114 = vmatpush3.bf16.msra.mxu0 %v5757_v26  ;;  %v5808_v26 = vld [vmem:[%s7200_s3 + $0x5a8] sm:$0xff]  }
 0x1e8   :  { %5130 = vmatprep.subr.bf16.mxu0 %v5758_v27 }
 0x1ea   :  { %2615 = vmatmul.mubr.bf16.vlgmr.msra.gmra.mrb[32].mxu0 %v6416_v15 }
 0x1eb   :  { %5131 = vmatpush3.bf16.msra.mxu0 %v5759_v28  ;;  %2927 = vmatprep.mubr.bf16.mxu0 %v6421_v17 }
 0x1ec   :  { %5132 = vmatprep.subr.bf16.mxu0 %v5760_v29 }
 0x1ef   :  { %5133 = vmatpush3.bf16.msra.mxu0 %v5761_v31  ;;  %v5809_v31 = vld [vmem:[%s7200_s3 + $0x568] sm:$0xff]  }
 0x1f0   :  { %5134 = vmatprep.subr.bf16.mxu0 %v5762_v32  ;;  %v5810_v32 = vld [vmem:[%s7200_s3 + $0x5b0] sm:$0xff]  }
 0x1f3   :  { %5135 = vmatpush3.bf16.msra.mxu0 %v5763_v33 }
 0x1f4   :  { %5136 = vmatprep.subr.bf16.mxu0 %v5764_v34  ;;  %v5811_v34 = vld [vmem:[%s7200_s3 + $0x570] sm:$0xff]  }
 0x1f7   :  { %5137 = vmatpush3.bf16.msra.mxu0 %v5765_v35  ;;  %v5813_v35 = vld [vmem:[%s7200_s3 + $0x578] sm:$0xff]  }
 0x1f8   :  { %5138 = vmatprep.subr.bf16.mxu0 %v5766_v20  ;;  %v5814_v20 = vld [vmem:[%s7200_s3 + $0x5c0] sm:$0xff]  }
 0x1fb   :  { %5139 = vmatpush3.bf16.msra.mxu0 %v5767_v36  ;;  %v5815_v36 = vld [vmem:[%s7200_s3 + $0x580] sm:$0xff]  }
 0x1fc   :  { %5140 = vmatprep.subr.bf16.mxu0 %v5768_v37  ;;  %v5816_v37 = vld [vmem:[%s7200_s3 + $0x5c8] sm:$0xff]  }
 0x1ff   :  { %5141 = vmatpush3.bf16.msra.mxu0 %v5769_v38  ;;  %v5817_v38 = vld [vmem:[%s7200_s3 + $0x588] sm:$0xff]  }
 0x200   :  { %5142 = vmatprep.subr.bf16.mxu0 %v5770_v39  ;;  %v5818_v39 = vld [vmem:[%s7200_s3 + $0x5d0] sm:$0xff]  }
 0x203   :  { %5143 = vmatpush3.bf16.msra.mxu0 %v5771_v40 }
 0x204   :  { %5144 = vmatprep.subr.bf16.mxu0 %v5772_v41 }
 0x207   :  { %5145 = vmatpush3.bf16.msra.mxu0 %v5773_v42 }
 0x208   :  { %5161 = vmatprep.subr.bf16.mxu0 %v5774_v43  ;;  %v5819_v43 = vld [vmem:[%s7200_s3 + $0x590] sm:$0xff]  }
 0x20a   :  { %2928 = vmatmul.mubr.bf16.vlgmr.msra.gmra.mrb[36].mxu0 %v6416_v15 }
 0x20b   :  { %5162 = vmatpush3.bf16.msra.mxu0 %v5775_v44  ;;  %3240 = vmatprep.mubr.bf16.mxu0 %v6421_v17 }
 0x20c   :  { %5163 = vmatprep.subr.bf16.mxu0 %v5776_v45  ;;  %v5820_v45 = vld [vmem:[%s7200_s3 + $0x5d8] sm:$0xff]  }
 0x20f   :  { %5164 = vmatpush3.bf16.msra.mxu0 %v5777_v46 }
 0x210   :  { %5165 = vmatprep.subr.bf16.mxu0 %v5778_v47 }
 0x213   :  { %5166 = vmatpush3.bf16.msra.mxu0 %v5779_v48  ;;  %v5821_v48 = vld [vmem:[%s7200_s3 + $0x598] sm:$0xff]  }
 0x214   :  { %5167 = vmatprep.subr.bf16.mxu0 %v5780_v49 }
 0x217   :  { %5168 = vmatpush3.bf16.msra.mxu0 %v5781_v50 }
 0x218   :  { %5169 = vmatprep.subr.bf16.mxu0 %v5782_v51 }
 0x21b   :  { %5170 = vmatpush3.bf16.msra.mxu0 %v5783_v52 }
 0x21c   :  { %5171 = vmatprep.subr.bf16.mxu0 %v5784_v0 }
 0x21f   :  { %5172 = vmatpush3.bf16.msra.mxu0 %v5785_v54 }
 0x220   :  { %5173 = vmatprep.subr.bf16.mxu0 %v5786_v30 }
 0x223   :  { %5174 = vmatpush3.bf16.msra.mxu0 %v5787_v55  ;;  %v5822_v55 = vld [vmem:[%s7201_s4 + $0x8] sm:$0xff]  }
 0x224   :  { %5175 = vmatprep.subr.bf16.mxu0 %v5788_v56  ;;  %v5823_v56 = vld [vmem:[%s7201_s4] sm:$0xff]  }
 0x227   :  { %5176 = vmatpush3.bf16.msra.mxu0 %v5789_v57  ;;  %v5825_v57 = vld [vmem:[%s7200_s3 + $0x1e0] sm:$0xff]  }
 0x228   :  { %5192 = vmatprep.subr.bf16.mxu0 %v5790_v58  ;;  %v5826_v58 = vld [vmem:[%s7200_s3 + $0x1e8] sm:$0xff]  }
 0x22a   :  { %3241 = vmatmul.mubr.bf16.vlgmr.msra.gmra.mrb[40].mxu0 %v6416_v15 }
 0x22b   :  { %5193 = vmatpush3.bf16.msra.mxu0 %v5791_v59  ;;  %3553 = vmatprep.mubr.bf16.mxu0 %v6421_v17 }
 0x22c   :  { %5194 = vmatprep.subr.bf16.mxu0 %v5792_v60 }
 0x22f   :  { %5195 = vmatpush3.bf16.msra.mxu0 %v5793_v61 }
 0x230   :  { %5196 = vmatprep.subr.bf16.mxu0 %v5794_v62 }
 0x233   :  { %5197 = vmatpush3.bf16.msra.mxu0 %v5795_v63 }
 0x234   :  { %5198 = vmatprep.subr.bf16.mxu0 %v5796_v1  ;;  %v5827_v1 = vld [vmem:[%s7200_s3 + $0x1f0] sm:$0xff]  }
 0x237   :  { %5199 = vmatpush3.bf16.msra.mxu0 %v5797_v2 }
 0x238   :  { %5200 = vmatprep.subr.bf16.mxu0 %v5798_v3  ;;  %v5828_v3 = vld [vmem:[%s7200_s3 + $0x1f8] sm:$0xff]  }
 0x23b   :  { %5201 = vmatpush3.bf16.msra.mxu0 %v5799_v4  ;;  %v5829_v4 = vld [vmem:[%s7200_s3 + $0x200] ss:$0 sps:$4 sm:$0x11]  }
 0x23c   :  { %5202 = vmatprep.subr.bf16.mxu0 %v5800_v5  ;;  %v1954_v5 = vsel %vm1330_vm1, %v5829_v4, 0 }
 0x23f   :  { %5203 = vmatpush3.bf16.msra.mxu0 %v5801_v6 }
 0x240   :  { %5204 = vmatprep.subr.bf16.mxu0 %v5802_v7 }
 0x243   :  { %v1409_v10 = vpop.f32.mrb[16].mxu1  ;;  %5205 = vmatpush3.bf16.msra.mxu0 %v5803_v8 }
 0x244   :  { %v5282_v11 = vpop.f32.mrb[17].mxu1  ;;  %5206 = vmatprep.subr.bf16.mxu0 %v5804_v9 }
 0x245   :  { %v1412_v14 = vpop.f32.mrb[18].mxu1  ;;  %v4991_v18 = vpop.f32.mrb[16].mxu0 }
 0x246   :  { %v5283_v19 = vpop.f32.mrb[19].mxu1  ;;  %v4992_v21 = vpop.f32.mrb[17].mxu0 }
 0x247   :  { %v4993_v22 = vadd.f32 %v4992_v21, %v4991_v18  ;;  %5207 = vmatpush3.bf16.msra.mxu0 %v5805_v12  ;;  %v4994_v23 = vpop.f32.mrb[18].mxu0 }
 0x248   :  { %v4995_v25 = vpop.f32.mrb[19].mxu0  ;;  %5223 = vmatprep.subr.bf16.mxu0 %v5806_v16 }
 0x249   :  { %v1410_v27 = vadd.f32 %v4993_v22, %v1409_v10  ;;  %v4996_v28 = vadd.f32 %v4995_v25, %v4994_v23 }
 0x24a   :  { %3554 = vmatmul.mubr.bf16.vlgmr.msra.gmra.mrb[44].mxu0 %v6416_v15 }
 0x24b   :  { %v1413_v29 = vadd.f32 %v4996_v28, %v1412_v14  ;;  %5224 = vmatpush3.bf16.msra.mxu0 %v5807_v24  ;;  %3866 = vmatprep.mubr.bf16.mxu0 %v6421_v17  ;;  %v5812_v17 = vld [vmem:[%s7200_s3 + $0x5b8] sm:$0xff]  }
 0x24c   :  { %5225 = vmatprep.subr.bf16.mxu0 %v5808_v26 }
 0x24d   :  { %v1416_v33 = vpack.c.bf16 %v1413_v29, %v1410_v27 }
 0x24f   :  { %5226 = vmatpush3.bf16.msra.mxu0 %v5809_v31 }
 0x250   :  { %5227 = vmatprep.subr.bf16.mxu0 %v5810_v32 }
 0x253   :  { %5228 = vmatpush3.bf16.msra.mxu0 %v5811_v34 }
 0x254   :  { %5229 = vmatprep.subr.bf16.mxu0 %v5812_v17 }
 0x257   :  { %5230 = vmatpush3.bf16.msra.mxu0 %v5813_v35 }
 0x258   :  { %5231 = vmatprep.subr.bf16.mxu0 %v5814_v20 }
 0x25b   :  { %5232 = vmatpush3.bf16.msra.mxu0 %v5815_v36 }
 0x25c   :  { %5233 = vmatprep.subr.bf16.mxu0 %v5816_v37 }
 0x25d   :  { %v1671_v40 = vpop.f32.mrb[20].mxu0 }
 0x25e   :  { %v5298_v41 = vpop.f32.mrb[21].mxu0 }
 0x25f   :  { %v1674_v42 = vpop.f32.mrb[22].mxu0  ;;  %5234 = vmatpush3.bf16.msra.mxu0 %v5817_v38 }
 0x260   :  { %v5299_v44 = vpop.f32.mrb[23].mxu0  ;;  %5235 = vmatprep.subr.bf16.mxu0 %v5818_v39 }
 0x263   :  { %v5020_v46 = vpop.f32.mrb[20].mxu1  ;;  %5236 = vmatpush3.bf16.msra.mxu0 %v5819_v43 }
 0x264   :  { %v5021_v47 = vpop.f32.mrb[21].mxu1  ;;  %5237 = vmatprep.subr.bf16.mxu0 %v5820_v45 }
 0x265   :  { %v5022_v49 = vadd.f32 %v5021_v47, %v5020_v46  ;;  %v5023_v50 = vpop.f32.mrb[22].mxu1 }
 0x266   :  { %v5024_v51 = vpop.f32.mrb[23].mxu1 }
 0x267   :  { %v1672_v52 = vadd.f32 %v5022_v49, %v1671_v40  ;;  %v5025_v0 = vadd.f32 %v5024_v51, %v5023_v50  ;;  %5238 = vmatpush3.bf16.msra.mxu0 %v5821_v48 }
 0x269   :  { %v1675_v54 = vadd.f32 %v5025_v0, %v1674_v42 }
 0x26a   :  { %3867 = vmatmul.mubr.bf16.vlgmr.msra.gmra.mrb[48].mxu0 %v6416_v15  ;;  %v5824_v15 = vld [vmem:[%s7200_s3 + $0x1d8] sm:$0xff]  }
 0x26b   :  { %v1678_v30 = vpack.c.bf16 %v1675_v54, %v1672_v52 }
 0x26d   :  { %5301 = vmatpush3.bf16.msra.mxu1 %v1678_v30 }
 0x26e   :  { %5306 = vmatprep.subr.bf16.mxu1 %v5874_v53 }
 0x270   :  { %5303 = vmatmul.mubr.msk.bf16.vlgmr.msra.gmra.mrb[24].mxu1 %vm224_vm0, %v5822_v55 }
 0x271   :  { %5307 = vmatpush3.bf16.msra.mxu1 %v1416_v33  ;;  %5308 = vmatprep.mubr.msk.bf16.mxu1 %vm5875_vm2, %v5874_v53 }
 0x272   :  { %5312 = vmatprep.subr.bf16.mxu1 %v5874_v53 }
 0x278   :  { %5309 = vmatmul.mubr.msk.bf16.vlgmr.msra.gmra.mrb[28].mxu1 %vm224_vm0, %v5823_v56 }
 0x279   :  { %5313 = vmatpush3.bf16.msra.mxu1 %v5824_v15  ;;  %5324 = vmatprep.mubr.msk.bf16.mxu1 %vm5875_vm2, %v5874_v53 }
 0x27a   :  { %5314 = vmatprep.subr.bf16.mxu1 %v5874_v53 }
 0x27d   :  { %5315 = vmatpush3.bf16.msra.mxu1 %v5825_v57  ;;  %v5053_v59 = vpop.f32.mrb[24].mxu0 }
 0x27e   :  { %5316 = vmatprep.subr.bf16.mxu1 %v5874_v53  ;;  %v5054_v60 = vpop.f32.mrb[25].mxu0 }
 0x27f   :  { %v6874_v61 = vadd.f32 %v5054_v60, %v5053_v59  ;;  %v5056_v62 = vpop.f32.mrb[26].mxu0  ;;  %v5830_v60 = vld [vmem:[%s7201_s4 + $0x10] sm:$0xff]  }
 0x280   :  { %v5057_v63 = vpop.f32.mrb[27].mxu0 }
 0x281   :  { %5317 = vmatpush3.bf16.msra.mxu1 %v5826_v58  ;;  %v6879_v2 = vadd.f32 %v5057_v63, %v5056_v62  ;;  %v5831_v62 = vld [vmem:[%s7200_s3 + $0x284] sm:$0xff]   ;;  %v5833_v63 = vld [vmem:[%s7200_s3 + $0x294] sm:$0xff]  }
 0x282   :  { %5318 = vmatprep.subr.bf16.mxu1 %v5874_v53 }
 0x285   :  { %5319 = vmatpush3.bf16.msra.mxu1 %v5827_v1  ;;  %v5834_v1 = vld [vmem:[%s7200_s3 + $0x29c] sm:$0xff]  }
 0x286   :  { %5320 = vmatprep.subr.bf16.mxu1 %v5874_v53 }
 0x289   :  { %5321 = vmatpush3.bf16.msra.mxu1 %v5828_v3  ;;  %v5836_v3 = vld [vmem:[%s7200_s3 + $0x2ac] ss:$0 sps:$4 sm:$0x11]  }
 0x28a   :  { %5322 = vmatprep.subr.bf16.mxu1 %v5874_v53  ;;  %v2267_v4 = vsel %vm1330_vm1, %v5836_v3, 0 }
 0x28d   :  { %5323 = vmatpush3.bf16.msra.mxu1 %v1954_v5 }
 0x28e   :  { %5328 = vmatprep.subr.bf16.mxu1 %v5874_v53 }
 0x290   :  { %5325 = vmatmul.mubr.msk.bf16.vlgmr.msra.gmra.mrb[32].mxu1 %vm1326_vm3, %v6414_v13 }
 0x291   :  { %5330 = vmatprep.mubr.msk.bf16.mxu1 %vm5875_vm2, %v5874_v53 }
 0x29d   :  { %v5084_v6 = vpop.f32.mrb[28].mxu0 }
 0x29e   :  { %v5085_v7 = vpop.f32.mrb[29].mxu0 }
 0x29f   :  { %v6896_v8 = vadd.f32 %v5085_v7, %v5084_v6  ;;  %v5087_v9 = vpop.f32.mrb[30].mxu0 }
 0x2a0   :  { %v5088_v10 = vpop.f32.mrb[31].mxu0 }
 0x2a1   :  { %v6898_v11 = vadd.f32 %v5088_v10, %v5087_v9 }
 0x2bd   :  { %v5115_v12 = vpop.f32.mrb[32].mxu0 }
 0x2be   :  { %v5116_v14 = vpop.f32.mrb[33].mxu0 }
 0x2bf   :  { %v6900_v16 = vadd.f32 %v5116_v14, %v5115_v12  ;;  %v5118_v18 = vpop.f32.mrb[34].mxu0 }
 0x2c0   :  { %v5119_v19 = vpop.f32.mrb[35].mxu0 }
 0x2c1   :  { %v6902_v21 = vadd.f32 %v5119_v19, %v5118_v18 }
 0x2dd   :  { %v5146_v22 = vpop.f32.mrb[36].mxu0 }
 0x2de   :  { %v5147_v23 = vpop.f32.mrb[37].mxu0 }
 0x2df   :  { %v6904_v24 = vadd.f32 %v5147_v23, %v5146_v22  ;;  %v5149_v25 = vpop.f32.mrb[38].mxu0 }
 0x2e0   :  { %v5150_v26 = vpop.f32.mrb[39].mxu0 }
 0x2e1   :  { %v6906_v27 = vadd.f32 %v5150_v26, %v5149_v25 }
 0x2fd   :  { %v5177_v28 = vpop.f32.mrb[40].mxu0 }
 0x2fe   :  { %v5178_v29 = vpop.f32.mrb[41].mxu0 }
 0x2ff   :  { %v6908_v31 = vadd.f32 %v5178_v29, %v5177_v28  ;;  %v5180_v32 = vpop.f32.mrb[42].mxu0  ;;  %v5837_v28 = vld [vmem:[%s7201_s4 + $0x18] sm:$0xff]   ;;  %v5838_v29 = vld [vmem:[%s7200_s3 + $0x330] sm:$0xff]  }
 0x300   :  { %v5181_v33 = vpop.f32.mrb[43].mxu0 }
 0x301   :  { %v6910_v34 = vadd.f32 %v5181_v33, %v5180_v32  ;;  %v5841_v32 = vld [vmem:[%s7200_s3 + $0x348] sm:$0xff]   ;;  %v5842_v33 = vld [vmem:[%s7200_s3 + $0x350] sm:$0xff]  }
 0x31d   :  { %v5208_v17 = vpop.f32.mrb[44].mxu0 }
 0x31e   :  { %v5209_v35 = vpop.f32.mrb[45].mxu0 }
 0x31f   :  { %v6912_v20 = vadd.f32 %v5209_v35, %v5208_v17  ;;  %v5211_v36 = vpop.f32.mrb[46].mxu0  ;;  %v5843_v17 = vld [vmem:[%s7200_s3 + $0x358] ss:$0 sps:$4 sm:$0x11]  }
 0x320   :  { %v5212_v37 = vpop.f32.mrb[47].mxu0  ;;  %v2580_v35 = vsel %vm1330_vm1, %v5843_v17, 0 }
 0x321   :  { %v6914_v38 = vadd.f32 %v5212_v37, %v5211_v36 }
 0x33d   :  { %v5239_v39 = vpop.f32.mrb[48].mxu0 }
 0x33e   :  { %v5240_v40 = vpop.f32.mrb[49].mxu0 }
 0x33f   :  { %v6916_v41 = vadd.f32 %v5240_v40, %v5239_v39  ;;  %v5242_v42 = vpop.f32.mrb[50].mxu0 }
 0x340   :  { %v5243_v43 = vpop.f32.mrb[51].mxu0 }
 0x341   :  { %v6918_v44 = vadd.f32 %v5243_v43, %v5242_v42 }
 0x343   :  { %v1721_v45 = vpop.f32.mrb[24].mxu1 }
 0x344   :  { %v5304_v46 = vpop.f32.mrb[25].mxu1 }
 0x345   :  { %v1724_v47 = vpop.f32.mrb[26].mxu1 }
 0x346   :  { %v5305_v48 = vpop.f32.mrb[27].mxu1 }
 0x34b   :  { %v1770_v49 = vpop.f32.mrb[28].mxu1 }
 0x34c   :  { %v1771_v50 = vadd.f32 %v1770_v49, %v1721_v45  ;;  %v5310_v51 = vpop.f32.mrb[29].mxu1 }
 0x34d   :  { %v1773_v52 = vpop.f32.mrb[30].mxu1 }
 0x34e   :  { %v1774_v0 = vadd.f32 %v1773_v52, %v1724_v47  ;;  %v5311_v54 = vpop.f32.mrb[31].mxu1  ;;  %v5844_v52 = vld [vmem:[%s7201_s4 + $0x20] sm:$0xff]  }
 0x34f   :  { %v5848_v54 = vld [vmem:[%s7200_s3 + $0x3f4] sm:$0xff]  }
 0x363   :  { %v2031_v30 = vpop.f32.mrb[32].mxu1 }
 0x364   :  { %v2032_v55 = vadd.f32 %v6874_v61, %v2031_v30  ;;  %v5326_v56 = vpop.f32.mrb[33].mxu1  ;;  %v5832_v61 = vld [vmem:[%s7200_s3 + $0x28c] sm:$0xff]   ;;  %v5849_v30 = vld [vmem:[%s7200_s3 + $0x3fc] sm:$0xff]  }
 0x365   :  { %v2034_v15 = vpop.f32.mrb[34].mxu1 }
 0x366   :  { %v2035_v57 = vadd.f32 %v6879_v2, %v2034_v15  ;;  %v5327_v58 = vpop.f32.mrb[35].mxu1  ;;  %v5835_v2 = vld [vmem:[%s7200_s3 + $0x2a4] sm:$0xff]  }
 0x368   :  { %v2038_v59 = vpack.c.bf16 %v2035_v57, %v2032_v55  ;;  %v5850_v55 = vld [vmem:[%s7200_s3 + $0x404] ss:$0 sps:$4 sm:$0x11]  }
 0x369   :  { %v2893_v56 = vsel %vm1330_vm1, %v5850_v55, 0  ;;  %v5866_v55 = vld [vmem:[%s7200_s3 + $0x5e0] sm:$0xff]  }
 0x36a   :  { %5329 = vmatpush3.bf16.msra.mxu1 %v2038_v59 }
 0x36b   :  { %5334 = vmatprep.subr.bf16.mxu1 %v5874_v53 }
 0x36d   :  { %5331 = vmatmul.mubr.msk.bf16.vlgmr.msra.gmra.mrb[36].mxu1 %vm224_vm0, %v5830_v60 }
 0x36e   :  { %5335 = vmatpush3.bf16.msra.mxu1 %v5831_v62  ;;  %5346 = vmatprep.mubr.msk.bf16.mxu1 %vm5875_vm2, %v5874_v53 }
 0x36f   :  { %5336 = vmatprep.subr.bf16.mxu1 %v5874_v53 }
 0x372   :  { %5337 = vmatpush3.bf16.msra.mxu1 %v5832_v61 }
 0x373   :  { %5338 = vmatprep.subr.bf16.mxu1 %v5874_v53 }
 0x376   :  { %5339 = vmatpush3.bf16.msra.mxu1 %v5833_v63 }
 0x377   :  { %5340 = vmatprep.subr.bf16.mxu1 %v5874_v53 }
 0x37a   :  { %5341 = vmatpush3.bf16.msra.mxu1 %v5834_v1 }
 0x37b   :  { %5342 = vmatprep.subr.bf16.mxu1 %v5874_v53 }
 0x37e   :  { %5343 = vmatpush3.bf16.msra.mxu1 %v5835_v2 }
 0x37f   :  { %5344 = vmatprep.subr.bf16.mxu1 %v5874_v53 }
 0x382   :  { %5345 = vmatpush3.bf16.msra.mxu1 %v2267_v4 }
 0x383   :  { %5350 = vmatprep.subr.bf16.mxu1 %v5874_v53 }
 0x385   :  { %5347 = vmatmul.mubr.msk.bf16.vlgmr.msra.gmra.mrb[40].mxu1 %vm1326_vm3, %v6414_v13 }
 0x386   :  { %5352 = vmatprep.mubr.msk.bf16.mxu1 %vm5875_vm2, %v5874_v53 }
 0x440   :  { %v2081_v5 = vpop.f32.mrb[36].mxu1 }
 0x441   :  { %v2088_v6 = vadd.f32 %v2081_v5, %v1771_v50  ;;  %v5332_v7 = vpop.f32.mrb[37].mxu1 }
 0x442   :  { %v2084_v9 = vpop.f32.mrb[38].mxu1  ;;  %v5852_v7 = vld [vmem:[%s7200_s3 + $0x488] sm:$0xff]  }
 0x443   :  { %v2089_v10 = vadd.f32 %v2084_v9, %v1774_v0  ;;  %v5333_v12 = vpop.f32.mrb[39].mxu1  ;;  %v5845_v0 = vld [vmem:[%s7200_s3 + $0x3dc] sm:$0xff]  }
 0x444   :  { %v5855_v9 = vld [vmem:[%s7200_s3 + $0x4a0] sm:$0xff]   ;;  %v5857_v12 = vld [vmem:[%s7200_s3 + $0x4b0] ss:$0 sps:$4 sm:$0x11]  }
 0x458   :  { %v2344_v14 = vpop.f32.mrb[40].mxu1 }
 0x459   :  { %v2345_v18 = vadd.f32 %v6896_v8, %v2344_v14  ;;  %v5348_v19 = vpop.f32.mrb[41].mxu1  ;;  %v5839_v8 = vld [vmem:[%s7200_s3 + $0x338] sm:$0xff]   ;;  %v3206_v14 = vsel %vm1330_vm1, %v5857_v12, 0 }
 0x45a   :  { %v2347_v22 = vpop.f32.mrb[42].mxu1 }
 0x45b   :  { %v2348_v23 = vadd.f32 %v6898_v11, %v2347_v22  ;;  %v5349_v25 = vpop.f32.mrb[43].mxu1  ;;  %v5840_v11 = vld [vmem:[%s7200_s3 + $0x340] sm:$0xff]  }
 0x45d   :  { %v2351_v26 = vpack.c.bf16 %v2348_v23, %v2345_v18 }
 0x45f   :  { %5351 = vmatpush3.bf16.msra.mxu1 %v2351_v26 }
 0x460   :  { %5356 = vmatprep.subr.bf16.mxu1 %v5874_v53 }
 0x462   :  { %5353 = vmatmul.mubr.msk.bf16.vlgmr.msra.gmra.mrb[44].mxu1 %vm224_vm0, %v5837_v28 }
 0x463   :  { %5357 = vmatpush3.bf16.msra.mxu1 %v5838_v29  ;;  %5368 = vmatprep.mubr.msk.bf16.mxu1 %vm5875_vm2, %v5874_v53 }
 0x464   :  { %5358 = vmatprep.subr.bf16.mxu1 %v5874_v53 }
 0x467   :  { %5359 = vmatpush3.bf16.msra.mxu1 %v5839_v8 }
 0x468   :  { %5360 = vmatprep.subr.bf16.mxu1 %v5874_v53 }
 0x46b   :  { %5361 = vmatpush3.bf16.msra.mxu1 %v5840_v11 }
 0x46c   :  { %5362 = vmatprep.subr.bf16.mxu1 %v5874_v53 }
 0x46f   :  { %5363 = vmatpush3.bf16.msra.mxu1 %v5841_v32 }
 0x470   :  { %5364 = vmatprep.subr.bf16.mxu1 %v5874_v53 }
 0x473   :  { %5365 = vmatpush3.bf16.msra.mxu1 %v5842_v33 }
 0x474   :  { %5366 = vmatprep.subr.bf16.mxu1 %v5874_v53 }
 0x477   :  { %5367 = vmatpush3.bf16.msra.mxu1 %v2580_v35  ;;  %v5858_v35 = vld [vmem:[%s7201_s4 + $0x30] sm:$0xff]  }
 0x478   :  { %5372 = vmatprep.subr.bf16.mxu1 %v5874_v53 }
 0x47a   :  { %5369 = vmatmul.mubr.msk.bf16.vlgmr.msra.gmra.mrb[48].mxu1 %vm1326_vm3, %v6414_v13 }
 0x47b   :  { %5374 = vmatprep.mubr.msk.bf16.mxu1 %vm5875_vm2, %v5874_v53 }
 0x535   :  { %v2394_v36 = vpop.f32.mrb[44].mxu1 }
 0x536   :  { %v2401_v37 = vadd.f32 %v2394_v36, %v2088_v6  ;;  %v5354_v39 = vpop.f32.mrb[45].mxu1  ;;  %v5851_v6 = vld [vmem:[%s7201_s4 + $0x28] sm:$0xff]   ;;  %v5859_v36 = vld [vmem:[%s7200_s3 + $0x534] sm:$0xff]  }
 0x537   :  { %v2397_v40 = vpop.f32.mrb[46].mxu1  ;;  %v5863_v39 = vld [vmem:[%s7200_s3 + $0x554] sm:$0xff]  }
 0x538   :  { %v2402_v42 = vadd.f32 %v2397_v40, %v2089_v10  ;;  %v5355_v43 = vpop.f32.mrb[47].mxu1  ;;  %v5856_v10 = vld [vmem:[%s7200_s3 + $0x4a8] sm:$0xff]   ;;  %v5864_v40 = vld [vmem:[%s7200_s3 + $0x55c] ss:$0 sps:$4 sm:$0x11]  }
 0x54d   :  { %v2657_v45 = vpop.f32.mrb[48].mxu1 }
 0x54e   :  { %v2658_v46 = vadd.f32 %v6900_v16, %v2657_v45  ;;  %v5370_v47 = vpop.f32.mrb[49].mxu1  ;;  %v5846_v16 = vld [vmem:[%s7200_s3 + $0x3e4] sm:$0xff]  }
 0x54f   :  { %v2660_v48 = vpop.f32.mrb[50].mxu1 }
 0x550   :  { %v2661_v49 = vadd.f32 %v6902_v21, %v2660_v48  ;;  %v5371_v50 = vpop.f32.mrb[51].mxu1  ;;  %v5847_v21 = vld [vmem:[%s7200_s3 + $0x3ec] sm:$0xff]  }
 0x552   :  { %v2664_v51 = vpack.c.bf16 %v2661_v49, %v2658_v46 }
 0x554   :  { %5373 = vmatpush3.bf16.msra.mxu1 %v2664_v51 }
 0x555   :  { %5378 = vmatprep.subr.bf16.mxu1 %v5874_v53 }
 0x557   :  { %5375 = vmatmul.mubr.msk.bf16.vlgmr.msra.gmra.mrb[52].mxu1 %vm224_vm0, %v5844_v52 }
 0x558   :  { %5379 = vmatpush3.bf16.msra.mxu1 %v5845_v0  ;;  %5390 = vmatprep.mubr.msk.bf16.mxu1 %vm5875_vm2, %v5874_v53 }
 0x559   :  { %5380 = vmatprep.subr.bf16.mxu1 %v5874_v53 }
 0x55c   :  { %5381 = vmatpush3.bf16.msra.mxu1 %v5846_v16 }
 0x55d   :  { %5382 = vmatprep.subr.bf16.mxu1 %v5874_v53 }
 0x560   :  { %5383 = vmatpush3.bf16.msra.mxu1 %v5847_v21 }
 0x561   :  { %5384 = vmatprep.subr.bf16.mxu1 %v5874_v53 }
 0x564   :  { %5385 = vmatpush3.bf16.msra.mxu1 %v5848_v54 }
 0x565   :  { %5386 = vmatprep.subr.bf16.mxu1 %v5874_v53 }
 0x568   :  { %5387 = vmatpush3.bf16.msra.mxu1 %v5849_v30  ;;  %v5865_v30 = vld [vmem:[%s7201_s4 + $0x38] sm:$0xff]  }
 0x569   :  { %5388 = vmatprep.subr.bf16.mxu1 %v5874_v53 }
 0x56c   :  { %5389 = vmatpush3.bf16.msra.mxu1 %v2893_v56  ;;  %v5869_v56 = vld [vmem:[%s7200_s3 + $0x5f8] sm:$0xff]  }
 0x56d   :  { %5394 = vmatprep.subr.bf16.mxu1 %v5874_v53 }
 0x56f   :  { %5391 = vmatmul.mubr.msk.bf16.vlgmr.msra.gmra.mrb[56].mxu1 %vm1326_vm3, %v6414_v13 }
 0x570   :  { %5396 = vmatprep.mubr.msk.bf16.mxu1 %vm5875_vm2, %v5874_v53 }
 0x62a   :  { %v2707_v15 = vpop.f32.mrb[52].mxu1 }
 0x62b   :  { %v2714_v57 = vadd.f32 %v2707_v15, %v2401_v37  ;;  %v5376_v58 = vpop.f32.mrb[53].mxu1  ;;  %v5862_v37 = vld [vmem:[%s7200_s3 + $0x54c] sm:$0xff]   ;;  %v5870_v15 = vld [vmem:[%s7200_s3 + $0x600] sm:$0xff]  }
 0x62c   :  { %v2710_v59 = vpop.f32.mrb[54].mxu1 }
 0x62d   :  { %v2715_v60 = vadd.f32 %v2710_v59, %v2402_v42  ;;  %v5377_v62 = vpop.f32.mrb[55].mxu1  ;;  %v3519_v42 = vsel %vm1330_vm1, %v5864_v40, 0  ;;  %v3968_v59 = vld [vmem:[%s7202_s5] sm:$0xff] }
 0x62e   :  { %3972 = vperm.xlu1 %5518, %v3968_v59   ;;  %v3985_v62 = vld [vmem:[%s7203_s6 + $0x8] sm:$0xff] }
 0x642   :  { %v2970_v61 = vpop.f32.mrb[56].mxu1 }
 0x643   :  { %v2971_v63 = vadd.f32 %v6904_v24, %v2970_v61  ;;  %v5392_v1 = vpop.f32.mrb[57].mxu1  ;;  %v5853_v24 = vld [vmem:[%s7200_s3 + $0x490] sm:$0xff]   ;;  %v3987_v61 = vld [vmem:[%s7203_s6 + $0x18] sm:$0xff] }
 0x644   :  { %v2973_v2 = vpop.f32.mrb[58].mxu1 }
 0x645   :  { %v2974_v3 = vadd.f32 %v6906_v27, %v2973_v2  ;;  %v5393_v4 = vpop.f32.mrb[59].mxu1  ;;  %v5854_v27 = vld [vmem:[%s7200_s3 + $0x498] sm:$0xff]  }
 0x646   :  { %v3989_v4 = vld [vmem:[%s7203_s6 + $0x28] sm:$0xff] }
 0x647   :  { %v2977_v5 = vpack.c.bf16 %v2974_v3, %v2971_v63  ;;  %v3969_v63 = vld [vmem:[%s7202_s5 + $0x8] sm:$0xff]  ;;  %v3988_v3 = vld [vmem:[%s7203_s6 + $0x20] sm:$0xff] }
 0x648   :  { %3977 = vperm.xlu1 %5518, %v3969_v63  }
 0x649   :  { %5395 = vmatpush3.bf16.msra.mxu1 %v2977_v5  ;;  %v5502_v5 = vpack.c.bf16 %v3989_v4, %v3988_v3 }
 0x64a   :  { %5400 = vmatprep.subr.bf16.mxu1 %v5874_v53 }
 0x64c   :  { %5397 = vmatmul.mubr.msk.bf16.vlgmr.msra.gmra.mrb[60].mxu1 %vm224_vm0, %v5851_v6 }
 0x64d   :  { %5401 = vmatpush3.bf16.msra.mxu1 %v5852_v7  ;;  %5412 = vmatprep.mubr.msk.bf16.mxu1 %vm5875_vm2, %v5874_v53 }
 0x64e   :  { %5402 = vmatprep.subr.bf16.mxu1 %v5874_v53 }
 0x651   :  { %5403 = vmatpush3.bf16.msra.mxu1 %v5853_v24 }
 0x652   :  { %5404 = vmatprep.subr.bf16.mxu1 %v5874_v53 }
 0x655   :  { %5405 = vmatpush3.bf16.msra.mxu1 %v5854_v27 }
 0x656   :  { %5406 = vmatprep.subr.bf16.mxu1 %v5874_v53 }
 0x659   :  { %5407 = vmatpush3.bf16.msra.mxu1 %v5855_v9 }
 0x65a   :  { %5408 = vmatprep.subr.bf16.mxu1 %v5874_v53 }
 0x65d   :  { %5409 = vmatpush3.bf16.msra.mxu1 %v5856_v10 }
 0x65e   :  { %5410 = vmatprep.subr.bf16.mxu1 %v5874_v53 }
 0x661   :  { %5411 = vmatpush3.bf16.msra.mxu1 %v3206_v14 }
 0x662   :  { %5416 = vmatprep.subr.bf16.mxu1 %v5874_v53 }
 0x664   :  { %5413 = vmatmul.mubr.msk.bf16.vlgmr.msra.gmra.mrb[64].mxu1 %vm1326_vm3, %v6414_v13 }
 0x665   :  { %5418 = vmatprep.mubr.msk.bf16.mxu1 %vm5875_vm2, %v5874_v53 }
 0x71f   :  { %v3020_v18 = vpop.f32.mrb[60].mxu1 }
 0x720   :  { %v3027_v19 = vadd.f32 %v3020_v18, %v2714_v57  ;;  %v5398_v22 = vpop.f32.mrb[61].mxu1  ;;  %v5871_v57 = vld [vmem:[%s7200_s3 + $0x608] ss:$0 sps:$4 sm:$0x11]  }
 0x721   :  { %v3023_v23 = vpop.f32.mrb[62].mxu1  ;;  %v3832_v58 = vsel %vm1330_vm1, %v5871_v57, 0 }
 0x722   :  { %v3028_v25 = vadd.f32 %v3023_v23, %v2715_v60  ;;  %v5399_v26 = vpop.f32.mrb[63].mxu1  ;;  %v3984_v60 = vld [vmem:[%s7203_s6] sm:$0xff] }
 0x723   :  { %v5494_v1 = vpack.c.bf16 %v3985_v62, %v3984_v60  ;;  %v5872_v26 = vld [vmem:[%s7201_s4 + $0x40] sm:$0xff]  }
 0x725   :  { %5495 = vmatprep.subr.bf16.mxu0 %v5494_v1 }
 0x726   :  { %5497 = vmatpush3.bf16.msra.mxu0 %v5494_v1 }
 0x737   :  { %v3283_v28 = vpop.f32.mrb[64].mxu1 }
 0x738   :  { %v3284_v29 = vadd.f32 %v6908_v31, %v3283_v28  ;;  %v5414_v8 = vpop.f32.mrb[65].mxu1  ;;  %v5860_v31 = vld [vmem:[%s7200_s3 + $0x53c] sm:$0xff]   ;;  %v3990_v28 = vld [vmem:[%s7203_s6 + $0x30] sm:$0xff] }
 0x739   :  { %v3286_v11 = vpop.f32.mrb[66].mxu1  ;;  %v3973_v8 = vpop.permute.xlu1 %3972 }
 0x73a   :  { %v3287_v32 = vadd.f32 %v6910_v34, %v3286_v11  ;;  %v5415_v33 = vpop.f32.mrb[67].mxu1  ;;  %v5861_v34 = vld [vmem:[%s7200_s3 + $0x544] sm:$0xff]  }
 0x73c   :  { %v3290_v17 = vpack.c.bf16 %v3287_v32, %v3284_v29 }
 0x73e   :  { %5417 = vmatpush3.bf16.msra.mxu1 %v3290_v17 }
 0x73f   :  { %5422 = vmatprep.subr.bf16.mxu1 %v5874_v53 }
 0x741   :  { %5419 = vmatmul.mubr.msk.bf16.vlgmr.msra.gmra.mrb[68].mxu1 %vm224_vm0, %v5858_v35 }
 0x742   :  { %5423 = vmatpush3.bf16.msra.mxu1 %v5859_v36  ;;  %5434 = vmatprep.mubr.msk.bf16.mxu1 %vm5875_vm2, %v5874_v53 }
 0x743   :  { %5424 = vmatprep.subr.bf16.mxu1 %v5874_v53 }
 0x746   :  { %5425 = vmatpush3.bf16.msra.mxu1 %v5860_v31 }
 0x747   :  { %5426 = vmatprep.subr.bf16.mxu1 %v5874_v53 }
 0x74a   :  { %5427 = vmatpush3.bf16.msra.mxu1 %v5861_v34  ;;  %v3978_v34 = vpop.permute.xlu1 %3977 }
 0x74b   :  { %5428 = vmatprep.subr.bf16.mxu1 %v5874_v53 }
 0x74e   :  { %5429 = vmatpush3.bf16.msra.mxu1 %v5862_v37 }
 0x74f   :  { %5430 = vmatprep.subr.bf16.mxu1 %v5874_v53 }
 0x752   :  { %5431 = vmatpush3.bf16.msra.mxu1 %v5863_v39 }
 0x753   :  { %5432 = vmatprep.subr.bf16.mxu1 %v5874_v53 }
 0x756   :  { %5433 = vmatpush3.bf16.msra.mxu1 %v3519_v42  ;;  %v5876_v42 = vmov 0.0|0.0  }
 0x757   :  { %5438 = vmatprep.subr.bf16.mxu1 %v5874_v53 }
 0x759   :  { %5435 = vmatmul.mubr.msk.bf16.vlgmr.msra.gmra.mrb[72].mxu1 %vm1326_vm3, %v6414_v13 }
 0x75a   :  { %5440 = vmatprep.mubr.msk.bf16.mxu1 %vm5875_vm2, %v5874_v53 }
 0x814   :  { %v3333_v43 = vpop.f32.mrb[68].mxu1 }
 0x815   :  { %v3340_v45 = vadd.f32 %v3333_v43, %v3027_v19  ;;  %v5420_v46 = vpop.f32.mrb[69].mxu1 }
 0x816   :  { %v3336_v47 = vpop.f32.mrb[70].mxu1 }
 0x817   :  { %v3341_v48 = vadd.f32 %v3336_v47, %v3028_v25  ;;  %v5421_v49 = vpop.f32.mrb[71].mxu1  ;;  %v4075_v47 = vld [vmem:[%s7204_s7] sm:$0x3] }
 0x82c   :  { %v3596_v50 = vpop.f32.mrb[72].mxu1 }
 0x82d   :  { %v3597_v51 = vadd.f32 %v6912_v20, %v3596_v50  ;;  %v5436_v52 = vpop.f32.mrb[73].mxu1  ;;  %v5867_v20 = vld [vmem:[%s7200_s3 + $0x5e8] sm:$0xff]  }
 0x82e   :  { %v3599_v0 = vpop.f32.mrb[74].mxu1 }
 0x82f   :  { %v3600_v16 = vadd.f32 %v6914_v38, %v3599_v0  ;;  %v5437_v21 = vpop.f32.mrb[75].mxu1  ;;  %v5868_v38 = vld [vmem:[%s7200_s3 + $0x5f0] sm:$0xff]  }
 0x831   :  { %v3603_v54 = vpack.c.bf16 %v3600_v16, %v3597_v51 }
 0x833   :  { %5439 = vmatpush3.bf16.msra.mxu1 %v3603_v54 }
 0x834   :  { %5444 = vmatprep.subr.bf16.mxu1 %v5874_v53 }
 0x836   :  { %5441 = vmatmul.mubr.msk.bf16.vlgmr.msra.gmra.mrb[76].mxu1 %vm224_vm0, %v5865_v30 }
 0x837   :  { %5445 = vmatpush3.bf16.msra.mxu1 %v5866_v55  ;;  %5456 = vmatprep.mubr.msk.bf16.mxu1 %vm5875_vm2, %v5874_v53 }
 0x838   :  { %5446 = vmatprep.subr.bf16.mxu1 %v5874_v53 }
 0x83b   :  { %5447 = vmatpush3.bf16.msra.mxu1 %v5867_v20 }
 0x83c   :  { %5448 = vmatprep.subr.bf16.mxu1 %v5874_v53 }
 0x83f   :  { %5449 = vmatpush3.bf16.msra.mxu1 %v5868_v38 }
 0x840   :  { %5450 = vmatprep.subr.bf16.mxu1 %v5874_v53 }
 0x843   :  { %5451 = vmatpush3.bf16.msra.mxu1 %v5869_v56 }
 0x844   :  { %5452 = vmatprep.subr.bf16.mxu1 %v5874_v53 }
 0x847   :  { %5453 = vmatpush3.bf16.msra.mxu1 %v5870_v15 }
 0x848   :  { %5454 = vmatprep.subr.bf16.mxu1 %v5874_v53 }
 0x84b   :  { %5455 = vmatpush3.bf16.msra.mxu1 %v3832_v58 }
 0x84c   :  { %5460 = vmatprep.subr.bf16.mxu1 %v5874_v53 }
 0x84e   :  { %5457 = vmatmul.mubr.msk.bf16.vlgmr.msra.gmra.mrb[80].mxu1 %vm1326_vm3, %v6414_v13  ;;  %v3986_v13 = vld [vmem:[%s7203_s6 + $0x10] sm:$0xff] }
 0x84f   :  { %5462 = vmatprep.mubr.msk.bf16.mxu1 %vm5875_vm2, %v5874_v53  ;;  %v5498_v2 = vpack.c.bf16 %v3987_v61, %v3986_v13 }
 0x851   :  { %5499 = vmatprep.subr.bf16.mxu0 %v5498_v2 }
 0x852   :  { %5501 = vmatpush3.bf16.msra.mxu0 %v5498_v2 }
 0x853   :  { %5503 = vmatprep.subr.bf16.mxu0 %v5502_v5 }
 0x856   :  { %5505 = vmatpush3.bf16.msra.mxu0 %v5502_v5 }
 0x909   :  { %v3646_v6 = vpop.f32.mrb[76].mxu1 }
 0x90a   :  { %v3653_v7 = vadd.f32 %v3646_v6, %v3340_v45  ;;  %v5442_v24 = vpop.f32.mrb[77].mxu1 }
 0x90b   :  { %v3649_v27 = vpop.f32.mrb[78].mxu1 }
 0x90c   :  { %v3654_v9 = vadd.f32 %v3649_v27, %v3341_v48  ;;  %v5443_v10 = vpop.f32.mrb[79].mxu1  ;;  %v4080_v48 = vpop.permute.xlu0 %4079 }
 0x921   :  { %v3909_v12 = vpop.f32.mrb[80].mxu1 }
 0x922   :  { %v3910_v14 = vadd.f32 %v6916_v41, %v3909_v12  ;;  %v5458_v18 = vpop.f32.mrb[81].mxu1  ;;  %v3991_v41 = vld [vmem:[%s7203_s6 + $0x38] sm:$0xff] }
 0x923   :  { %v3912_v19 = vpop.f32.mrb[82].mxu1  ;;  %v5506_v29 = vpack.c.bf16 %v3991_v41, %v3990_v28 }
 0x924   :  { %v3913_v22 = vadd.f32 %v6918_v44, %v3912_v19  ;;  %v5459_v23 = vpop.f32.mrb[83].mxu1  ;;  %v3992_v44 = vld [vmem:[%s7203_s6 + $0x40] sm:$0xff] }
 0x925   :  { %5507 = vmatprep.subr.bf16.mxu0 %v5506_v29 }
 0x926   :  { %v3916_v25 = vpack.c.bf16 %v3913_v22, %v3910_v14  ;;  %5509 = vmatpush3.bf16.msra.mxu0 %v5506_v29 }
 0x927   :  { %5482 = vmatprep.subr.mxu0 %v3992_v44 }
 0x928   :  { %5461 = vmatpush3.bf16.msra.mxu1 %v3916_v25 }
 0x92a   :  { %5483 = vmatpush3.msra.mxu0 %v3992_v44 }
 0x92b   :  { %5463 = vmatmul.mubr.msk.bf16.vlgmr.msra.gmra.mrb[84].mxu1 %vm224_vm0, %v5872_v26  ;;  %5510 = vmatprep.subr.bf16.mxu0 %v5876_v42 }
 0x9fe   :  { %v3959_v11 = vpop.f32.mrb[84].mxu1 }
 0x9ff   :  { %v3966_v32 = vadd.f32 %v3959_v11, %v3653_v7  ;;  %v5464_v33 = vpop.f32.mrb[85].mxu1 }
 0xa00   :  { %v3962_v17 = vpop.f32.mrb[86].mxu1 }
 0xa01   :  { %v3980_v35 = vadd.f32 %v3973_v8, %v3966_v32  ;;  %v3967_v36 = vadd.f32 %v3962_v17, %v3654_v9  ;;  %v5465_v31 = vpop.f32.mrb[87].mxu1 }
 0xa03   :  { %v3982_v37 = vmax.f32 %v3980_v35, 0.0  ;;  %v3981_v39 = vadd.f32 %v3978_v34, %v3967_v36 }
 0xa05   :  { %v3983_v40 = vmax.f32 %v3981_v39, 0.0  ;;  %5484 = vmatprep.mubr.msk.f32.mxu0 %vm3993_vm4, %v3982_v37 }
 0xa07   :  { %5485 = vmatmul.mubr.msk.f32.vlgmr.msra.gmra.mrb[52].mxu0 %vm3993_vm4, %v3983_v40 }
 0xa08   :  { %5491 = vmatprep.mubr.msk.f32.mxu0 %vm5875_vm2, %v5874_v53 }
 0xada   :  { %v5486_v43 = vpop.f32.mrb[52].mxu0 }
 0xadb   :  { %v4066_v45 = vpop.f32.mrb[53].mxu0 }
 0xadc   :  { %v5511_v46 = vpack.c.bf16 %v5486_v43, %v4066_v45 }
 0xade   :  { %5512 = vmatpush3.bf16.msra.mxu0 %v5511_v46 }
 0xae1   :  { %5492 = vmatmul.mubr.msk.f32.vlgmr.msra.gmra.mrb[54].mxu0 %vm224_vm0, %v4075_v47 }
 0xbb4   :  { %v4151_v49 = vpop.f32.mrb[54].mxu0 }
 0xbb5   :  { %v4152_v50 = vadd.f32 %v4151_v49, %v4080_v48  ;;  %v5493_v51 = vpop.f32.mrb[55].mxu0 }
 0xbb7   :  { %4156 = vst.msk [vmem:[%s7205_s9] sm:$0x3] %vm4155_vm5, %v4152_v50 }

</bundles_post_ra>
